<compile_context>
chip_gen: v7x
topology: tpu7x:2x2x1
jax: 0.10.0
libtpu: 0.0.40
codegen_flags: <defaults>
</compile_context>

<pallas_src>
import functools

import jax
import jax.numpy as jnp
from jax.experimental import pallas as pl
from jax.experimental.pallas import tpu as pltpu


def code2seq_kernel(x_ref, wif_ref, wib_ref, whh_ref, b_ref, nv_ref,
                    pw_ref, pb_ref, sel_ref, out_ref,
                    *, n_layers, L, Mp, D):
    f32 = jnp.float32
    zero_state = jnp.zeros((Mp, D), f32)

    seq_f = None          # previous layer's fwd output sequence, (L*Mp, D)
    seq_b = None          # previous layer's bwd output sequence (time order)
    h_f = h_b = None      # last-layer final hidden states

    for layer in range(n_layers):
        last = (layer == n_layers - 1)

        wif0 = wif_ref[layer, 0]          # (D, 4D)
        wif1 = wif_ref[layer, 1]
        whh0 = whh_ref[layer, 0]          # (D, 4D)
        whh1 = whh_ref[layer, 1]
        b0 = b_ref[layer, 0]              # (1, 4D)
        b1 = b_ref[layer, 1]

        # ---- hoisted input projection: one matmul per direction over the whole
        # sequence (bias folded in) -------------------------------------------
        if layer == 0:
            x = x_ref[...]                                    # (L*Mp, D)
            gx_f = jnp.dot(x, wif0, preferred_element_type=f32) + b0
            gx_b = jnp.dot(x, wif1, preferred_element_type=f32) + b1
        else:
            wib0 = wib_ref[layer, 0]
            wib1 = wib_ref[layer, 1]
            gx_f = (jnp.dot(seq_f, wif0, preferred_element_type=f32)
                    + jnp.dot(seq_b, wib0, preferred_element_type=f32) + b0)
            gx_b = (jnp.dot(seq_f, wif1, preferred_element_type=f32)
                    + jnp.dot(seq_b, wib1, preferred_element_type=f32) + b1)

        # ---- fused fwd/bwd recurrence, fully unrolled over time --------------
        h_f = zero_state
        c_f = zero_state
        h_b = zero_state
        c_b = zero_state
        outs_f = [None] * L
        outs_b = [None] * L
        for t in range(L):
            tb = L - 1 - t
            g_f = (gx_f[t * Mp:(t + 1) * Mp]
                   + jnp.dot(h_f, whh0, preferred_element_type=f32))   # (Mp, 4D)
            g_b = (gx_b[tb * Mp:(tb + 1) * Mp]
                   + jnp.dot(h_b, whh1, preferred_element_type=f32))
            # gates repacked to (i, f, o, g): sigmoid once over 3D, tanh once on D
            s_f = jax.nn.sigmoid(g_f[:, :3 * D])
            s_b = jax.nn.sigmoid(g_b[:, :3 * D])
            gg_f = jnp.tanh(g_f[:, 3 * D:])
            gg_b = jnp.tanh(g_b[:, 3 * D:])
            c_f = s_f[:, D:2 * D] * c_f + s_f[:, :D] * gg_f
            c_b = s_b[:, D:2 * D] * c_b + s_b[:, :D] * gg_b
            h_f = s_f[:, 2 * D:3 * D] * jnp.tanh(c_f)
            h_b = s_b[:, 2 * D:3 * D] * jnp.tanh(c_b)
            if not last:                       # last layer: only final h needed
                outs_f[t] = h_f
                outs_b[tb] = h_b
        if not last:
            seq_f = jnp.concatenate(outs_f, axis=0)            # (L*Mp, D)
            seq_b = jnp.concatenate(outs_b, axis=0)

    # ---- joint projection + tanh, with split weights (no lane concat) --------
    pw_f = pw_ref[0:D]                 # (D, D)
    pw_b = pw_ref[D:2 * D]             # (D, D)
    pw_nv = pw_ref[2 * D:4 * D]        # (2D, D)
    path = jnp.tanh(
        jnp.dot(h_f, pw_f, preferred_element_type=f32)
        + jnp.dot(h_b, pw_b, preferred_element_type=f32)
        + jnp.dot(nv_ref[...], pw_nv, preferred_element_type=f32)
        + pb_ref[...])                                         # (Mp, D)

    # ---- mean over N via one tiny matmul with the (B, Mp) averaging matrix ---
    out_ref[...] = jnp.dot(sel_ref[...], path, preferred_element_type=f32)


def code2seq_encoder(node_embed, node_val_embed, params, *, n_layers, embed_dim):
    L, N, B, D = node_embed.shape
    assert D == embed_dim
    M = N * B
    Mp = ((M + 7) // 8) * 8            # pad rows to a sublane-tile multiple

    x = node_embed.reshape(L, M, D).astype(jnp.float32)
    x = jnp.pad(x, ((0, 0), (0, Mp - M), (0, 0))).reshape(L * Mp, D)

    nv = jnp.concatenate([node_val_embed[0], node_val_embed[1]], axis=-1)
    nv = nv.reshape(M, 2 * D).astype(jnp.float32)
    nv = jnp.pad(nv, ((0, Mp - M), (0, 0)))                    # (Mp, 2D)

    # (B, Mp) averaging matrix: out[b] = (1/N) * sum_n path[n*B + b]
    sel = jnp.tile(jnp.eye(B, dtype=jnp.float32), (1, N)) / float(N)
    sel = jnp.pad(sel, ((0, 0), (0, Mp - M)))                  # padded rows ignored

    # Repack gate order (i,f,g,o) -> (i,f,o,g) so sigmoid gates are contiguous.
    def reorder(w):
        return jnp.concatenate(
            [w[0:D], w[D:2 * D], w[3 * D:4 * D], w[2 * D:3 * D]], axis=0)

    # Pack weights with stacks (no per-element .at[].set scatters).
    wif_rows, wib_rows, whh_rows, b_rows = [], [], [], []
    for layer in range(n_layers):
        wif_d, wib_d, whh_d, b_d = [], [], [], []
        for d in range(2):
            wi = reorder(params["w_ih"][layer][d])             # (4D, in_dim)
            wif_d.append(wi[:, 0:D].T)                         # (D, 4D)
            if layer > 0:
                wib_d.append(wi[:, D:2 * D].T)                 # (D, 4D)
            else:
                wib_d.append(jnp.zeros((D, 4 * D), jnp.float32))  # unused half
            whh_d.append(reorder(params["w_hh"][layer][d]).T)  # (D, 4D)
            b_d.append(reorder(params["b_ih"][layer][d]
                               + params["b_hh"][layer][d]).reshape(1, 4 * D))
        wif_rows.append(jnp.stack(wif_d))
        wib_rows.append(jnp.stack(wib_d))
        whh_rows.append(jnp.stack(whh_d))
        b_rows.append(jnp.stack(b_d))
    w_ihf = jnp.stack(wif_rows).astype(jnp.float32)            # (nl, 2, D, 4D)
    w_ihb = jnp.stack(wib_rows).astype(jnp.float32)
    w_hh = jnp.stack(whh_rows).astype(jnp.float32)
    bias = jnp.stack(b_rows).astype(jnp.float32)               # (nl, 2, 1, 4D)

    pw = params["proj_w"].T.astype(jnp.float32)                # (4D, D)
    pb = params["proj_b"].reshape(1, D).astype(jnp.float32)

    kernel = functools.partial(code2seq_kernel, n_layers=n_layers,
                               L=L, Mp=Mp, D=D)
    return pl.pallas_call(
        kernel,
        out_shape=jax.ShapeDtypeStruct((B, D), jnp.float32),
        in_specs=[pl.BlockSpec(memory_space=pltpu.MemorySpace.VMEM)] * 9,
        out_specs=pl.BlockSpec(memory_space=pltpu.MemorySpace.VMEM),
    )(x, w_ihf, w_ihb, w_hh, bias, nv, pw, pb, sel)


# ---------------- deterministic parameter init (PyTorch-style uniform) ----------
def init_params(key, n_layers, D):
    k = 1.0 / (D ** 0.5)
    params = {"w_ih": [], "w_hh": [], "b_ih": [], "b_hh": []}
    for layer in range(n_layers):
        in_dim = D if layer == 0 else 2 * D
        wi_l, wh_l, bi_l, bh_l = [], [], [], []
        for _ in range(2):
            key, k1, k2, k3, k4 = jax.random.split(key, 5)
            wi_l.append(jax.random.uniform(k1, (4 * D, in_dim), jnp.float32, -k, k))
            wh_l.append(jax.random.uniform(k2, (4 * D, D), jnp.float32, -k, k))
            bi_l.append(jax.random.uniform(k3, (4 * D,), jnp.float32, -k, k))
            bh_l.append(jax.random.uniform(k4, (4 * D,), jnp.float32, -k, k))
        params["w_ih"].append(wi_l)
        params["w_hh"].append(wh_l)
        params["b_ih"].append(bi_l)
        params["b_hh"].append(bh_l)
    key, k1, k2 = jax.random.split(key, 3)
    kp = 1.0 / ((4 * D) ** 0.5)
    params["proj_w"] = jax.random.uniform(k1, (D, 4 * D), jnp.float32, -kp, kp)
    params["proj_b"] = jax.random.uniform(k2, (D,), jnp.float32, -kp, kp)
    return params


# ---------------- pure-JAX reference (mirrors PyTorch LSTM semantics) -----------
def reference(node_embed, node_val_embed, params, *, n_layers, embed_dim):
    L, N, B, D = node_embed.shape
    M = N * B
    layer_in = node_embed.reshape(L, M, D)
    hfinal = None
    for layer in range(n_layers):
        outs, hfinal = [], []
        for d in range(2):
            w_ih = params["w_ih"][layer][d]
            w_hh = params["w_hh"][layer][d]
            b = params["b_ih"][layer][d] + params["b_hh"][layer][d]
            seq = layer_in if d == 0 else layer_in[::-1]
            h = jnp.zeros((M, D), jnp.float32)
            c = jnp.zeros((M, D), jnp.float32)
            hs = []
            for t in range(L):
                gates = seq[t] @ w_ih.T + h @ w_hh.T + b
                i = jax.nn.sigmoid(gates[:, 0:D])
                f = jax.nn.sigmoid(gates[:, D:2 * D])
                g = jnp.tanh(gates[:, 2 * D:3 * D])
                o = jax.nn.sigmoid(gates[:, 3 * D:4 * D])
                c = f * c + i * g
                h = o * jnp.tanh(c)
                hs.append(h)
            hs = jnp.stack(hs)
            if d == 1:
                hs = hs[::-1]
            outs.append(hs)
            hfinal.append(h)
        layer_in = jnp.concatenate(outs, axis=-1)
    state = jnp.stack(hfinal).reshape(2, N, B, D)
    joint = jnp.concatenate([state[0], state[1],
                             node_val_embed[0], node_val_embed[1]], axis=-1)
    path = jnp.tanh(joint @ params["proj_w"].T + params["proj_b"])
    return jnp.mean(path, axis=0)


if __name__ == "__main__":
    n_layers, D = 2, 32
    L, N, B = 8, 3, 2

    key = jax.random.PRNGKey(0)
    key, k_ne, k_nv, k_p = jax.random.split(key, 4)
    node_embed = jax.random.normal(k_ne, (L, N, B, D), jnp.float32)
    node_val_embed = jax.random.normal(k_nv, (2, N, B, D), jnp.float32)
    params = init_params(k_p, n_layers, D)

    out = code2seq_encoder(node_embed, node_val_embed, params,
                           n_layers=n_layers, embed_dim=D)
    out = jax.block_until_ready(out)

    ref = jax.block_until_ready(
        reference(node_embed, node_val_embed, params,
                  n_layers=n_layers, embed_dim=D))

    assert out.shape == (B, D), out.shape
    assert jnp.allclose(out, ref, rtol=5e-3, atol=5e-3), (
        float(jnp.max(jnp.abs(out - ref))))
    print("KERNEL_OK")
</pallas_src>

<mosaic_0001>
module attributes {stable_mosaic.version = 11 : i64} {
  func.func @code2seq_kernel(%arg0: memref<64x32xf32, #tpu.memory_space<vmem>>, %arg1: memref<2x2x32x128xf32, #tpu.memory_space<vmem>>, %arg2: memref<2x2x32x128xf32, #tpu.memory_space<vmem>>, %arg3: memref<2x2x32x128xf32, #tpu.memory_space<vmem>>, %arg4: memref<2x2x1x128xf32, #tpu.memory_space<vmem>>, %arg5: memref<8x64xf32, #tpu.memory_space<vmem>>, %arg6: memref<128x32xf32, #tpu.memory_space<vmem>>, %arg7: memref<1x32xf32, #tpu.memory_space<vmem>>, %arg8: memref<2x8xf32, #tpu.memory_space<vmem>>, %arg9: memref<2x32xf32, #tpu.memory_space<vmem>>) attributes {dimension_semantics = [], scalar_prefetch = 0 : i64, scratch_operands = 0 : i64, tpu.core_type = #tpu.core_type<tc>} {
    %cst = arith.constant 0.000000e+00 : f32
    %0 = vector.broadcast %cst : f32 to vector<8x32xf32>
    %c0 = arith.constant 0 : index
    %c0_0 = arith.constant 0 : index
    %c0_1 = arith.constant 0 : index
    %c0_2 = arith.constant 0 : index
    %1 = vector.load %arg1[%c0, %c0_0, %c0_1, %c0_2] : memref<2x2x32x128xf32, #tpu.memory_space<vmem>>, vector<1x1x32x128xf32>
    %2 = vector.shape_cast %1 : vector<1x1x32x128xf32> to vector<32x128xf32>
    %c0_3 = arith.constant 0 : index
    %c1 = arith.constant 1 : index
    %c0_4 = arith.constant 0 : index
    %c0_5 = arith.constant 0 : index
    %3 = vector.load %arg1[%c0_3, %c1, %c0_4, %c0_5] : memref<2x2x32x128xf32, #tpu.memory_space<vmem>>, vector<1x1x32x128xf32>
    %4 = vector.shape_cast %3 : vector<1x1x32x128xf32> to vector<32x128xf32>
    %c0_6 = arith.constant 0 : index
    %c0_7 = arith.constant 0 : index
    %c0_8 = arith.constant 0 : index
    %c0_9 = arith.constant 0 : index
    %5 = vector.load %arg3[%c0_6, %c0_7, %c0_8, %c0_9] : memref<2x2x32x128xf32, #tpu.memory_space<vmem>>, vector<1x1x32x128xf32>
    %6 = vector.shape_cast %5 : vector<1x1x32x128xf32> to vector<32x128xf32>
    %c0_10 = arith.constant 0 : index
    %c1_11 = arith.constant 1 : index
    %c0_12 = arith.constant 0 : index
    %c0_13 = arith.constant 0 : index
    %7 = vector.load %arg3[%c0_10, %c1_11, %c0_12, %c0_13] : memref<2x2x32x128xf32, #tpu.memory_space<vmem>>, vector<1x1x32x128xf32>
    %8 = vector.shape_cast %7 : vector<1x1x32x128xf32> to vector<32x128xf32>
    %c0_14 = arith.constant 0 : index
    %c0_15 = arith.constant 0 : index
    %c0_16 = arith.constant 0 : index
    %c0_17 = arith.constant 0 : index
    %9 = vector.load %arg4[%c0_14, %c0_15, %c0_16, %c0_17] : memref<2x2x1x128xf32, #tpu.memory_space<vmem>>, vector<1x1x1x128xf32>
    %10 = vector.shape_cast %9 : vector<1x1x1x128xf32> to vector<1x128xf32>
    %c0_18 = arith.constant 0 : index
    %c1_19 = arith.constant 1 : index
    %c0_20 = arith.constant 0 : index
    %c0_21 = arith.constant 0 : index
    %11 = vector.load %arg4[%c0_18, %c1_19, %c0_20, %c0_21] : memref<2x2x1x128xf32, #tpu.memory_space<vmem>>, vector<1x1x1x128xf32>
    %12 = vector.shape_cast %11 : vector<1x1x1x128xf32> to vector<1x128xf32>
    %c0_22 = arith.constant 0 : index
    %c0_23 = arith.constant 0 : index
    %13 = vector.load %arg0[%c0_22, %c0_23] : memref<64x32xf32, #tpu.memory_space<vmem>>, vector<64x32xf32>
    %cst_24 = arith.constant dense<0.000000e+00> : vector<64x128xf32>
    %14 = tpu.matmul %13, %2, %cst_24 {dimension_numbers = #tpu.dot_dimension_numbers<[1], [0], [0], [1], [0, 0, 1, 1], [], []>} : vector<64x32xf32>, vector<32x128xf32>, vector<64x128xf32> -> vector<64x128xf32>
    %15 = vector.broadcast %10 : vector<1x128xf32> to vector<64x128xf32>
    %16 = arith.addf %14, %15 : vector<64x128xf32>
    %cst_25 = arith.constant dense<0.000000e+00> : vector<64x128xf32>
    %17 = tpu.matmul %13, %4, %cst_25 {dimension_numbers = #tpu.dot_dimension_numbers<[1], [0], [0], [1], [0, 0, 1, 1], [], []>} : vector<64x32xf32>, vector<32x128xf32>, vector<64x128xf32> -> vector<64x128xf32>
    %18 = vector.broadcast %12 : vector<1x128xf32> to vector<64x128xf32>
    %19 = arith.addf %17, %18 : vector<64x128xf32>
    %20 = vector.extract_strided_slice %16 {offsets = [0, 0], sizes = [8, 128], strides = [1, 1]} : vector<64x128xf32> to vector<8x128xf32>
    %cst_26 = arith.constant dense<0.000000e+00> : vector<8x128xf32>
    %21 = tpu.matmul %0, %6, %cst_26 {dimension_numbers = #tpu.dot_dimension_numbers<[1], [0], [0], [1], [0, 0, 1, 1], [], []>} : vector<8x32xf32>, vector<32x128xf32>, vector<8x128xf32> -> vector<8x128xf32>
    %22 = arith.addf %20, %21 : vector<8x128xf32>
    %23 = vector.extract_strided_slice %19 {offsets = [56, 0], sizes = [8, 128], strides = [1, 1]} : vector<64x128xf32> to vector<8x128xf32>
    %cst_27 = arith.constant dense<0.000000e+00> : vector<8x128xf32>
    %24 = tpu.matmul %0, %8, %cst_27 {dimension_numbers = #tpu.dot_dimension_numbers<[1], [0], [0], [1], [0, 0, 1, 1], [], []>} : vector<8x32xf32>, vector<32x128xf32>, vector<8x128xf32> -> vector<8x128xf32>
    %25 = arith.addf %23, %24 : vector<8x128xf32>
    %26 = vector.extract_strided_slice %22 {offsets = [0, 0], sizes = [8, 96], strides = [1, 1]} : vector<8x128xf32> to vector<8x96xf32>
    %27 = arith.negf %26 : vector<8x96xf32>
    %28 = math.exp %27 : vector<8x96xf32>
    %cst_28 = arith.constant 1.000000e+00 : f32
    %29 = vector.broadcast %cst_28 : f32 to vector<8x96xf32>
    %30 = arith.addf %29, %28 : vector<8x96xf32>
    %31 = arith.divf %29, %30 : vector<8x96xf32>
    %32 = vector.extract_strided_slice %25 {offsets = [0, 0], sizes = [8, 96], strides = [1, 1]} : vector<8x128xf32> to vector<8x96xf32>
    %33 = arith.negf %32 : vector<8x96xf32>
    %34 = math.exp %33 : vector<8x96xf32>
    %cst_29 = arith.constant 1.000000e+00 : f32
    %35 = vector.broadcast %cst_29 : f32 to vector<8x96xf32>
    %36 = arith.addf %35, %34 : vector<8x96xf32>
    %37 = arith.divf %35, %36 : vector<8x96xf32>
    %38 = vector.extract_strided_slice %22 {offsets = [0, 96], sizes = [8, 32], strides = [1, 1]} : vector<8x128xf32> to vector<8x32xf32>
    %39 = math.tanh %38 : vector<8x32xf32>
    %40 = vector.extract_strided_slice %25 {offsets = [0, 96], sizes = [8, 32], strides = [1, 1]} : vector<8x128xf32> to vector<8x32xf32>
    %41 = math.tanh %40 : vector<8x32xf32>
    %42 = vector.extract_strided_slice %31 {offsets = [0, 32], sizes = [8, 32], strides = [1, 1]} : vector<8x96xf32> to vector<8x32xf32>
    %43 = arith.mulf %42, %0 : vector<8x32xf32>
    %44 = vector.extract_strided_slice %31 {offsets = [0, 0], sizes = [8, 32], strides = [1, 1]} : vector<8x96xf32> to vector<8x32xf32>
    %45 = arith.mulf %44, %39 : vector<8x32xf32>
    %46 = arith.addf %43, %45 : vector<8x32xf32>
    %47 = vector.extract_strided_slice %37 {offsets = [0, 32], sizes = [8, 32], strides = [1, 1]} : vector<8x96xf32> to vector<8x32xf32>
    %48 = arith.mulf %47, %0 : vector<8x32xf32>
    %49 = vector.extract_strided_slice %37 {offsets = [0, 0], sizes = [8, 32], strides = [1, 1]} : vector<8x96xf32> to vector<8x32xf32>
    %50 = arith.mulf %49, %41 : vector<8x32xf32>
    %51 = arith.addf %48, %50 : vector<8x32xf32>
    %52 = vector.extract_strided_slice %31 {offsets = [0, 64], sizes = [8, 32], strides = [1, 1]} : vector<8x96xf32> to vector<8x32xf32>
    %53 = math.tanh %46 : vector<8x32xf32>
    %54 = arith.mulf %52, %53 : vector<8x32xf32>
    %55 = vector.extract_strided_slice %37 {offsets = [0, 64], sizes = [8, 32], strides = [1, 1]} : vector<8x96xf32> to vector<8x32xf32>
    %56 = math.tanh %51 : vector<8x32xf32>
    %57 = arith.mulf %55, %56 : vector<8x32xf32>
    %58 = vector.extract_strided_slice %16 {offsets = [8, 0], sizes = [8, 128], strides = [1, 1]} : vector<64x128xf32> to vector<8x128xf32>
    %cst_30 = arith.constant dense<0.000000e+00> : vector<8x128xf32>
    %59 = tpu.matmul %54, %6, %cst_30 {dimension_numbers = #tpu.dot_dimension_numbers<[1], [0], [0], [1], [0, 0, 1, 1], [], []>} : vector<8x32xf32>, vector<32x128xf32>, vector<8x128xf32> -> vector<8x128xf32>
    %60 = arith.addf %58, %59 : vector<8x128xf32>
    %61 = vector.extract_strided_slice %19 {offsets = [48, 0], sizes = [8, 128], strides = [1, 1]} : vector<64x128xf32> to vector<8x128xf32>
    %cst_31 = arith.constant dense<0.000000e+00> : vector<8x128xf32>
    %62 = tpu.matmul %57, %8, %cst_31 {dimension_numbers = #tpu.dot_dimension_numbers<[1], [0], [0], [1], [0, 0, 1, 1], [], []>} : vector<8x32xf32>, vector<32x128xf32>, vector<8x128xf32> -> vector<8x128xf32>
    %63 = arith.addf %61, %62 : vector<8x128xf32>
    %64 = vector.extract_strided_slice %60 {offsets = [0, 0], sizes = [8, 96], strides = [1, 1]} : vector<8x128xf32> to vector<8x96xf32>
    %65 = arith.negf %64 : vector<8x96xf32>
    %66 = math.exp %65 : vector<8x96xf32>
    %cst_32 = arith.constant 1.000000e+00 : f32
    %67 = vector.broadcast %cst_32 : f32 to vector<8x96xf32>
    %68 = arith.addf %67, %66 : vector<8x96xf32>
    %69 = arith.divf %67, %68 : vector<8x96xf32>
    %70 = vector.extract_strided_slice %63 {offsets = [0, 0], sizes = [8, 96], strides = [1, 1]} : vector<8x128xf32> to vector<8x96xf32>
    %71 = arith.negf %70 : vector<8x96xf32>
    %72 = math.exp %71 : vector<8x96xf32>
    %cst_33 = arith.constant 1.000000e+00 : f32
    %73 = vector.broadcast %cst_33 : f32 to vector<8x96xf32>
    %74 = arith.addf %73, %72 : vector<8x96xf32>
    %75 = arith.divf %73, %74 : vector<8x96xf32>
    %76 = vector.extract_strided_slice %60 {offsets = [0, 96], sizes = [8, 32], strides = [1, 1]} : vector<8x128xf32> to vector<8x32xf32>
    %77 = math.tanh %76 : vector<8x32xf32>
    %78 = vector.extract_strided_slice %63 {offsets = [0, 96], sizes = [8, 32], strides = [1, 1]} : vector<8x128xf32> to vector<8x32xf32>
    %79 = math.tanh %78 : vector<8x32xf32>
    %80 = vector.extract_strided_slice %69 {offsets = [0, 32], sizes = [8, 32], strides = [1, 1]} : vector<8x96xf32> to vector<8x32xf32>
    %81 = arith.mulf %80, %46 : vector<8x32xf32>
    %82 = vector.extract_strided_slice %69 {offsets = [0, 0], sizes = [8, 32], strides = [1, 1]} : vector<8x96xf32> to vector<8x32xf32>
    %83 = arith.mulf %82, %77 : vector<8x32xf32>
    %84 = arith.addf %81, %83 : vector<8x32xf32>
    %85 = vector.extract_strided_slice %75 {offsets = [0, 32], sizes = [8, 32], strides = [1, 1]} : vector<8x96xf32> to vector<8x32xf32>
    %86 = arith.mulf %85, %51 : vector<8x32xf32>
    %87 = vector.extract_strided_slice %75 {offsets = [0, 0], sizes = [8, 32], strides = [1, 1]} : vector<8x96xf32> to vector<8x32xf32>
    %88 = arith.mulf %87, %79 : vector<8x32xf32>
    %89 = arith.addf %86, %88 : vector<8x32xf32>
    %90 = vector.extract_strided_slice %69 {offsets = [0, 64], sizes = [8, 32], strides = [1, 1]} : vector<8x96xf32> to vector<8x32xf32>
    %91 = math.tanh %84 : vector<8x32xf32>
    %92 = arith.mulf %90, %91 : vector<8x32xf32>
    %93 = vector.extract_strided_slice %75 {offsets = [0, 64], sizes = [8, 32], strides = [1, 1]} : vector<8x96xf32> to vector<8x32xf32>
    %94 = math.tanh %89 : vector<8x32xf32>
    %95 = arith.mulf %93, %94 : vector<8x32xf32>
    %96 = vector.extract_strided_slice %16 {offsets = [16, 0], sizes = [8, 128], strides = [1, 1]} : vector<64x128xf32> to vector<8x128xf32>
    %cst_34 = arith.constant dense<0.000000e+00> : vector<8x128xf32>
    %97 = tpu.matmul %92, %6, %cst_34 {dimension_numbers = #tpu.dot_dimension_numbers<[1], [0], [0], [1], [0, 0, 1, 1], [], []>} : vector<8x32xf32>, vector<32x128xf32>, vector<8x128xf32> -> vector<8x128xf32>
    %98 = arith.addf %96, %97 : vector<8x128xf32>
    %99 = vector.extract_strided_slice %19 {offsets = [40, 0], sizes = [8, 128], strides = [1, 1]} : vector<64x128xf32> to vector<8x128xf32>
    %cst_35 = arith.constant dense<0.000000e+00> : vector<8x128xf32>
    %100 = tpu.matmul %95, %8, %cst_35 {dimension_numbers = #tpu.dot_dimension_numbers<[1], [0], [0], [1], [0, 0, 1, 1], [], []>} : vector<8x32xf32>, vector<32x128xf32>, vector<8x128xf32> -> vector<8x128xf32>
    %101 = arith.addf %99, %100 : vector<8x128xf32>
    %102 = vector.extract_strided_slice %98 {offsets = [0, 0], sizes = [8, 96], strides = [1, 1]} : vector<8x128xf32> to vector<8x96xf32>
    %103 = arith.negf %102 : vector<8x96xf32>
    %104 = math.exp %103 : vector<8x96xf32>
    %cst_36 = arith.constant 1.000000e+00 : f32
    %105 = vector.broadcast %cst_36 : f32 to vector<8x96xf32>
    %106 = arith.addf %105, %104 : vector<8x96xf32>
    %107 = arith.divf %105, %106 : vector<8x96xf32>
    %108 = vector.extract_strided_slice %101 {offsets = [0, 0], sizes = [8, 96], strides = [1, 1]} : vector<8x128xf32> to vector<8x96xf32>
    %109 = arith.negf %108 : vector<8x96xf32>
    %110 = math.exp %109 : vector<8x96xf32>
    %cst_37 = arith.constant 1.000000e+00 : f32
    %111 = vector.broadcast %cst_37 : f32 to vector<8x96xf32>
    %112 = arith.addf %111, %110 : vector<8x96xf32>
    %113 = arith.divf %111, %112 : vector<8x96xf32>
    %114 = vector.extract_strided_slice %98 {offsets = [0, 96], sizes = [8, 32], strides = [1, 1]} : vector<8x128xf32> to vector<8x32xf32>
    %115 = math.tanh %114 : vector<8x32xf32>
    %116 = vector.extract_strided_slice %101 {offsets = [0, 96], sizes = [8, 32], strides = [1, 1]} : vector<8x128xf32> to vector<8x32xf32>
    %117 = math.tanh %116 : vector<8x32xf32>
    %118 = vector.extract_strided_slice %107 {offsets = [0, 32], sizes = [8, 32], strides = [1, 1]} : vector<8x96xf32> to vector<8x32xf32>
    %119 = arith.mulf %118, %84 : vector<8x32xf32>
    %120 = vector.extract_strided_slice %107 {offsets = [0, 0], sizes = [8, 32], strides = [1, 1]} : vector<8x96xf32> to vector<8x32xf32>
    %121 = arith.mulf %120, %115 : vector<8x32xf32>
    %122 = arith.addf %119, %121 : vector<8x32xf32>
    %123 = vector.extract_strided_slice %113 {offsets = [0, 32], sizes = [8, 32], strides = [1, 1]} : vector<8x96xf32> to vector<8x32xf32>
    %124 = arith.mulf %123, %89 : vector<8x32xf32>
    %125 = vector.extract_strided_slice %113 {offsets = [0, 0], sizes = [8, 32], strides = [1, 1]} : vector<8x96xf32> to vector<8x32xf32>
    %126 = arith.mulf %125, %117 : vector<8x32xf32>
    %127 = arith.addf %124, %126 : vector<8x32xf32>
    %128 = vector.extract_strided_slice %107 {offsets = [0, 64], sizes = [8, 32], strides = [1, 1]} : vector<8x96xf32> to vector<8x32xf32>
    %129 = math.tanh %122 : vector<8x32xf32>
    %130 = arith.mulf %128, %129 : vector<8x32xf32>
    %131 = vector.extract_strided_slice %113 {offsets = [0, 64], sizes = [8, 32], strides = [1, 1]} : vector<8x96xf32> to vector<8x32xf32>
    %132 = math.tanh %127 : vector<8x32xf32>
    %133 = arith.mulf %131, %132 : vector<8x32xf32>
    %134 = vector.extract_strided_slice %16 {offsets = [24, 0], sizes = [8, 128], strides = [1, 1]} : vector<64x128xf32> to vector<8x128xf32>
    %cst_38 = arith.constant dense<0.000000e+00> : vector<8x128xf32>
    %135 = tpu.matmul %130, %6, %cst_38 {dimension_numbers = #tpu.dot_dimension_numbers<[1], [0], [0], [1], [0, 0, 1, 1], [], []>} : vector<8x32xf32>, vector<32x128xf32>, vector<8x128xf32> -> vector<8x128xf32>
    %136 = arith.addf %134, %135 : vector<8x128xf32>
    %137 = vector.extract_strided_slice %19 {offsets = [32, 0], sizes = [8, 128], strides = [1, 1]} : vector<64x128xf32> to vector<8x128xf32>
    %cst_39 = arith.constant dense<0.000000e+00> : vector<8x128xf32>
    %138 = tpu.matmul %133, %8, %cst_39 {dimension_numbers = #tpu.dot_dimension_numbers<[1], [0], [0], [1], [0, 0, 1, 1], [], []>} : vector<8x32xf32>, vector<32x128xf32>, vector<8x128xf32> -> vector<8x128xf32>
    %139 = arith.addf %137, %138 : vector<8x128xf32>
    %140 = vector.extract_strided_slice %136 {offsets = [0, 0], sizes = [8, 96], strides = [1, 1]} : vector<8x128xf32> to vector<8x96xf32>
    %141 = arith.negf %140 : vector<8x96xf32>
    %142 = math.exp %141 : vector<8x96xf32>
    %cst_40 = arith.constant 1.000000e+00 : f32
    %143 = vector.broadcast %cst_40 : f32 to vector<8x96xf32>
    %144 = arith.addf %143, %142 : vector<8x96xf32>
    %145 = arith.divf %143, %144 : vector<8x96xf32>
    %146 = vector.extract_strided_slice %139 {offsets = [0, 0], sizes = [8, 96], strides = [1, 1]} : vector<8x128xf32> to vector<8x96xf32>
    %147 = arith.negf %146 : vector<8x96xf32>
    %148 = math.exp %147 : vector<8x96xf32>
    %cst_41 = arith.constant 1.000000e+00 : f32
    %149 = vector.broadcast %cst_41 : f32 to vector<8x96xf32>
    %150 = arith.addf %149, %148 : vector<8x96xf32>
    %151 = arith.divf %149, %150 : vector<8x96xf32>
    %152 = vector.extract_strided_slice %136 {offsets = [0, 96], sizes = [8, 32], strides = [1, 1]} : vector<8x128xf32> to vector<8x32xf32>
    %153 = math.tanh %152 : vector<8x32xf32>
    %154 = vector.extract_strided_slice %139 {offsets = [0, 96], sizes = [8, 32], strides = [1, 1]} : vector<8x128xf32> to vector<8x32xf32>
    %155 = math.tanh %154 : vector<8x32xf32>
    %156 = vector.extract_strided_slice %145 {offsets = [0, 32], sizes = [8, 32], strides = [1, 1]} : vector<8x96xf32> to vector<8x32xf32>
    %157 = arith.mulf %156, %122 : vector<8x32xf32>
    %158 = vector.extract_strided_slice %145 {offsets = [0, 0], sizes = [8, 32], strides = [1, 1]} : vector<8x96xf32> to vector<8x32xf32>
    %159 = arith.mulf %158, %153 : vector<8x32xf32>
    %160 = arith.addf %157, %159 : vector<8x32xf32>
    %161 = vector.extract_strided_slice %151 {offsets = [0, 32], sizes = [8, 32], strides = [1, 1]} : vector<8x96xf32> to vector<8x32xf32>
    %162 = arith.mulf %161, %127 : vector<8x32xf32>
    %163 = vector.extract_strided_slice %151 {offsets = [0, 0], sizes = [8, 32], strides = [1, 1]} : vector<8x96xf32> to vector<8x32xf32>
    %164 = arith.mulf %163, %155 : vector<8x32xf32>
    %165 = arith.addf %162, %164 : vector<8x32xf32>
    %166 = vector.extract_strided_slice %145 {offsets = [0, 64], sizes = [8, 32], strides = [1, 1]} : vector<8x96xf32> to vector<8x32xf32>
    %167 = math.tanh %160 : vector<8x32xf32>
    %168 = arith.mulf %166, %167 : vector<8x32xf32>
    %169 = vector.extract_strided_slice %151 {offsets = [0, 64], sizes = [8, 32], strides = [1, 1]} : vector<8x96xf32> to vector<8x32xf32>
    %170 = math.tanh %165 : vector<8x32xf32>
    %171 = arith.mulf %169, %170 : vector<8x32xf32>
    %172 = vector.extract_strided_slice %16 {offsets = [32, 0], sizes = [8, 128], strides = [1, 1]} : vector<64x128xf32> to vector<8x128xf32>
    %cst_42 = arith.constant dense<0.000000e+00> : vector<8x128xf32>
    %173 = tpu.matmul %168, %6, %cst_42 {dimension_numbers = #tpu.dot_dimension_numbers<[1], [0], [0], [1], [0, 0, 1, 1], [], []>} : vector<8x32xf32>, vector<32x128xf32>, vector<8x128xf32> -> vector<8x128xf32>
    %174 = arith.addf %172, %173 : vector<8x128xf32>
    %175 = vector.extract_strided_slice %19 {offsets = [24, 0], sizes = [8, 128], strides = [1, 1]} : vector<64x128xf32> to vector<8x128xf32>
    %cst_43 = arith.constant dense<0.000000e+00> : vector<8x128xf32>
    %176 = tpu.matmul %171, %8, %cst_43 {dimension_numbers = #tpu.dot_dimension_numbers<[1], [0], [0], [1], [0, 0, 1, 1], [], []>} : vector<8x32xf32>, vector<32x128xf32>, vector<8x128xf32> -> vector<8x128xf32>
    %177 = arith.addf %175, %176 : vector<8x128xf32>
    %178 = vector.extract_strided_slice %174 {offsets = [0, 0], sizes = [8, 96], strides = [1, 1]} : vector<8x128xf32> to vector<8x96xf32>
    %179 = arith.negf %178 : vector<8x96xf32>
    %180 = math.exp %179 : vector<8x96xf32>
    %cst_44 = arith.constant 1.000000e+00 : f32
    %181 = vector.broadcast %cst_44 : f32 to vector<8x96xf32>
    %182 = arith.addf %181, %180 : vector<8x96xf32>
    %183 = arith.divf %181, %182 : vector<8x96xf32>
    %184 = vector.extract_strided_slice %177 {offsets = [0, 0], sizes = [8, 96], strides = [1, 1]} : vector<8x128xf32> to vector<8x96xf32>
    %185 = arith.negf %184 : vector<8x96xf32>
    %186 = math.exp %185 : vector<8x96xf32>
    %cst_45 = arith.constant 1.000000e+00 : f32
    %187 = vector.broadcast %cst_45 : f32 to vector<8x96xf32>
    %188 = arith.addf %187, %186 : vector<8x96xf32>
    %189 = arith.divf %187, %188 : vector<8x96xf32>
    %190 = vector.extract_strided_slice %174 {offsets = [0, 96], sizes = [8, 32], strides = [1, 1]} : vector<8x128xf32> to vector<8x32xf32>
    %191 = math.tanh %190 : vector<8x32xf32>
    %192 = vector.extract_strided_slice %177 {offsets = [0, 96], sizes = [8, 32], strides = [1, 1]} : vector<8x128xf32> to vector<8x32xf32>
    %193 = math.tanh %192 : vector<8x32xf32>
    %194 = vector.extract_strided_slice %183 {offsets = [0, 32], sizes = [8, 32], strides = [1, 1]} : vector<8x96xf32> to vector<8x32xf32>
    %195 = arith.mulf %194, %160 : vector<8x32xf32>
    %196 = vector.extract_strided_slice %183 {offsets = [0, 0], sizes = [8, 32], strides = [1, 1]} : vector<8x96xf32> to vector<8x32xf32>
    %197 = arith.mulf %196, %191 : vector<8x32xf32>
    %198 = arith.addf %195, %197 : vector<8x32xf32>
    %199 = vector.extract_strided_slice %189 {offsets = [0, 32], sizes = [8, 32], strides = [1, 1]} : vector<8x96xf32> to vector<8x32xf32>
    %200 = arith.mulf %199, %165 : vector<8x32xf32>
    %201 = vector.extract_strided_slice %189 {offsets = [0, 0], sizes = [8, 32], strides = [1, 1]} : vector<8x96xf32> to vector<8x32xf32>
    %202 = arith.mulf %201, %193 : vector<8x32xf32>
    %203 = arith.addf %200, %202 : vector<8x32xf32>
    %204 = vector.extract_strided_slice %183 {offsets = [0, 64], sizes = [8, 32], strides = [1, 1]} : vector<8x96xf32> to vector<8x32xf32>
    %205 = math.tanh %198 : vector<8x32xf32>
    %206 = arith.mulf %204, %205 : vector<8x32xf32>
    %207 = vector.extract_strided_slice %189 {offsets = [0, 64], sizes = [8, 32], strides = [1, 1]} : vector<8x96xf32> to vector<8x32xf32>
    %208 = math.tanh %203 : vector<8x32xf32>
    %209 = arith.mulf %207, %208 : vector<8x32xf32>
    %210 = vector.extract_strided_slice %16 {offsets = [40, 0], sizes = [8, 128], strides = [1, 1]} : vector<64x128xf32> to vector<8x128xf32>
    %cst_46 = arith.constant dense<0.000000e+00> : vector<8x128xf32>
    %211 = tpu.matmul %206, %6, %cst_46 {dimension_numbers = #tpu.dot_dimension_numbers<[1], [0], [0], [1], [0, 0, 1, 1], [], []>} : vector<8x32xf32>, vector<32x128xf32>, vector<8x128xf32> -> vector<8x128xf32>
    %212 = arith.addf %210, %211 : vector<8x128xf32>
    %213 = vector.extract_strided_slice %19 {offsets = [16, 0], sizes = [8, 128], strides = [1, 1]} : vector<64x128xf32> to vector<8x128xf32>
    %cst_47 = arith.constant dense<0.000000e+00> : vector<8x128xf32>
    %214 = tpu.matmul %209, %8, %cst_47 {dimension_numbers = #tpu.dot_dimension_numbers<[1], [0], [0], [1], [0, 0, 1, 1], [], []>} : vector<8x32xf32>, vector<32x128xf32>, vector<8x128xf32> -> vector<8x128xf32>
    %215 = arith.addf %213, %214 : vector<8x128xf32>
    %216 = vector.extract_strided_slice %212 {offsets = [0, 0], sizes = [8, 96], strides = [1, 1]} : vector<8x128xf32> to vector<8x96xf32>
    %217 = arith.negf %216 : vector<8x96xf32>
    %218 = math.exp %217 : vector<8x96xf32>
    %cst_48 = arith.constant 1.000000e+00 : f32
    %219 = vector.broadcast %cst_48 : f32 to vector<8x96xf32>
    %220 = arith.addf %219, %218 : vector<8x96xf32>
    %221 = arith.divf %219, %220 : vector<8x96xf32>
    %222 = vector.extract_strided_slice %215 {offsets = [0, 0], sizes = [8, 96], strides = [1, 1]} : vector<8x128xf32> to vector<8x96xf32>
    %223 = arith.negf %222 : vector<8x96xf32>
    %224 = math.exp %223 : vector<8x96xf32>
    %cst_49 = arith.constant 1.000000e+00 : f32
    %225 = vector.broadcast %cst_49 : f32 to vector<8x96xf32>
    %226 = arith.addf %225, %224 : vector<8x96xf32>
    %227 = arith.divf %225, %226 : vector<8x96xf32>
    %228 = vector.extract_strided_slice %212 {offsets = [0, 96], sizes = [8, 32], strides = [1, 1]} : vector<8x128xf32> to vector<8x32xf32>
    %229 = math.tanh %228 : vector<8x32xf32>
    %230 = vector.extract_strided_slice %215 {offsets = [0, 96], sizes = [8, 32], strides = [1, 1]} : vector<8x128xf32> to vector<8x32xf32>
    %231 = math.tanh %230 : vector<8x32xf32>
    %232 = vector.extract_strided_slice %221 {offsets = [0, 32], sizes = [8, 32], strides = [1, 1]} : vector<8x96xf32> to vector<8x32xf32>
    %233 = arith.mulf %232, %198 : vector<8x32xf32>
    %234 = vector.extract_strided_slice %221 {offsets = [0, 0], sizes = [8, 32], strides = [1, 1]} : vector<8x96xf32> to vector<8x32xf32>
    %235 = arith.mulf %234, %229 : vector<8x32xf32>
    %236 = arith.addf %233, %235 : vector<8x32xf32>
    %237 = vector.extract_strided_slice %227 {offsets = [0, 32], sizes = [8, 32], strides = [1, 1]} : vector<8x96xf32> to vector<8x32xf32>
    %238 = arith.mulf %237, %203 : vector<8x32xf32>
    %239 = vector.extract_strided_slice %227 {offsets = [0, 0], sizes = [8, 32], strides = [1, 1]} : vector<8x96xf32> to vector<8x32xf32>
    %240 = arith.mulf %239, %231 : vector<8x32xf32>
    %241 = arith.addf %238, %240 : vector<8x32xf32>
    %242 = vector.extract_strided_slice %221 {offsets = [0, 64], sizes = [8, 32], strides = [1, 1]} : vector<8x96xf32> to vector<8x32xf32>
    %243 = math.tanh %236 : vector<8x32xf32>
    %244 = arith.mulf %242, %243 : vector<8x32xf32>
    %245 = vector.extract_strided_slice %227 {offsets = [0, 64], sizes = [8, 32], strides = [1, 1]} : vector<8x96xf32> to vector<8x32xf32>
    %246 = math.tanh %241 : vector<8x32xf32>
    %247 = arith.mulf %245, %246 : vector<8x32xf32>
    %248 = vector.extract_strided_slice %16 {offsets = [48, 0], sizes = [8, 128], strides = [1, 1]} : vector<64x128xf32> to vector<8x128xf32>
    %cst_50 = arith.constant dense<0.000000e+00> : vector<8x128xf32>
    %249 = tpu.matmul %244, %6, %cst_50 {dimension_numbers = #tpu.dot_dimension_numbers<[1], [0], [0], [1], [0, 0, 1, 1], [], []>} : vector<8x32xf32>, vector<32x128xf32>, vector<8x128xf32> -> vector<8x128xf32>
    %250 = arith.addf %248, %249 : vector<8x128xf32>
    %251 = vector.extract_strided_slice %19 {offsets = [8, 0], sizes = [8, 128], strides = [1, 1]} : vector<64x128xf32> to vector<8x128xf32>
    %cst_51 = arith.constant dense<0.000000e+00> : vector<8x128xf32>
    %252 = tpu.matmul %247, %8, %cst_51 {dimension_numbers = #tpu.dot_dimension_numbers<[1], [0], [0], [1], [0, 0, 1, 1], [], []>} : vector<8x32xf32>, vector<32x128xf32>, vector<8x128xf32> -> vector<8x128xf32>
    %253 = arith.addf %251, %252 : vector<8x128xf32>
    %254 = vector.extract_strided_slice %250 {offsets = [0, 0], sizes = [8, 96], strides = [1, 1]} : vector<8x128xf32> to vector<8x96xf32>
    %255 = arith.negf %254 : vector<8x96xf32>
    %256 = math.exp %255 : vector<8x96xf32>
    %cst_52 = arith.constant 1.000000e+00 : f32
    %257 = vector.broadcast %cst_52 : f32 to vector<8x96xf32>
    %258 = arith.addf %257, %256 : vector<8x96xf32>
    %259 = arith.divf %257, %258 : vector<8x96xf32>
    %260 = vector.extract_strided_slice %253 {offsets = [0, 0], sizes = [8, 96], strides = [1, 1]} : vector<8x128xf32> to vector<8x96xf32>
    %261 = arith.negf %260 : vector<8x96xf32>
    %262 = math.exp %261 : vector<8x96xf32>
    %cst_53 = arith.constant 1.000000e+00 : f32
    %263 = vector.broadcast %cst_53 : f32 to vector<8x96xf32>
    %264 = arith.addf %263, %262 : vector<8x96xf32>
    %265 = arith.divf %263, %264 : vector<8x96xf32>
    %266 = vector.extract_strided_slice %250 {offsets = [0, 96], sizes = [8, 32], strides = [1, 1]} : vector<8x128xf32> to vector<8x32xf32>
    %267 = math.tanh %266 : vector<8x32xf32>
    %268 = vector.extract_strided_slice %253 {offsets = [0, 96], sizes = [8, 32], strides = [1, 1]} : vector<8x128xf32> to vector<8x32xf32>
    %269 = math.tanh %268 : vector<8x32xf32>
    %270 = vector.extract_strided_slice %259 {offsets = [0, 32], sizes = [8, 32], strides = [1, 1]} : vector<8x96xf32> to vector<8x32xf32>
    %271 = arith.mulf %270, %236 : vector<8x32xf32>
    %272 = vector.extract_strided_slice %259 {offsets = [0, 0], sizes = [8, 32], strides = [1, 1]} : vector<8x96xf32> to vector<8x32xf32>
    %273 = arith.mulf %272, %267 : vector<8x32xf32>
    %274 = arith.addf %271, %273 : vector<8x32xf32>
    %275 = vector.extract_strided_slice %265 {offsets = [0, 32], sizes = [8, 32], strides = [1, 1]} : vector<8x96xf32> to vector<8x32xf32>
    %276 = arith.mulf %275, %241 : vector<8x32xf32>
    %277 = vector.extract_strided_slice %265 {offsets = [0, 0], sizes = [8, 32], strides = [1, 1]} : vector<8x96xf32> to vector<8x32xf32>
    %278 = arith.mulf %277, %269 : vector<8x32xf32>
    %279 = arith.addf %276, %278 : vector<8x32xf32>
    %280 = vector.extract_strided_slice %259 {offsets = [0, 64], sizes = [8, 32], strides = [1, 1]} : vector<8x96xf32> to vector<8x32xf32>
    %281 = math.tanh %274 : vector<8x32xf32>
    %282 = arith.mulf %280, %281 : vector<8x32xf32>
    %283 = vector.extract_strided_slice %265 {offsets = [0, 64], sizes = [8, 32], strides = [1, 1]} : vector<8x96xf32> to vector<8x32xf32>
    %284 = math.tanh %279 : vector<8x32xf32>
    %285 = arith.mulf %283, %284 : vector<8x32xf32>
    %286 = vector.extract_strided_slice %16 {offsets = [56, 0], sizes = [8, 128], strides = [1, 1]} : vector<64x128xf32> to vector<8x128xf32>
    %cst_54 = arith.constant dense<0.000000e+00> : vector<8x128xf32>
    %287 = tpu.matmul %282, %6, %cst_54 {dimension_numbers = #tpu.dot_dimension_numbers<[1], [0], [0], [1], [0, 0, 1, 1], [], []>} : vector<8x32xf32>, vector<32x128xf32>, vector<8x128xf32> -> vector<8x128xf32>
    %288 = arith.addf %286, %287 : vector<8x128xf32>
    %289 = vector.extract_strided_slice %19 {offsets = [0, 0], sizes = [8, 128], strides = [1, 1]} : vector<64x128xf32> to vector<8x128xf32>
    %cst_55 = arith.constant dense<0.000000e+00> : vector<8x128xf32>
    %290 = tpu.matmul %285, %8, %cst_55 {dimension_numbers = #tpu.dot_dimension_numbers<[1], [0], [0], [1], [0, 0, 1, 1], [], []>} : vector<8x32xf32>, vector<32x128xf32>, vector<8x128xf32> -> vector<8x128xf32>
    %291 = arith.addf %289, %290 : vector<8x128xf32>
    %292 = vector.extract_strided_slice %288 {offsets = [0, 0], sizes = [8, 96], strides = [1, 1]} : vector<8x128xf32> to vector<8x96xf32>
    %293 = arith.negf %292 : vector<8x96xf32>
    %294 = math.exp %293 : vector<8x96xf32>
    %cst_56 = arith.constant 1.000000e+00 : f32
    %295 = vector.broadcast %cst_56 : f32 to vector<8x96xf32>
    %296 = arith.addf %295, %294 : vector<8x96xf32>
    %297 = arith.divf %295, %296 : vector<8x96xf32>
    %298 = vector.extract_strided_slice %291 {offsets = [0, 0], sizes = [8, 96], strides = [1, 1]} : vector<8x128xf32> to vector<8x96xf32>
    %299 = arith.negf %298 : vector<8x96xf32>
    %300 = math.exp %299 : vector<8x96xf32>
    %cst_57 = arith.constant 1.000000e+00 : f32
    %301 = vector.broadcast %cst_57 : f32 to vector<8x96xf32>
    %302 = arith.addf %301, %300 : vector<8x96xf32>
    %303 = arith.divf %301, %302 : vector<8x96xf32>
    %304 = vector.extract_strided_slice %288 {offsets = [0, 96], sizes = [8, 32], strides = [1, 1]} : vector<8x128xf32> to vector<8x32xf32>
    %305 = math.tanh %304 : vector<8x32xf32>
    %306 = vector.extract_strided_slice %291 {offsets = [0, 96], sizes = [8, 32], strides = [1, 1]} : vector<8x128xf32> to vector<8x32xf32>
    %307 = math.tanh %306 : vector<8x32xf32>
    %308 = vector.extract_strided_slice %297 {offsets = [0, 32], sizes = [8, 32], strides = [1, 1]} : vector<8x96xf32> to vector<8x32xf32>
    %309 = arith.mulf %308, %274 : vector<8x32xf32>
    %310 = vector.extract_strided_slice %297 {offsets = [0, 0], sizes = [8, 32], strides = [1, 1]} : vector<8x96xf32> to vector<8x32xf32>
    %311 = arith.mulf %310, %305 : vector<8x32xf32>
    %312 = arith.addf %309, %311 : vector<8x32xf32>
    %313 = vector.extract_strided_slice %303 {offsets = [0, 32], sizes = [8, 32], strides = [1, 1]} : vector<8x96xf32> to vector<8x32xf32>
    %314 = arith.mulf %313, %279 : vector<8x32xf32>
    %315 = vector.extract_strided_slice %303 {offsets = [0, 0], sizes = [8, 32], strides = [1, 1]} : vector<8x96xf32> to vector<8x32xf32>
    %316 = arith.mulf %315, %307 : vector<8x32xf32>
    %317 = arith.addf %314, %316 : vector<8x32xf32>
    %318 = vector.extract_strided_slice %297 {offsets = [0, 64], sizes = [8, 32], strides = [1, 1]} : vector<8x96xf32> to vector<8x32xf32>
    %319 = math.tanh %312 : vector<8x32xf32>
    %320 = arith.mulf %318, %319 : vector<8x32xf32>
    %321 = vector.extract_strided_slice %303 {offsets = [0, 64], sizes = [8, 32], strides = [1, 1]} : vector<8x96xf32> to vector<8x32xf32>
    %322 = math.tanh %317 : vector<8x32xf32>
    %323 = arith.mulf %321, %322 : vector<8x32xf32>
    %324 = tpu.concatenate %54, %92, %130, %168, %206, %244, %282, %320 in 0 : vector<8x32xf32>, vector<8x32xf32>, vector<8x32xf32>, vector<8x32xf32>, vector<8x32xf32>, vector<8x32xf32>, vector<8x32xf32>, vector<8x32xf32> -> vector<64x32xf32>
    %325 = tpu.concatenate %323, %285, %247, %209, %171, %133, %95, %57 in 0 : vector<8x32xf32>, vector<8x32xf32>, vector<8x32xf32>, vector<8x32xf32>, vector<8x32xf32>, vector<8x32xf32>, vector<8x32xf32>, vector<8x32xf32> -> vector<64x32xf32>
    %c1_58 = arith.constant 1 : index
    %c0_59 = arith.constant 0 : index
    %c0_60 = arith.constant 0 : index
    %c0_61 = arith.constant 0 : index
    %326 = vector.load %arg1[%c1_58, %c0_59, %c0_60, %c0_61] : memref<2x2x32x128xf32, #tpu.memory_space<vmem>>, vector<1x1x32x128xf32>
    %327 = vector.shape_cast %326 : vector<1x1x32x128xf32> to vector<32x128xf32>
    %c1_62 = arith.constant 1 : index
    %c1_63 = arith.constant 1 : index
    %c0_64 = arith.constant 0 : index
    %c0_65 = arith.constant 0 : index
    %328 = vector.load %arg1[%c1_62, %c1_63, %c0_64, %c0_65] : memref<2x2x32x128xf32, #tpu.memory_space<vmem>>, vector<1x1x32x128xf32>
    %329 = vector.shape_cast %328 : vector<1x1x32x128xf32> to vector<32x128xf32>
    %c1_66 = arith.constant 1 : index
    %c0_67 = arith.constant 0 : index
    %c0_68 = arith.constant 0 : index
    %c0_69 = arith.constant 0 : index
    %330 = vector.load %arg3[%c1_66, %c0_67, %c0_68, %c0_69] : memref<2x2x32x128xf32, #tpu.memory_space<vmem>>, vector<1x1x32x128xf32>
    %331 = vector.shape_cast %330 : vector<1x1x32x128xf32> to vector<32x128xf32>
    %c1_70 = arith.constant 1 : index
    %c1_71 = arith.constant 1 : index
    %c0_72 = arith.constant 0 : index
    %c0_73 = arith.constant 0 : index
    %332 = vector.load %arg3[%c1_70, %c1_71, %c0_72, %c0_73] : memref<2x2x32x128xf32, #tpu.memory_space<vmem>>, vector<1x1x32x128xf32>
    %333 = vector.shape_cast %332 : vector<1x1x32x128xf32> to vector<32x128xf32>
    %c1_74 = arith.constant 1 : index
    %c0_75 = arith.constant 0 : index
    %c0_76 = arith.constant 0 : index
    %c0_77 = arith.constant 0 : index
    %334 = vector.load %arg4[%c1_74, %c0_75, %c0_76, %c0_77] : memref<2x2x1x128xf32, #tpu.memory_space<vmem>>, vector<1x1x1x128xf32>
    %335 = vector.shape_cast %334 : vector<1x1x1x128xf32> to vector<1x128xf32>
    %c1_78 = arith.constant 1 : index
    %c1_79 = arith.constant 1 : index
    %c0_80 = arith.constant 0 : index
    %c0_81 = arith.constant 0 : index
    %336 = vector.load %arg4[%c1_78, %c1_79, %c0_80, %c0_81] : memref<2x2x1x128xf32, #tpu.memory_space<vmem>>, vector<1x1x1x128xf32>
    %337 = vector.shape_cast %336 : vector<1x1x1x128xf32> to vector<1x128xf32>
    %c1_82 = arith.constant 1 : index
    %c0_83 = arith.constant 0 : index
    %c0_84 = arith.constant 0 : index
    %c0_85 = arith.constant 0 : index
    %338 = vector.load %arg2[%c1_82, %c0_83, %c0_84, %c0_85] : memref<2x2x32x128xf32, #tpu.memory_space<vmem>>, vector<1x1x32x128xf32>
    %339 = vector.shape_cast %338 : vector<1x1x32x128xf32> to vector<32x128xf32>
    %c1_86 = arith.constant 1 : index
    %c1_87 = arith.constant 1 : index
    %c0_88 = arith.constant 0 : index
    %c0_89 = arith.constant 0 : index
    %340 = vector.load %arg2[%c1_86, %c1_87, %c0_88, %c0_89] : memref<2x2x32x128xf32, #tpu.memory_space<vmem>>, vector<1x1x32x128xf32>
    %341 = vector.shape_cast %340 : vector<1x1x32x128xf32> to vector<32x128xf32>
    %cst_90 = arith.constant dense<0.000000e+00> : vector<64x128xf32>
    %342 = tpu.matmul %324, %327, %cst_90 {dimension_numbers = #tpu.dot_dimension_numbers<[1], [0], [0], [1], [0, 0, 1, 1], [], []>} : vector<64x32xf32>, vector<32x128xf32>, vector<64x128xf32> -> vector<64x128xf32>
    %cst_91 = arith.constant dense<0.000000e+00> : vector<64x128xf32>
    %343 = tpu.matmul %325, %339, %cst_91 {dimension_numbers = #tpu.dot_dimension_numbers<[1], [0], [0], [1], [0, 0, 1, 1], [], []>} : vector<64x32xf32>, vector<32x128xf32>, vector<64x128xf32> -> vector<64x128xf32>
    %344 = arith.addf %342, %343 : vector<64x128xf32>
    %345 = vector.broadcast %335 : vector<1x128xf32> to vector<64x128xf32>
    %346 = arith.addf %344, %345 : vector<64x128xf32>
    %cst_92 = arith.constant dense<0.000000e+00> : vector<64x128xf32>
    %347 = tpu.matmul %324, %329, %cst_92 {dimension_numbers = #tpu.dot_dimension_numbers<[1], [0], [0], [1], [0, 0, 1, 1], [], []>} : vector<64x32xf32>, vector<32x128xf32>, vector<64x128xf32> -> vector<64x128xf32>
    %cst_93 = arith.constant dense<0.000000e+00> : vector<64x128xf32>
    %348 = tpu.matmul %325, %341, %cst_93 {dimension_numbers = #tpu.dot_dimension_numbers<[1], [0], [0], [1], [0, 0, 1, 1], [], []>} : vector<64x32xf32>, vector<32x128xf32>, vector<64x128xf32> -> vector<64x128xf32>
    %349 = arith.addf %347, %348 : vector<64x128xf32>
    %350 = vector.broadcast %337 : vector<1x128xf32> to vector<64x128xf32>
    %351 = arith.addf %349, %350 : vector<64x128xf32>
    %352 = vector.extract_strided_slice %346 {offsets = [0, 0], sizes = [8, 128], strides = [1, 1]} : vector<64x128xf32> to vector<8x128xf32>
    %cst_94 = arith.constant dense<0.000000e+00> : vector<8x128xf32>
    %353 = tpu.matmul %0, %331, %cst_94 {dimension_numbers = #tpu.dot_dimension_numbers<[1], [0], [0], [1], [0, 0, 1, 1], [], []>} : vector<8x32xf32>, vector<32x128xf32>, vector<8x128xf32> -> vector<8x128xf32>
    %354 = arith.addf %352, %353 : vector<8x128xf32>
    %355 = vector.extract_strided_slice %351 {offsets = [56, 0], sizes = [8, 128], strides = [1, 1]} : vector<64x128xf32> to vector<8x128xf32>
    %cst_95 = arith.constant dense<0.000000e+00> : vector<8x128xf32>
    %356 = tpu.matmul %0, %333, %cst_95 {dimension_numbers = #tpu.dot_dimension_numbers<[1], [0], [0], [1], [0, 0, 1, 1], [], []>} : vector<8x32xf32>, vector<32x128xf32>, vector<8x128xf32> -> vector<8x128xf32>
    %357 = arith.addf %355, %356 : vector<8x128xf32>
    %358 = vector.extract_strided_slice %354 {offsets = [0, 0], sizes = [8, 96], strides = [1, 1]} : vector<8x128xf32> to vector<8x96xf32>
    %359 = arith.negf %358 : vector<8x96xf32>
    %360 = math.exp %359 : vector<8x96xf32>
    %cst_96 = arith.constant 1.000000e+00 : f32
    %361 = vector.broadcast %cst_96 : f32 to vector<8x96xf32>
    %362 = arith.addf %361, %360 : vector<8x96xf32>
    %363 = arith.divf %361, %362 : vector<8x96xf32>
    %364 = vector.extract_strided_slice %357 {offsets = [0, 0], sizes = [8, 96], strides = [1, 1]} : vector<8x128xf32> to vector<8x96xf32>
    %365 = arith.negf %364 : vector<8x96xf32>
    %366 = math.exp %365 : vector<8x96xf32>
    %cst_97 = arith.constant 1.000000e+00 : f32
    %367 = vector.broadcast %cst_97 : f32 to vector<8x96xf32>
    %368 = arith.addf %367, %366 : vector<8x96xf32>
    %369 = arith.divf %367, %368 : vector<8x96xf32>
    %370 = vector.extract_strided_slice %354 {offsets = [0, 96], sizes = [8, 32], strides = [1, 1]} : vector<8x128xf32> to vector<8x32xf32>
    %371 = math.tanh %370 : vector<8x32xf32>
    %372 = vector.extract_strided_slice %357 {offsets = [0, 96], sizes = [8, 32], strides = [1, 1]} : vector<8x128xf32> to vector<8x32xf32>
    %373 = math.tanh %372 : vector<8x32xf32>
    %374 = vector.extract_strided_slice %363 {offsets = [0, 32], sizes = [8, 32], strides = [1, 1]} : vector<8x96xf32> to vector<8x32xf32>
    %375 = arith.mulf %374, %0 : vector<8x32xf32>
    %376 = vector.extract_strided_slice %363 {offsets = [0, 0], sizes = [8, 32], strides = [1, 1]} : vector<8x96xf32> to vector<8x32xf32>
    %377 = arith.mulf %376, %371 : vector<8x32xf32>
    %378 = arith.addf %375, %377 : vector<8x32xf32>
    %379 = vector.extract_strided_slice %369 {offsets = [0, 32], sizes = [8, 32], strides = [1, 1]} : vector<8x96xf32> to vector<8x32xf32>
    %380 = arith.mulf %379, %0 : vector<8x32xf32>
    %381 = vector.extract_strided_slice %369 {offsets = [0, 0], sizes = [8, 32], strides = [1, 1]} : vector<8x96xf32> to vector<8x32xf32>
    %382 = arith.mulf %381, %373 : vector<8x32xf32>
    %383 = arith.addf %380, %382 : vector<8x32xf32>
    %384 = vector.extract_strided_slice %363 {offsets = [0, 64], sizes = [8, 32], strides = [1, 1]} : vector<8x96xf32> to vector<8x32xf32>
    %385 = math.tanh %378 : vector<8x32xf32>
    %386 = arith.mulf %384, %385 : vector<8x32xf32>
    %387 = vector.extract_strided_slice %369 {offsets = [0, 64], sizes = [8, 32], strides = [1, 1]} : vector<8x96xf32> to vector<8x32xf32>
    %388 = math.tanh %383 : vector<8x32xf32>
    %389 = arith.mulf %387, %388 : vector<8x32xf32>
    %390 = vector.extract_strided_slice %346 {offsets = [8, 0], sizes = [8, 128], strides = [1, 1]} : vector<64x128xf32> to vector<8x128xf32>
    %cst_98 = arith.constant dense<0.000000e+00> : vector<8x128xf32>
    %391 = tpu.matmul %386, %331, %cst_98 {dimension_numbers = #tpu.dot_dimension_numbers<[1], [0], [0], [1], [0, 0, 1, 1], [], []>} : vector<8x32xf32>, vector<32x128xf32>, vector<8x128xf32> -> vector<8x128xf32>
    %392 = arith.addf %390, %391 : vector<8x128xf32>
    %393 = vector.extract_strided_slice %351 {offsets = [48, 0], sizes = [8, 128], strides = [1, 1]} : vector<64x128xf32> to vector<8x128xf32>
    %cst_99 = arith.constant dense<0.000000e+00> : vector<8x128xf32>
    %394 = tpu.matmul %389, %333, %cst_99 {dimension_numbers = #tpu.dot_dimension_numbers<[1], [0], [0], [1], [0, 0, 1, 1], [], []>} : vector<8x32xf32>, vector<32x128xf32>, vector<8x128xf32> -> vector<8x128xf32>
    %395 = arith.addf %393, %394 : vector<8x128xf32>
    %396 = vector.extract_strided_slice %392 {offsets = [0, 0], sizes = [8, 96], strides = [1, 1]} : vector<8x128xf32> to vector<8x96xf32>
    %397 = arith.negf %396 : vector<8x96xf32>
    %398 = math.exp %397 : vector<8x96xf32>
    %cst_100 = arith.constant 1.000000e+00 : f32
    %399 = vector.broadcast %cst_100 : f32 to vector<8x96xf32>
    %400 = arith.addf %399, %398 : vector<8x96xf32>
    %401 = arith.divf %399, %400 : vector<8x96xf32>
    %402 = vector.extract_strided_slice %395 {offsets = [0, 0], sizes = [8, 96], strides = [1, 1]} : vector<8x128xf32> to vector<8x96xf32>
    %403 = arith.negf %402 : vector<8x96xf32>
    %404 = math.exp %403 : vector<8x96xf32>
    %cst_101 = arith.constant 1.000000e+00 : f32
    %405 = vector.broadcast %cst_101 : f32 to vector<8x96xf32>
    %406 = arith.addf %405, %404 : vector<8x96xf32>
    %407 = arith.divf %405, %406 : vector<8x96xf32>
    %408 = vector.extract_strided_slice %392 {offsets = [0, 96], sizes = [8, 32], strides = [1, 1]} : vector<8x128xf32> to vector<8x32xf32>
    %409 = math.tanh %408 : vector<8x32xf32>
    %410 = vector.extract_strided_slice %395 {offsets = [0, 96], sizes = [8, 32], strides = [1, 1]} : vector<8x128xf32> to vector<8x32xf32>
    %411 = math.tanh %410 : vector<8x32xf32>
    %412 = vector.extract_strided_slice %401 {offsets = [0, 32], sizes = [8, 32], strides = [1, 1]} : vector<8x96xf32> to vector<8x32xf32>
    %413 = arith.mulf %412, %378 : vector<8x32xf32>
    %414 = vector.extract_strided_slice %401 {offsets = [0, 0], sizes = [8, 32], strides = [1, 1]} : vector<8x96xf32> to vector<8x32xf32>
    %415 = arith.mulf %414, %409 : vector<8x32xf32>
    %416 = arith.addf %413, %415 : vector<8x32xf32>
    %417 = vector.extract_strided_slice %407 {offsets = [0, 32], sizes = [8, 32], strides = [1, 1]} : vector<8x96xf32> to vector<8x32xf32>
    %418 = arith.mulf %417, %383 : vector<8x32xf32>
    %419 = vector.extract_strided_slice %407 {offsets = [0, 0], sizes = [8, 32], strides = [1, 1]} : vector<8x96xf32> to vector<8x32xf32>
    %420 = arith.mulf %419, %411 : vector<8x32xf32>
    %421 = arith.addf %418, %420 : vector<8x32xf32>
    %422 = vector.extract_strided_slice %401 {offsets = [0, 64], sizes = [8, 32], strides = [1, 1]} : vector<8x96xf32> to vector<8x32xf32>
    %423 = math.tanh %416 : vector<8x32xf32>
    %424 = arith.mulf %422, %423 : vector<8x32xf32>
    %425 = vector.extract_strided_slice %407 {offsets = [0, 64], sizes = [8, 32], strides = [1, 1]} : vector<8x96xf32> to vector<8x32xf32>
    %426 = math.tanh %421 : vector<8x32xf32>
    %427 = arith.mulf %425, %426 : vector<8x32xf32>
    %428 = vector.extract_strided_slice %346 {offsets = [16, 0], sizes = [8, 128], strides = [1, 1]} : vector<64x128xf32> to vector<8x128xf32>
    %cst_102 = arith.constant dense<0.000000e+00> : vector<8x128xf32>
    %429 = tpu.matmul %424, %331, %cst_102 {dimension_numbers = #tpu.dot_dimension_numbers<[1], [0], [0], [1], [0, 0, 1, 1], [], []>} : vector<8x32xf32>, vector<32x128xf32>, vector<8x128xf32> -> vector<8x128xf32>
    %430 = arith.addf %428, %429 : vector<8x128xf32>
    %431 = vector.extract_strided_slice %351 {offsets = [40, 0], sizes = [8, 128], strides = [1, 1]} : vector<64x128xf32> to vector<8x128xf32>
    %cst_103 = arith.constant dense<0.000000e+00> : vector<8x128xf32>
    %432 = tpu.matmul %427, %333, %cst_103 {dimension_numbers = #tpu.dot_dimension_numbers<[1], [0], [0], [1], [0, 0, 1, 1], [], []>} : vector<8x32xf32>, vector<32x128xf32>, vector<8x128xf32> -> vector<8x128xf32>
    %433 = arith.addf %431, %432 : vector<8x128xf32>
    %434 = vector.extract_strided_slice %430 {offsets = [0, 0], sizes = [8, 96], strides = [1, 1]} : vector<8x128xf32> to vector<8x96xf32>
    %435 = arith.negf %434 : vector<8x96xf32>
    %436 = math.exp %435 : vector<8x96xf32>
    %cst_104 = arith.constant 1.000000e+00 : f32
    %437 = vector.broadcast %cst_104 : f32 to vector<8x96xf32>
    %438 = arith.addf %437, %436 : vector<8x96xf32>
    %439 = arith.divf %437, %438 : vector<8x96xf32>
    %440 = vector.extract_strided_slice %433 {offsets = [0, 0], sizes = [8, 96], strides = [1, 1]} : vector<8x128xf32> to vector<8x96xf32>
    %441 = arith.negf %440 : vector<8x96xf32>
    %442 = math.exp %441 : vector<8x96xf32>
    %cst_105 = arith.constant 1.000000e+00 : f32
    %443 = vector.broadcast %cst_105 : f32 to vector<8x96xf32>
    %444 = arith.addf %443, %442 : vector<8x96xf32>
    %445 = arith.divf %443, %444 : vector<8x96xf32>
    %446 = vector.extract_strided_slice %430 {offsets = [0, 96], sizes = [8, 32], strides = [1, 1]} : vector<8x128xf32> to vector<8x32xf32>
    %447 = math.tanh %446 : vector<8x32xf32>
    %448 = vector.extract_strided_slice %433 {offsets = [0, 96], sizes = [8, 32], strides = [1, 1]} : vector<8x128xf32> to vector<8x32xf32>
    %449 = math.tanh %448 : vector<8x32xf32>
    %450 = vector.extract_strided_slice %439 {offsets = [0, 32], sizes = [8, 32], strides = [1, 1]} : vector<8x96xf32> to vector<8x32xf32>
    %451 = arith.mulf %450, %416 : vector<8x32xf32>
    %452 = vector.extract_strided_slice %439 {offsets = [0, 0], sizes = [8, 32], strides = [1, 1]} : vector<8x96xf32> to vector<8x32xf32>
    %453 = arith.mulf %452, %447 : vector<8x32xf32>
    %454 = arith.addf %451, %453 : vector<8x32xf32>
    %455 = vector.extract_strided_slice %445 {offsets = [0, 32], sizes = [8, 32], strides = [1, 1]} : vector<8x96xf32> to vector<8x32xf32>
    %456 = arith.mulf %455, %421 : vector<8x32xf32>
    %457 = vector.extract_strided_slice %445 {offsets = [0, 0], sizes = [8, 32], strides = [1, 1]} : vector<8x96xf32> to vector<8x32xf32>
    %458 = arith.mulf %457, %449 : vector<8x32xf32>
    %459 = arith.addf %456, %458 : vector<8x32xf32>
    %460 = vector.extract_strided_slice %439 {offsets = [0, 64], sizes = [8, 32], strides = [1, 1]} : vector<8x96xf32> to vector<8x32xf32>
    %461 = math.tanh %454 : vector<8x32xf32>
    %462 = arith.mulf %460, %461 : vector<8x32xf32>
    %463 = vector.extract_strided_slice %445 {offsets = [0, 64], sizes = [8, 32], strides = [1, 1]} : vector<8x96xf32> to vector<8x32xf32>
    %464 = math.tanh %459 : vector<8x32xf32>
    %465 = arith.mulf %463, %464 : vector<8x32xf32>
    %466 = vector.extract_strided_slice %346 {offsets = [24, 0], sizes = [8, 128], strides = [1, 1]} : vector<64x128xf32> to vector<8x128xf32>
    %cst_106 = arith.constant dense<0.000000e+00> : vector<8x128xf32>
    %467 = tpu.matmul %462, %331, %cst_106 {dimension_numbers = #tpu.dot_dimension_numbers<[1], [0], [0], [1], [0, 0, 1, 1], [], []>} : vector<8x32xf32>, vector<32x128xf32>, vector<8x128xf32> -> vector<8x128xf32>
    %468 = arith.addf %466, %467 : vector<8x128xf32>
    %469 = vector.extract_strided_slice %351 {offsets = [32, 0], sizes = [8, 128], strides = [1, 1]} : vector<64x128xf32> to vector<8x128xf32>
    %cst_107 = arith.constant dense<0.000000e+00> : vector<8x128xf32>
    %470 = tpu.matmul %465, %333, %cst_107 {dimension_numbers = #tpu.dot_dimension_numbers<[1], [0], [0], [1], [0, 0, 1, 1], [], []>} : vector<8x32xf32>, vector<32x128xf32>, vector<8x128xf32> -> vector<8x128xf32>
    %471 = arith.addf %469, %470 : vector<8x128xf32>
    %472 = vector.extract_strided_slice %468 {offsets = [0, 0], sizes = [8, 96], strides = [1, 1]} : vector<8x128xf32> to vector<8x96xf32>
    %473 = arith.negf %472 : vector<8x96xf32>
    %474 = math.exp %473 : vector<8x96xf32>
    %cst_108 = arith.constant 1.000000e+00 : f32
    %475 = vector.broadcast %cst_108 : f32 to vector<8x96xf32>
    %476 = arith.addf %475, %474 : vector<8x96xf32>
    %477 = arith.divf %475, %476 : vector<8x96xf32>
    %478 = vector.extract_strided_slice %471 {offsets = [0, 0], sizes = [8, 96], strides = [1, 1]} : vector<8x128xf32> to vector<8x96xf32>
    %479 = arith.negf %478 : vector<8x96xf32>
    %480 = math.exp %479 : vector<8x96xf32>
    %cst_109 = arith.constant 1.000000e+00 : f32
    %481 = vector.broadcast %cst_109 : f32 to vector<8x96xf32>
    %482 = arith.addf %481, %480 : vector<8x96xf32>
    %483 = arith.divf %481, %482 : vector<8x96xf32>
    %484 = vector.extract_strided_slice %468 {offsets = [0, 96], sizes = [8, 32], strides = [1, 1]} : vector<8x128xf32> to vector<8x32xf32>
    %485 = math.tanh %484 : vector<8x32xf32>
    %486 = vector.extract_strided_slice %471 {offsets = [0, 96], sizes = [8, 32], strides = [1, 1]} : vector<8x128xf32> to vector<8x32xf32>
    %487 = math.tanh %486 : vector<8x32xf32>
    %488 = vector.extract_strided_slice %477 {offsets = [0, 32], sizes = [8, 32], strides = [1, 1]} : vector<8x96xf32> to vector<8x32xf32>
    %489 = arith.mulf %488, %454 : vector<8x32xf32>
    %490 = vector.extract_strided_slice %477 {offsets = [0, 0], sizes = [8, 32], strides = [1, 1]} : vector<8x96xf32> to vector<8x32xf32>
    %491 = arith.mulf %490, %485 : vector<8x32xf32>
    %492 = arith.addf %489, %491 : vector<8x32xf32>
    %493 = vector.extract_strided_slice %483 {offsets = [0, 32], sizes = [8, 32], strides = [1, 1]} : vector<8x96xf32> to vector<8x32xf32>
    %494 = arith.mulf %493, %459 : vector<8x32xf32>
    %495 = vector.extract_strided_slice %483 {offsets = [0, 0], sizes = [8, 32], strides = [1, 1]} : vector<8x96xf32> to vector<8x32xf32>
    %496 = arith.mulf %495, %487 : vector<8x32xf32>
    %497 = arith.addf %494, %496 : vector<8x32xf32>
    %498 = vector.extract_strided_slice %477 {offsets = [0, 64], sizes = [8, 32], strides = [1, 1]} : vector<8x96xf32> to vector<8x32xf32>
    %499 = math.tanh %492 : vector<8x32xf32>
    %500 = arith.mulf %498, %499 : vector<8x32xf32>
    %501 = vector.extract_strided_slice %483 {offsets = [0, 64], sizes = [8, 32], strides = [1, 1]} : vector<8x96xf32> to vector<8x32xf32>
    %502 = math.tanh %497 : vector<8x32xf32>
    %503 = arith.mulf %501, %502 : vector<8x32xf32>
    %504 = vector.extract_strided_slice %346 {offsets = [32, 0], sizes = [8, 128], strides = [1, 1]} : vector<64x128xf32> to vector<8x128xf32>
    %cst_110 = arith.constant dense<0.000000e+00> : vector<8x128xf32>
    %505 = tpu.matmul %500, %331, %cst_110 {dimension_numbers = #tpu.dot_dimension_numbers<[1], [0], [0], [1], [0, 0, 1, 1], [], []>} : vector<8x32xf32>, vector<32x128xf32>, vector<8x128xf32> -> vector<8x128xf32>
    %506 = arith.addf %504, %505 : vector<8x128xf32>
    %507 = vector.extract_strided_slice %351 {offsets = [24, 0], sizes = [8, 128], strides = [1, 1]} : vector<64x128xf32> to vector<8x128xf32>
    %cst_111 = arith.constant dense<0.000000e+00> : vector<8x128xf32>
    %508 = tpu.matmul %503, %333, %cst_111 {dimension_numbers = #tpu.dot_dimension_numbers<[1], [0], [0], [1], [0, 0, 1, 1], [], []>} : vector<8x32xf32>, vector<32x128xf32>, vector<8x128xf32> -> vector<8x128xf32>
    %509 = arith.addf %507, %508 : vector<8x128xf32>
    %510 = vector.extract_strided_slice %506 {offsets = [0, 0], sizes = [8, 96], strides = [1, 1]} : vector<8x128xf32> to vector<8x96xf32>
    %511 = arith.negf %510 : vector<8x96xf32>
    %512 = math.exp %511 : vector<8x96xf32>
    %cst_112 = arith.constant 1.000000e+00 : f32
    %513 = vector.broadcast %cst_112 : f32 to vector<8x96xf32>
    %514 = arith.addf %513, %512 : vector<8x96xf32>
    %515 = arith.divf %513, %514 : vector<8x96xf32>
    %516 = vector.extract_strided_slice %509 {offsets = [0, 0], sizes = [8, 96], strides = [1, 1]} : vector<8x128xf32> to vector<8x96xf32>
    %517 = arith.negf %516 : vector<8x96xf32>
    %518 = math.exp %517 : vector<8x96xf32>
    %cst_113 = arith.constant 1.000000e+00 : f32
    %519 = vector.broadcast %cst_113 : f32 to vector<8x96xf32>
    %520 = arith.addf %519, %518 : vector<8x96xf32>
    %521 = arith.divf %519, %520 : vector<8x96xf32>
    %522 = vector.extract_strided_slice %506 {offsets = [0, 96], sizes = [8, 32], strides = [1, 1]} : vector<8x128xf32> to vector<8x32xf32>
    %523 = math.tanh %522 : vector<8x32xf32>
    %524 = vector.extract_strided_slice %509 {offsets = [0, 96], sizes = [8, 32], strides = [1, 1]} : vector<8x128xf32> to vector<8x32xf32>
    %525 = math.tanh %524 : vector<8x32xf32>
    %526 = vector.extract_strided_slice %515 {offsets = [0, 32], sizes = [8, 32], strides = [1, 1]} : vector<8x96xf32> to vector<8x32xf32>
    %527 = arith.mulf %526, %492 : vector<8x32xf32>
    %528 = vector.extract_strided_slice %515 {offsets = [0, 0], sizes = [8, 32], strides = [1, 1]} : vector<8x96xf32> to vector<8x32xf32>
    %529 = arith.mulf %528, %523 : vector<8x32xf32>
    %530 = arith.addf %527, %529 : vector<8x32xf32>
    %531 = vector.extract_strided_slice %521 {offsets = [0, 32], sizes = [8, 32], strides = [1, 1]} : vector<8x96xf32> to vector<8x32xf32>
    %532 = arith.mulf %531, %497 : vector<8x32xf32>
    %533 = vector.extract_strided_slice %521 {offsets = [0, 0], sizes = [8, 32], strides = [1, 1]} : vector<8x96xf32> to vector<8x32xf32>
    %534 = arith.mulf %533, %525 : vector<8x32xf32>
    %535 = arith.addf %532, %534 : vector<8x32xf32>
    %536 = vector.extract_strided_slice %515 {offsets = [0, 64], sizes = [8, 32], strides = [1, 1]} : vector<8x96xf32> to vector<8x32xf32>
    %537 = math.tanh %530 : vector<8x32xf32>
    %538 = arith.mulf %536, %537 : vector<8x32xf32>
    %539 = vector.extract_strided_slice %521 {offsets = [0, 64], sizes = [8, 32], strides = [1, 1]} : vector<8x96xf32> to vector<8x32xf32>
    %540 = math.tanh %535 : vector<8x32xf32>
    %541 = arith.mulf %539, %540 : vector<8x32xf32>
    %542 = vector.extract_strided_slice %346 {offsets = [40, 0], sizes = [8, 128], strides = [1, 1]} : vector<64x128xf32> to vector<8x128xf32>
    %cst_114 = arith.constant dense<0.000000e+00> : vector<8x128xf32>
    %543 = tpu.matmul %538, %331, %cst_114 {dimension_numbers = #tpu.dot_dimension_numbers<[1], [0], [0], [1], [0, 0, 1, 1], [], []>} : vector<8x32xf32>, vector<32x128xf32>, vector<8x128xf32> -> vector<8x128xf32>
    %544 = arith.addf %542, %543 : vector<8x128xf32>
    %545 = vector.extract_strided_slice %351 {offsets = [16, 0], sizes = [8, 128], strides = [1, 1]} : vector<64x128xf32> to vector<8x128xf32>
    %cst_115 = arith.constant dense<0.000000e+00> : vector<8x128xf32>
    %546 = tpu.matmul %541, %333, %cst_115 {dimension_numbers = #tpu.dot_dimension_numbers<[1], [0], [0], [1], [0, 0, 1, 1], [], []>} : vector<8x32xf32>, vector<32x128xf32>, vector<8x128xf32> -> vector<8x128xf32>
    %547 = arith.addf %545, %546 : vector<8x128xf32>
    %548 = vector.extract_strided_slice %544 {offsets = [0, 0], sizes = [8, 96], strides = [1, 1]} : vector<8x128xf32> to vector<8x96xf32>
    %549 = arith.negf %548 : vector<8x96xf32>
    %550 = math.exp %549 : vector<8x96xf32>
    %cst_116 = arith.constant 1.000000e+00 : f32
    %551 = vector.broadcast %cst_116 : f32 to vector<8x96xf32>
    %552 = arith.addf %551, %550 : vector<8x96xf32>
    %553 = arith.divf %551, %552 : vector<8x96xf32>
    %554 = vector.extract_strided_slice %547 {offsets = [0, 0], sizes = [8, 96], strides = [1, 1]} : vector<8x128xf32> to vector<8x96xf32>
    %555 = arith.negf %554 : vector<8x96xf32>
    %556 = math.exp %555 : vector<8x96xf32>
    %cst_117 = arith.constant 1.000000e+00 : f32
    %557 = vector.broadcast %cst_117 : f32 to vector<8x96xf32>
    %558 = arith.addf %557, %556 : vector<8x96xf32>
    %559 = arith.divf %557, %558 : vector<8x96xf32>
    %560 = vector.extract_strided_slice %544 {offsets = [0, 96], sizes = [8, 32], strides = [1, 1]} : vector<8x128xf32> to vector<8x32xf32>
    %561 = math.tanh %560 : vector<8x32xf32>
    %562 = vector.extract_strided_slice %547 {offsets = [0, 96], sizes = [8, 32], strides = [1, 1]} : vector<8x128xf32> to vector<8x32xf32>
    %563 = math.tanh %562 : vector<8x32xf32>
    %564 = vector.extract_strided_slice %553 {offsets = [0, 32], sizes = [8, 32], strides = [1, 1]} : vector<8x96xf32> to vector<8x32xf32>
    %565 = arith.mulf %564, %530 : vector<8x32xf32>
    %566 = vector.extract_strided_slice %553 {offsets = [0, 0], sizes = [8, 32], strides = [1, 1]} : vector<8x96xf32> to vector<8x32xf32>
    %567 = arith.mulf %566, %561 : vector<8x32xf32>
    %568 = arith.addf %565, %567 : vector<8x32xf32>
    %569 = vector.extract_strided_slice %559 {offsets = [0, 32], sizes = [8, 32], strides = [1, 1]} : vector<8x96xf32> to vector<8x32xf32>
    %570 = arith.mulf %569, %535 : vector<8x32xf32>
    %571 = vector.extract_strided_slice %559 {offsets = [0, 0], sizes = [8, 32], strides = [1, 1]} : vector<8x96xf32> to vector<8x32xf32>
    %572 = arith.mulf %571, %563 : vector<8x32xf32>
    %573 = arith.addf %570, %572 : vector<8x32xf32>
    %574 = vector.extract_strided_slice %553 {offsets = [0, 64], sizes = [8, 32], strides = [1, 1]} : vector<8x96xf32> to vector<8x32xf32>
    %575 = math.tanh %568 : vector<8x32xf32>
    %576 = arith.mulf %574, %575 : vector<8x32xf32>
    %577 = vector.extract_strided_slice %559 {offsets = [0, 64], sizes = [8, 32], strides = [1, 1]} : vector<8x96xf32> to vector<8x32xf32>
    %578 = math.tanh %573 : vector<8x32xf32>
    %579 = arith.mulf %577, %578 : vector<8x32xf32>
    %580 = vector.extract_strided_slice %346 {offsets = [48, 0], sizes = [8, 128], strides = [1, 1]} : vector<64x128xf32> to vector<8x128xf32>
    %cst_118 = arith.constant dense<0.000000e+00> : vector<8x128xf32>
    %581 = tpu.matmul %576, %331, %cst_118 {dimension_numbers = #tpu.dot_dimension_numbers<[1], [0], [0], [1], [0, 0, 1, 1], [], []>} : vector<8x32xf32>, vector<32x128xf32>, vector<8x128xf32> -> vector<8x128xf32>
    %582 = arith.addf %580, %581 : vector<8x128xf32>
    %583 = vector.extract_strided_slice %351 {offsets = [8, 0], sizes = [8, 128], strides = [1, 1]} : vector<64x128xf32> to vector<8x128xf32>
    %cst_119 = arith.constant dense<0.000000e+00> : vector<8x128xf32>
    %584 = tpu.matmul %579, %333, %cst_119 {dimension_numbers = #tpu.dot_dimension_numbers<[1], [0], [0], [1], [0, 0, 1, 1], [], []>} : vector<8x32xf32>, vector<32x128xf32>, vector<8x128xf32> -> vector<8x128xf32>
    %585 = arith.addf %583, %584 : vector<8x128xf32>
    %586 = vector.extract_strided_slice %582 {offsets = [0, 0], sizes = [8, 96], strides = [1, 1]} : vector<8x128xf32> to vector<8x96xf32>
    %587 = arith.negf %586 : vector<8x96xf32>
    %588 = math.exp %587 : vector<8x96xf32>
    %cst_120 = arith.constant 1.000000e+00 : f32
    %589 = vector.broadcast %cst_120 : f32 to vector<8x96xf32>
    %590 = arith.addf %589, %588 : vector<8x96xf32>
    %591 = arith.divf %589, %590 : vector<8x96xf32>
    %592 = vector.extract_strided_slice %585 {offsets = [0, 0], sizes = [8, 96], strides = [1, 1]} : vector<8x128xf32> to vector<8x96xf32>
    %593 = arith.negf %592 : vector<8x96xf32>
    %594 = math.exp %593 : vector<8x96xf32>
    %cst_121 = arith.constant 1.000000e+00 : f32
    %595 = vector.broadcast %cst_121 : f32 to vector<8x96xf32>
    %596 = arith.addf %595, %594 : vector<8x96xf32>
    %597 = arith.divf %595, %596 : vector<8x96xf32>
    %598 = vector.extract_strided_slice %582 {offsets = [0, 96], sizes = [8, 32], strides = [1, 1]} : vector<8x128xf32> to vector<8x32xf32>
    %599 = math.tanh %598 : vector<8x32xf32>
    %600 = vector.extract_strided_slice %585 {offsets = [0, 96], sizes = [8, 32], strides = [1, 1]} : vector<8x128xf32> to vector<8x32xf32>
    %601 = math.tanh %600 : vector<8x32xf32>
    %602 = vector.extract_strided_slice %591 {offsets = [0, 32], sizes = [8, 32], strides = [1, 1]} : vector<8x96xf32> to vector<8x32xf32>
    %603 = arith.mulf %602, %568 : vector<8x32xf32>
    %604 = vector.extract_strided_slice %591 {offsets = [0, 0], sizes = [8, 32], strides = [1, 1]} : vector<8x96xf32> to vector<8x32xf32>
    %605 = arith.mulf %604, %599 : vector<8x32xf32>
    %606 = arith.addf %603, %605 : vector<8x32xf32>
    %607 = vector.extract_strided_slice %597 {offsets = [0, 32], sizes = [8, 32], strides = [1, 1]} : vector<8x96xf32> to vector<8x32xf32>
    %608 = arith.mulf %607, %573 : vector<8x32xf32>
    %609 = vector.extract_strided_slice %597 {offsets = [0, 0], sizes = [8, 32], strides = [1, 1]} : vector<8x96xf32> to vector<8x32xf32>
    %610 = arith.mulf %609, %601 : vector<8x32xf32>
    %611 = arith.addf %608, %610 : vector<8x32xf32>
    %612 = vector.extract_strided_slice %591 {offsets = [0, 64], sizes = [8, 32], strides = [1, 1]} : vector<8x96xf32> to vector<8x32xf32>
    %613 = math.tanh %606 : vector<8x32xf32>
    %614 = arith.mulf %612, %613 : vector<8x32xf32>
    %615 = vector.extract_strided_slice %597 {offsets = [0, 64], sizes = [8, 32], strides = [1, 1]} : vector<8x96xf32> to vector<8x32xf32>
    %616 = math.tanh %611 : vector<8x32xf32>
    %617 = arith.mulf %615, %616 : vector<8x32xf32>
    %618 = vector.extract_strided_slice %346 {offsets = [56, 0], sizes = [8, 128], strides = [1, 1]} : vector<64x128xf32> to vector<8x128xf32>
    %cst_122 = arith.constant dense<0.000000e+00> : vector<8x128xf32>
    %619 = tpu.matmul %614, %331, %cst_122 {dimension_numbers = #tpu.dot_dimension_numbers<[1], [0], [0], [1], [0, 0, 1, 1], [], []>} : vector<8x32xf32>, vector<32x128xf32>, vector<8x128xf32> -> vector<8x128xf32>
    %620 = arith.addf %618, %619 : vector<8x128xf32>
    %621 = vector.extract_strided_slice %351 {offsets = [0, 0], sizes = [8, 128], strides = [1, 1]} : vector<64x128xf32> to vector<8x128xf32>
    %cst_123 = arith.constant dense<0.000000e+00> : vector<8x128xf32>
    %622 = tpu.matmul %617, %333, %cst_123 {dimension_numbers = #tpu.dot_dimension_numbers<[1], [0], [0], [1], [0, 0, 1, 1], [], []>} : vector<8x32xf32>, vector<32x128xf32>, vector<8x128xf32> -> vector<8x128xf32>
    %623 = arith.addf %621, %622 : vector<8x128xf32>
    %624 = vector.extract_strided_slice %620 {offsets = [0, 0], sizes = [8, 96], strides = [1, 1]} : vector<8x128xf32> to vector<8x96xf32>
    %625 = arith.negf %624 : vector<8x96xf32>
    %626 = math.exp %625 : vector<8x96xf32>
    %cst_124 = arith.constant 1.000000e+00 : f32
    %627 = vector.broadcast %cst_124 : f32 to vector<8x96xf32>
    %628 = arith.addf %627, %626 : vector<8x96xf32>
    %629 = arith.divf %627, %628 : vector<8x96xf32>
    %630 = vector.extract_strided_slice %623 {offsets = [0, 0], sizes = [8, 96], strides = [1, 1]} : vector<8x128xf32> to vector<8x96xf32>
    %631 = arith.negf %630 : vector<8x96xf32>
    %632 = math.exp %631 : vector<8x96xf32>
    %cst_125 = arith.constant 1.000000e+00 : f32
    %633 = vector.broadcast %cst_125 : f32 to vector<8x96xf32>
    %634 = arith.addf %633, %632 : vector<8x96xf32>
    %635 = arith.divf %633, %634 : vector<8x96xf32>
    %636 = vector.extract_strided_slice %620 {offsets = [0, 96], sizes = [8, 32], strides = [1, 1]} : vector<8x128xf32> to vector<8x32xf32>
    %637 = math.tanh %636 : vector<8x32xf32>
    %638 = vector.extract_strided_slice %623 {offsets = [0, 96], sizes = [8, 32], strides = [1, 1]} : vector<8x128xf32> to vector<8x32xf32>
    %639 = math.tanh %638 : vector<8x32xf32>
    %640 = vector.extract_strided_slice %629 {offsets = [0, 32], sizes = [8, 32], strides = [1, 1]} : vector<8x96xf32> to vector<8x32xf32>
    %641 = arith.mulf %640, %606 : vector<8x32xf32>
    %642 = vector.extract_strided_slice %629 {offsets = [0, 0], sizes = [8, 32], strides = [1, 1]} : vector<8x96xf32> to vector<8x32xf32>
    %643 = arith.mulf %642, %637 : vector<8x32xf32>
    %644 = arith.addf %641, %643 : vector<8x32xf32>
    %645 = vector.extract_strided_slice %635 {offsets = [0, 32], sizes = [8, 32], strides = [1, 1]} : vector<8x96xf32> to vector<8x32xf32>
    %646 = arith.mulf %645, %611 : vector<8x32xf32>
    %647 = vector.extract_strided_slice %635 {offsets = [0, 0], sizes = [8, 32], strides = [1, 1]} : vector<8x96xf32> to vector<8x32xf32>
    %648 = arith.mulf %647, %639 : vector<8x32xf32>
    %649 = arith.addf %646, %648 : vector<8x32xf32>
    %650 = vector.extract_strided_slice %629 {offsets = [0, 64], sizes = [8, 32], strides = [1, 1]} : vector<8x96xf32> to vector<8x32xf32>
    %651 = math.tanh %644 : vector<8x32xf32>
    %652 = arith.mulf %650, %651 : vector<8x32xf32>
    %653 = vector.extract_strided_slice %635 {offsets = [0, 64], sizes = [8, 32], strides = [1, 1]} : vector<8x96xf32> to vector<8x32xf32>
    %654 = math.tanh %649 : vector<8x32xf32>
    %655 = arith.mulf %653, %654 : vector<8x32xf32>
    %c0_126 = arith.constant 0 : index
    %c0_127 = arith.constant 0 : index
    %656 = vector.load %arg6[%c0_126, %c0_127] : memref<128x32xf32, #tpu.memory_space<vmem>>, vector<32x32xf32>
    %c32 = arith.constant 32 : index
    %c0_128 = arith.constant 0 : index
    %657 = vector.load %arg6[%c32, %c0_128] : memref<128x32xf32, #tpu.memory_space<vmem>>, vector<32x32xf32>
    %c64 = arith.constant 64 : index
    %c0_129 = arith.constant 0 : index
    %658 = vector.load %arg6[%c64, %c0_129] : memref<128x32xf32, #tpu.memory_space<vmem>>, vector<64x32xf32>
    %cst_130 = arith.constant dense<0.000000e+00> : vector<8x32xf32>
    %659 = tpu.matmul %652, %656, %cst_130 {dimension_numbers = #tpu.dot_dimension_numbers<[1], [0], [0], [1], [0, 0, 1, 1], [], []>} : vector<8x32xf32>, vector<32x32xf32>, vector<8x32xf32> -> vector<8x32xf32>
    %cst_131 = arith.constant dense<0.000000e+00> : vector<8x32xf32>
    %660 = tpu.matmul %655, %657, %cst_131 {dimension_numbers = #tpu.dot_dimension_numbers<[1], [0], [0], [1], [0, 0, 1, 1], [], []>} : vector<8x32xf32>, vector<32x32xf32>, vector<8x32xf32> -> vector<8x32xf32>
    %661 = arith.addf %659, %660 : vector<8x32xf32>
    %c0_132 = arith.constant 0 : index
    %c0_133 = arith.constant 0 : index
    %662 = vector.load %arg5[%c0_132, %c0_133] : memref<8x64xf32, #tpu.memory_space<vmem>>, vector<8x64xf32>
    %cst_134 = arith.constant dense<0.000000e+00> : vector<8x32xf32>
    %663 = tpu.matmul %662, %658, %cst_134 {dimension_numbers = #tpu.dot_dimension_numbers<[1], [0], [0], [1], [0, 0, 1, 1], [], []>} : vector<8x64xf32>, vector<64x32xf32>, vector<8x32xf32> -> vector<8x32xf32>
    %664 = arith.addf %661, %663 : vector<8x32xf32>
    %c0_135 = arith.constant 0 : index
    %c0_136 = arith.constant 0 : index
    %665 = vector.load %arg7[%c0_135, %c0_136] : memref<1x32xf32, #tpu.memory_space<vmem>>, vector<1x32xf32>
    %666 = vector.broadcast %665 : vector<1x32xf32> to vector<8x32xf32>
    %667 = arith.addf %664, %666 : vector<8x32xf32>
    %668 = math.tanh %667 : vector<8x32xf32>
    %c0_137 = arith.constant 0 : index
    %c0_138 = arith.constant 0 : index
    %669 = vector.load %arg8[%c0_137, %c0_138] : memref<2x8xf32, #tpu.memory_space<vmem>>, vector<2x8xf32>
    %cst_139 = arith.constant dense<0.000000e+00> : vector<2x32xf32>
    %670 = tpu.matmul %669, %668, %cst_139 {dimension_numbers = #tpu.dot_dimension_numbers<[1], [0], [0], [1], [0, 0, 1, 1], [], []>} : vector<2x8xf32>, vector<8x32xf32>, vector<2x32xf32> -> vector<2x32xf32>
    %c0_140 = arith.constant 0 : index
    %c0_141 = arith.constant 0 : index
    %671 = vector.load %arg9[%c0_140, %c0_141] : memref<2x32xf32, #tpu.memory_space<vmem>>, vector<2x32xf32>
    tpu.vector_store %arg9[%c0_140, %c0_141], %670 {strides = array<i32>} : memref<2x32xf32, #tpu.memory_space<vmem>>, vector<2x32xf32>,
    return
  }
}

</mosaic_0001>

<bundles_post_ra>
// kernel: tpu_custom_call.1
= control target key start
LH: loop header
LB: loop body
LE: loop exit
PB: predicated region body
PF: predicated region fallthrough
CT: control target
= control target key end

     0   :  { %14 = vsyncpa [#allocation3], 0  ;;  %s6692_s0 = inlined_call_operand.vmem [shape: f32[64,32], index: 0, kind: input, shape index: {}]   ;;  %s6693_s1 = inlined_call_operand.vmem [shape: f32[2,2,32,128], index: 1, kind: input, shape index: {}]   ;;  %s6694_s2 = inlined_call_operand.vmem [shape: f32[2,2,32,128], index: 2, kind: input, shape index: {}]   ;;  %s6695_s3 = inlined_call_operand.hbm [shape: f32[2,2,32,128], index: 3, kind: input, shape index: {}]   ;;  %s6696_s4 = inlined_call_operand.vmem [shape: f32[2,2,1,128], index: 4, kind: input, shape index: {}]   ;;  %s6697_s5 = inlined_call_operand.vmem [shape: f32[8,64], index: 5, kind: input, shape index: {}]   ;;  %s6698_s6 = inlined_call_operand.vmem [shape: f32[128,32], index: 6, kind: input, shape index: {}]   ;;  %s6699_s7 = inlined_call_operand.vmem [shape: f32[1,32], index: 7, kind: input, shape index: {}]   ;;  %s6700_s8 = inlined_call_operand.vmem [shape: f32[2,8], index: 8, kind: input, shape index: {}]   ;;  %s6701_s9 = inlined_call_operand.hbm [shape: f32[2,32], index: 9, kind: output, shape index: {}]  }
   0x1   :  { %15 = vsyncpa [#allocation4], 0  ;;  %s5851_s30 = smov [#allocation2]   ;;  %s5803_s13 = scalar_lea.hbm %s6695_s3, 2048 }
   0x2   :  { %s27_s10 = sshll.u32 %s5851_s30, 4  ;;  %p5804_p0 = scmp.ne.s32.totalorder %s6695_s3, %s5803_s13  ;;  %s28_s10 = int_to_ptr.vmem [resolvable:$true] %s27_s10 }
   0x3   :  { %p5807_p1 = scmp.lt.u32.totalorder %s5803_s13, %s6695_s3 }
   0x5   :  { %p5809_p2 = pnand %p5807_p1, %p5804_p0 }
   0x7   :  { %5812 = shalt.err (!%p5809_p2)
}
   0x8   :  { %s5813_s18 = scalar_lea.vmem %s28_s10, 2048  ;;  %p5818_p4 = scmp.lt.s32.totalorder %s28_s10, %s28_s10 }
   0x9   :  { %p5814_p3 = scmp.ne.s32.totalorder %s28_s10, %s5813_s18  ;;  %p5819_p5 = scmp.lt.s32.totalorder %s5813_s18, %s5813_s18 }
   0xb   :  { %p5820_p6 = por %p5819_p5, %p5818_p4 }
   0xd   :  { %p5821_p7 = pnand %p5820_p6, %p5814_p3 }
   0xf   :  { %5824 = shalt.err (!%p5821_p7)
}
  0x10   :  { %s5852_s19 = smov 128   ;;  %s5853_s20 = smov 8  }
  0x11   :  { %33 = dma.hbm_to_vmem [thread:$0]  %s6695_s3, 2048, %s28_s10, [#allocation3], %s5852_s19, %s5852_s19, %s5853_s20  }
  0x12   :  { %5847 = dma.done.wait [#allocation3], 2048  }
  0x13   :  { %5848 = vsyncadd [#allocation3], 4294965248  ;;  %vm82_vm0 = vcmask 261120   ;;  %v47_v0 = vld [vmem:[%s6693_s1] sm:$0xff]  ;;  %v48_v1 = vld [vmem:[%s6693_s1 + $0x8] sm:$0xff]  ;;  %v5854_v18 = vmov 0.0|0.0  }
  0x14   :  { %v49_v2 = vld [vmem:[%s6693_s1 + $0x10] sm:$0xff]  ;;  %v5252_v3 = vpack.c.bf16 %v48_v1, %v47_v0  ;;  %v50_v4 = vld [vmem:[%s6693_s1 + $0x18] sm:$0xff]  ;;  %v5937_v5 = vld [vmem:[%s6692_s0 + $0x20] sm:$0xff]  ;;  %vm5855_vm1 = vmmov 0   ;;  %v5856_v32 = vmov 0.0   ;;  %s5857_s14 = smov 32  }
  0x15   :  { %v5256_v6 = vpack.c.bf16 %v50_v4, %v49_v2  ;;  %4748 = vmatprep.mubr.msk.f32.mxu1 %vm82_vm0, %v5937_v5  ;;  %v4341_v7 = vld [vmem:[%s6693_s1 + $0x20] sm:$0xff]  ;;  %v4342_v8 = vld [vmem:[%s6693_s1 + $0x28] sm:$0xff]  ;;  %v4343_v11 = vld [vmem:[%s6693_s1 + $0x30] sm:$0xff]  ;;  %s5858_s15 = smov 64   ;;  %vm4165_vm2 = vcmask 523264   ;;  %vm4250_vm3 = vcmask 64512  }
  0x16   :  { %5516 = vmatprep.subr.bf16.mxu1 %v5252_v3  ;;  %5253 = vmatprep.subr.bf16.mxu0 %v5252_v3  ;;  %v5260_v9 = vpack.c.bf16 %v4342_v8, %v4341_v7  ;;  %v68_v10 = vld [vmem:[%s6692_s0] sm:$0xff]  ;;  %v4344_v12 = vld [vmem:[%s6693_s1 + $0x38] sm:$0xff]  ;;  %v57_v14 = vld [vmem:[#allocation2 + $0x8] sm:$0xff]  ;;  %vm4324_vm4 = vcmask 254976  }
  0x17   :  { %5518 = vmatpush3.bf16.msra.mxu1 %v5252_v3  ;;  %5255 = vmatpush3.bf16.msra.mxu0 %v5252_v3  ;;  %v56_v13 = vld [vmem:[#allocation2] sm:$0xff]  ;;  %v73_v15 = vld [vmem:[%s6692_s0 + $0x28] sm:$0xff]  ;;  %v74_v16 = vld [vmem:[%s6692_s0 + $0x30] sm:$0xff]  ;;  %v5264_v17 = vpack.c.bf16 %v4344_v12, %v4343_v11 }
  0x18   :  { %5517 = vmatprep.subr.bf16.mxu1 %v5256_v6  ;;  %5257 = vmatprep.subr.bf16.mxu0 %v5256_v6  ;;  %v5964_v19 = vpack.c.bf16 %v57_v14, %v56_v13  ;;  %v69_v20 = vld [vmem:[%s6692_s0 + $0x8] sm:$0xff]  ;;  %v58_v21 = vld [vmem:[#allocation2 + $0x10] sm:$0xff]  ;;  %v59_v22 = vld [vmem:[#allocation2 + $0x18] sm:$0xff] }
  0x19   :  { %4742 = vmatprep.mubr.msk.f32.mxu0 %vm82_vm0, %v68_v10  ;;  %v75_v23 = vld [vmem:[%s6692_s0 + $0x38] sm:$0xff]  ;;  %v70_v24 = vld [vmem:[%s6692_s0 + $0x10] sm:$0xff]  ;;  %v61_v25 = vld [vmem:[#allocation2 + $0x20] sm:$0xff]  ;;  %v5979_v27 = vpack.c.bf16 %v59_v22, %v58_v21 }
  0x1a   :  { %v62_v26 = vld [vmem:[#allocation2 + $0x28] sm:$0xff]  ;;  %v71_v28 = vld [vmem:[%s6692_s0 + $0x18] sm:$0xff]  ;;  %v63_v30 = vld [vmem:[#allocation2 + $0x30] sm:$0xff] }
  0x1b   :  { %5519 = vmatpush3.bf16.msra.mxu1 %v5256_v6  ;;  %5259 = vmatpush3.bf16.msra.mxu0 %v5256_v6  ;;  %v5989_v29 = vpack.c.bf16 %v62_v26, %v61_v25  ;;  %v64_v31 = vld [vmem:[#allocation2 + $0x38] sm:$0xff]  ;;  %v4346_v34 = vld [vmem:[%s6696_s4] ss:$0 sm:$0xff]  ;;  %v4355_v49 = vld [vmem:[%s6696_s4 + $0x1] ss:$0 sm:$0xff] }
  0x1c   :  { %5261 = vmatprep.subr.bf16.mxu1 %v5260_v9  ;;  %5268 = vmatprep.subr.bf16.mxu0 %v5854_v18  ;;  %v5999_v33 = vpack.c.bf16 %v64_v31, %v63_v30 }
  0x1e   :  { %4749 = vmatmul.mubr.msk.f32.vlgmr.msra.gmra.mrb[0].mxu1 %vm82_vm0, %v73_v15  ;;  %4743 = vmatmul.mubr.msk.f32.vlgmr.msra.gmra.mrb[0].mxu0 %vm82_vm0, %v69_v20 }
  0x1f   :  { %5263 = vmatpush3.bf16.msra.mxu1 %v5260_v9  ;;  %4751 = vmatprep.mubr.msk.f32.mxu1 %vm82_vm0, %v74_v16 }
  0x20   :  { %5265 = vmatprep.subr.bf16.mxu1 %v5264_v17  ;;  %5270 = vmatpush3.bf16.msra.mxu0 %v5964_v19 }
  0x21   :  { %4745 = vmatprep.mubr.msk.f32.mxu0 %vm82_vm0, %v70_v24  ;;  %5271 = vmatprep.subr.bf16.mxu0 %v5854_v18 }
  0x22   :  { %4752 = vmatmul.mubr.msk.f32.gmra.mrb[2].mxu1 %vm82_vm0, %v75_v23  ;;  %4746 = vmatmul.mubr.msk.f32.gmra.mrb[2].mxu0 %vm82_vm0, %v71_v28 }
  0x23   :  { %5267 = vmatpush3.bf16.msra.mxu1 %v5264_v17  ;;  %4762 = vmatprep.mubr.msk.f32.mxu1 %vm82_vm0, %v68_v10 }
  0x24   :  { %5274 = vmatprep.subr.bf16.mxu1 %v5854_v18  ;;  %5273 = vmatpush3.bf16.msra.mxu0 %v5979_v27 }
  0x25   :  { %4782 = vmatprep.mubr.msk.f32.mxu0 %vm5855_vm1, %v5856_v32  ;;  %5280 = vmatprep.subr.bf16.mxu0 %v5854_v18 }
  0x26   :  { %4763 = vmatmul.mubr.msk.f32.vlgmr.msra.gmra.mrb[4].mxu1 %vm82_vm0, %v69_v20 }
  0x27   :  { %4765 = vmatprep.mubr.msk.f32.mxu1 %vm82_vm0, %v70_v24  ;;  %5276 = vmatpush3.bf16.msra.mxu1 %v5989_v29 }
  0x28   :  { %5277 = vmatprep.subr.bf16.mxu1 %v5854_v18  ;;  %4783 = vmatmul.mubr.f32.vlgmr.msra.gmra.mrb[4].mxu0 %v5856_v32 }
  0x29   :  { %5282 = vmatpush3.bf16.msra.mxu0 %v5964_v19  ;;  %4804 = vmatprep.mubr.msk.f32.mxu0 %vm5855_vm1, %v5856_v32 }
  0x2a   :  { %4766 = vmatmul.mubr.msk.f32.gmra.mrb[6].mxu1 %vm82_vm0, %v71_v28  ;;  %5283 = vmatprep.subr.bf16.mxu0 %v5854_v18 }
  0x2b   :  { %4768 = vmatprep.mubr.msk.f32.mxu1 %vm82_vm0, %v5937_v5  ;;  %5279 = vmatpush3.bf16.msra.mxu1 %v5999_v33 }
  0x2c   :  { %5286 = vmatprep.subr.bf16.mxu1 %v5854_v18 }
  0x2d   :  { %5285 = vmatpush3.bf16.msra.mxu0 %v5979_v27 }
  0x2e   :  { %4769 = vmatmul.mubr.msk.f32.gmra.mrb[8].mxu1 %vm82_vm0, %v73_v15  ;;  %5292 = vmatprep.subr.bf16.mxu0 %v5854_v18 }
  0x2f   :  { %4771 = vmatprep.mubr.msk.f32.mxu1 %vm82_vm0, %v74_v16 }
  0x32   :  { %4772 = vmatmul.mubr.msk.f32.gmra.mrb[10].mxu1 %vm82_vm0, %v75_v23 }
  0x33   :  { %4793 = vmatprep.mubr.msk.f32.mxu1 %vm5855_vm1, %v5856_v32 }
  0x36   :  { %4794 = vmatmul.mubr.f32.vlgmr.msra.gmra.mrb[12].mxu1 %v5856_v32 }
  0x37   :  { %5288 = vmatpush3.bf16.msra.mxu1 %v5989_v29  ;;  %4815 = vmatprep.mubr.msk.f32.mxu1 %vm5855_vm1, %v5856_v32 }
  0x38   :  { %5289 = vmatprep.subr.bf16.mxu1 %v5854_v18 }
  0x3b   :  { %5291 = vmatpush3.bf16.msra.mxu1 %v5999_v33 }
  0x3c   :  { %5298 = vmatprep.subr.bf16.mxu1 %v5854_v18 }
  0xf1   :  { %v4750_v35 = vpop.f32.mrb[0].mxu1  ;;  %v4744_v36 = vpop.f32.mrb[0].mxu0 }
  0xf2   :  { %v6029_v37 = vadd.f32 %v4750_v35, %v4346_v34  ;;  %v193_v38 = vpop.f32.mrb[1].mxu1  ;;  %v6031_v39 = vadd.f32 %v4744_v36, %v4346_v34  ;;  %v173_v40 = vpop.f32.mrb[1].mxu0 }
  0xf3   :  { %v6033_v41 = vadd.f32 %v4346_v34, %v193_v38  ;;  %v174_v51 = vadd.f32 %v4346_v34, %v173_v40 }
  0xf5   :  { %v4753_v42 = vpop.f32.mrb[2].mxu1  ;;  %v4747_v43 = vpop.f32.mrb[2].mxu0 }
  0xf6   :  { %v6035_v44 = vadd.f32 %v4753_v42, %v4346_v34  ;;  %v203_v45 = vpop.f32.mrb[3].mxu1  ;;  %v6037_v46 = vadd.f32 %v4747_v43, %v4346_v34  ;;  %v183_v47 = vpop.f32.mrb[3].mxu0 }
  0xf7   :  { %v6039_v48 = vadd.f32 %v4346_v34, %v203_v45  ;;  %v6044_v50 = vadd.f32 %v4346_v34, %v183_v47 }
  0xf9   :  { %v4764_v52 = vpop.f32.mrb[4].mxu1 }
  0xfa   :  { %v6046_v53 = vadd.f32 %v4764_v52, %v4355_v49  ;;  %v284_v54 = vpop.f32.mrb[5].mxu1 }
  0xfb   :  { %v6048_v55 = vadd.f32 %v4355_v49, %v284_v54  ;;  %v392_v56 = vpop.f32.mrb[4].mxu0 }
  0xfc   :  { %v396_v57 = vadd.f32 %v392_v56, %v174_v51  ;;  %v4784_v58 = vpop.f32.mrb[5].mxu0 }
  0xfd   :  { %v4767_v59 = vpop.f32.mrb[6].mxu1 }
  0xfe   :  { %v6050_v60 = vadd.f32 %v4767_v59, %v4355_v49  ;;  %v294_v61 = vpop.f32.mrb[7].mxu1  ;;  %v4364_v13 = vmul.f32 -1.442695, %v396_v57 }
  0xff   :  { %v6052_v62 = vadd.f32 %v4355_v49, %v294_v61 }
 0x101   :  { %v4770_v63 = vpop.f32.mrb[8].mxu1 }
 0x102   :  { %v6054_v0 = vadd.f32 %v4770_v63, %v4355_v49  ;;  %v304_v1 = vpop.f32.mrb[9].mxu1 }
 0x103   :  { %v6056_v2 = vadd.f32 %v4355_v49, %v304_v1 }
 0x105   :  { %v4773_v3 = vpop.f32.mrb[10].mxu1 }
 0x106   :  { %v314_v4 = vpop.f32.mrb[11].mxu1  ;;  %v320_v6 = vadd.f32 %v4773_v3, %v4355_v49 }
 0x107   :  { %v6058_v5 = vadd.f32 %v4355_v49, %v314_v4 }
 0x109   :  { %v463_v7 = vpop.f32.mrb[12].mxu1 }
 0x10a   :  { %v467_v8 = vadd.f32 %v463_v7, %v320_v6  ;;  %v4795_v9 = vpop.f32.mrb[13].mxu1 }
 0x10c   :  { %5545 = vtanh.f32 %v467_v8  ;;  %v4365_v12 = vmul.f32 -1.442695, %v467_v8 }
 0x10d   :  { %5547 = vtanh.f32 %v396_v57 }
 0x10e   :  { %5549 = vpow2.f32 %v4365_v12 }
 0x10f   :  { %5551 = vpow2.f32 %v4364_v13 }
 0x116   :  { %v5546_v10 = vpop.eup %5545 }
 0x117   :  { %495 = vrot.lane.b32.xlu0 %v5546_v10, %s5857_s14  ;;  %v5548_v11 = vpop.eup %5547 }
 0x118   :  { %v5550_v14 = vpop.eup %5549 }
 0x119   :  { %v477_v15 = vadd.f32 1.0, %v5550_v14  ;;  %v5552_v16 = vpop.eup %5551 }
 0x11a   :  { %v471_v17 = vadd.f32 1.0, %v5552_v16 }
 0x11b   :  { %484 = vrot.lane.b32.xlu0 %v5548_v11, %s5857_s14  ;;  %5553 = vrcp.f32 %v477_v15 }
 0x11c   :  { %5555 = vrcp.f32 %v471_v17 }
 0x125   :  { %v5554_v20 = vpop.eup %5553 }
 0x126   :  { %v5556_v23 = vpop.eup %5555  ;;  %v493_v26 = vmul.f32 0.0, %v5554_v20 }
 0x127   :  { %v482_v31 = vmul.f32 0.0, %v5556_v23 }
 0x189   :  { %v496_v21 = vpop.permute.xlu0 %495 }
 0x18a   :  { %v498_v22 = vmul.f32 %v5554_v20, %v496_v21 }
 0x18c   :  { %500 = vrot.lane.b32.xlu1 %v498_v22, %s5857_s14 }
 0x18d   :  { %v485_v24 = vpop.permute.xlu0 %484 }
 0x18e   :  { %v487_v25 = vmul.f32 %v5556_v23, %v485_v24 }
 0x190   :  { %489 = vrot.lane.b32.xlu1 %v487_v25, %s5857_s14 }
 0x1fe   :  { %v501_v28 = vpop.permute.xlu1 %500 }
 0x1ff   :  { %v503_v30 = vadd.f32 %v501_v28, %v493_v26 }
 0x201   :  { %5557 = vtanh.f32 %v503_v30 }
 0x202   :  { %v490_v34 = vpop.permute.xlu1 %489 }
 0x203   :  { %v492_v35 = vadd.f32 %v490_v34, %v482_v31 }
 0x205   :  { %5559 = vtanh.f32 %v492_v35 }
 0x20b   :  { %v5558_v36 = vpop.eup %5557 }
 0x20c   :  { %512 = vrot.lane.b32.xlu0 %v5558_v36, %s5857_s14 }
 0x20f   :  { %v5560_v38 = vpop.eup %5559 }
 0x210   :  { %506 = vrot.lane.b32.xlu1 %v5560_v38, %s5857_s14 }
 0x27e   :  { %v513_v40 = vpop.permute.xlu0 %512 }
 0x27f   :  { %v515_v42 = vmul.f32 %v5554_v20, %v513_v40 }
 0x281   :  { %593 = vrot.lane.b32.xlu0 %v515_v42, %s5858_s15 }
 0x282   :  { %v507_v43 = vpop.permute.xlu1 %506 }
 0x283   :  { %v509_v45 = vmul.f32 %v5556_v23, %v507_v43 }
 0x285   :  { %517 = vrot.lane.b32.xlu1 %v509_v45, %s5858_s15 }
 0x2f3   :  { %v6068_v47 = vpop.permute.xlu0 %593 }
 0x2f4   :  { %4816 = vmatmul.mubr.msk.f32.vlgmr.msra.gmra.mrb[14].mxu1 %vm82_vm0, %v6068_v47 }
 0x2f5   :  { %5300 = vmatpush3.bf16.msra.mxu1 %v5989_v29  ;;  %4837 = vmatprep.mubr.msk.f32.mxu1 %vm5855_vm1, %v5856_v32 }
 0x2f6   :  { %5301 = vmatprep.subr.bf16.mxu1 %v5854_v18 }
 0x2f7   :  { %v6076_v49 = vpop.permute.xlu1 %517 }
 0x2f8   :  { %4805 = vmatmul.mubr.msk.f32.vlgmr.msra.gmra.mrb[6].mxu0 %vm82_vm0, %v6076_v49 }
 0x2f9   :  { %5294 = vmatpush3.bf16.msra.mxu0 %v5964_v19  ;;  %5303 = vmatpush3.bf16.msra.mxu1 %v5999_v33 }
 0x2fa   :  { %5295 = vmatprep.subr.bf16.mxu0 %v5854_v18  ;;  %4826 = vmatprep.mubr.msk.f32.mxu0 %vm5855_vm1, %v5856_v32 }
 0x2fb   :  { %5310 = vmatprep.subr.bf16.mxu1 %v5854_v18 }
 0x2fd   :  { %5297 = vmatpush3.bf16.msra.mxu0 %v5979_v27 }
 0x2fe   :  { %5304 = vmatprep.subr.bf16.mxu0 %v5854_v18 }
 0x3c7   :  { %v663_v51 = vpop.f32.mrb[14].mxu1 }
 0x3c8   :  { %v667_v52 = vadd.f32 %v663_v51, %v6058_v5  ;;  %v4817_v54 = vpop.f32.mrb[15].mxu1 }
 0x3ca   :  { %5561 = vtanh.f32 %v667_v52  ;;  %v4369_v63 = vmul.f32 -1.442695, %v667_v52 }
 0x3cb   :  { %v587_v56 = vpop.f32.mrb[6].mxu0 }
 0x3cc   :  { %v591_v57 = vadd.f32 %v587_v56, %v6031_v39  ;;  %v4806_v58 = vpop.f32.mrb[7].mxu0 }
 0x3ce   :  { %5563 = vtanh.f32 %v591_v57  ;;  %v4368_v1 = vmul.f32 -1.442695, %v591_v57 }
 0x3cf   :  { %5565 = vpow2.f32 %v4369_v63 }
 0x3d0   :  { %5567 = vpow2.f32 %v4368_v1 }
 0x3d4   :  { %v5562_v59 = vpop.eup %5561 }
 0x3d5   :  { %695 = vrot.lane.b32.xlu0 %v5562_v59, %s5857_s14 }
 0x3d8   :  { %v5564_v61 = vpop.eup %5563 }
 0x3d9   :  { %684 = vrot.lane.b32.xlu1 %v5564_v61, %s5857_s14  ;;  %v5566_v3 = vpop.eup %5565 }
 0x3da   :  { %v677_v4 = vadd.f32 1.0, %v5566_v3  ;;  %v5568_v5 = vpop.eup %5567 }
 0x3db   :  { %v671_v6 = vadd.f32 1.0, %v5568_v5 }
 0x3dc   :  { %5569 = vrcp.f32 %v677_v4 }
 0x3dd   :  { %5571 = vrcp.f32 %v671_v6 }
 0x3e6   :  { %v5570_v7 = vpop.eup %5569 }
 0x3e7   :  { %v5572_v9 = vpop.eup %5571  ;;  %v693_v12 = vmul.f32 %v5570_v7, %v503_v30 }
 0x3e8   :  { %v682_v15 = vmul.f32 %v5572_v9, %v492_v35 }
 0x447   :  { %v696_v39 = vpop.permute.xlu0 %695 }
 0x448   :  { %v698_v8 = vmul.f32 %v5570_v7, %v696_v39 }
 0x44a   :  { %700 = vrot.lane.b32.xlu0 %v698_v8, %s5857_s14 }
 0x44b   :  { %v685_v10 = vpop.permute.xlu1 %684 }
 0x44c   :  { %v687_v11 = vmul.f32 %v5572_v9, %v685_v10 }
 0x44e   :  { %689 = vrot.lane.b32.xlu1 %v687_v11, %s5857_s14 }
 0x4bc   :  { %v701_v13 = vpop.permute.xlu0 %700 }
 0x4bd   :  { %v703_v14 = vadd.f32 %v701_v13, %v693_v12 }
 0x4bf   :  { %5573 = vtanh.f32 %v703_v14 }
 0x4c0   :  { %v690_v16 = vpop.permute.xlu1 %689 }
 0x4c1   :  { %v692_v17 = vadd.f32 %v690_v16, %v682_v15 }
 0x4c3   :  { %5575 = vtanh.f32 %v692_v17 }
 0x4c9   :  { %v5574_v20 = vpop.eup %5573 }
 0x4ca   :  { %712 = vrot.lane.b32.xlu0 %v5574_v20, %s5857_s14 }
 0x4cd   :  { %v5576_v21 = vpop.eup %5575 }
 0x4ce   :  { %706 = vrot.lane.b32.xlu1 %v5576_v21, %s5857_s14 }
 0x53c   :  { %v713_v22 = vpop.permute.xlu0 %712 }
 0x53d   :  { %v715_v23 = vmul.f32 %v5570_v7, %v713_v22 }
 0x53f   :  { %793 = vrot.lane.b32.xlu0 %v715_v23, %s5858_s15 }
 0x540   :  { %v707_v24 = vpop.permute.xlu1 %706 }
 0x541   :  { %v709_v25 = vmul.f32 %v5572_v9, %v707_v24 }
 0x543   :  { %717 = vrot.lane.b32.xlu1 %v709_v25, %s5858_s15 }
 0x5b1   :  { %v6098_v26 = vpop.permute.xlu0 %793 }
 0x5b2   :  { %4838 = vmatmul.mubr.msk.f32.vlgmr.msra.gmra.mrb[16].mxu1 %vm82_vm0, %v6098_v26 }
 0x5b3   :  { %5312 = vmatpush3.bf16.msra.mxu1 %v5989_v29  ;;  %4859 = vmatprep.mubr.msk.f32.mxu1 %vm5855_vm1, %v5856_v32 }
 0x5b4   :  { %5313 = vmatprep.subr.bf16.mxu1 %v5854_v18 }
 0x5b5   :  { %v6106_v28 = vpop.permute.xlu1 %717 }
 0x5b6   :  { %4827 = vmatmul.mubr.msk.f32.vlgmr.msra.gmra.mrb[8].mxu0 %vm82_vm0, %v6106_v28 }
 0x5b7   :  { %5306 = vmatpush3.bf16.msra.mxu0 %v5964_v19  ;;  %5315 = vmatpush3.bf16.msra.mxu1 %v5999_v33 }
 0x5b8   :  { %5307 = vmatprep.subr.bf16.mxu0 %v5854_v18  ;;  %4848 = vmatprep.mubr.msk.f32.mxu0 %vm5855_vm1, %v5856_v32 }
 0x5b9   :  { %5322 = vmatprep.subr.bf16.mxu1 %v5854_v18 }
 0x5bb   :  { %5309 = vmatpush3.bf16.msra.mxu0 %v5979_v27 }
 0x5bc   :  { %5316 = vmatprep.subr.bf16.mxu0 %v5854_v18 }
 0x685   :  { %v863_v30 = vpop.f32.mrb[16].mxu1 }
 0x686   :  { %v867_v31 = vadd.f32 %v863_v30, %v6054_v0  ;;  %v4839_v34 = vpop.f32.mrb[17].mxu1 }
 0x688   :  { %5577 = vtanh.f32 %v867_v31  ;;  %v4373_v43 = vmul.f32 -1.442695, %v867_v31 }
 0x689   :  { %v787_v35 = vpop.f32.mrb[8].mxu0 }
 0x68a   :  { %v791_v36 = vadd.f32 %v787_v35, %v6044_v50  ;;  %v4828_v38 = vpop.f32.mrb[9].mxu0 }
 0x68c   :  { %5579 = vtanh.f32 %v791_v36  ;;  %v4372_v45 = vmul.f32 -1.442695, %v791_v36 }
 0x68d   :  { %5581 = vpow2.f32 %v4373_v43 }
 0x68e   :  { %5583 = vpow2.f32 %v4372_v45 }
 0x692   :  { %v5578_v40 = vpop.eup %5577 }
 0x693   :  { %895 = vrot.lane.b32.xlu0 %v5578_v40, %s5857_s14 }
 0x696   :  { %v5580_v42 = vpop.eup %5579 }
 0x697   :  { %884 = vrot.lane.b32.xlu1 %v5580_v42, %s5857_s14  ;;  %v5582_v51 = vpop.eup %5581 }
 0x698   :  { %v877_v52 = vadd.f32 1.0, %v5582_v51  ;;  %v5584_v0 = vpop.eup %5583 }
 0x699   :  { %v871_v54 = vadd.f32 1.0, %v5584_v0 }
 0x69a   :  { %5585 = vrcp.f32 %v877_v52 }
 0x69b   :  { %5587 = vrcp.f32 %v871_v54 }
 0x6a4   :  { %v5586_v56 = vpop.eup %5585 }
 0x6a5   :  { %v5588_v58 = vpop.eup %5587  ;;  %v893_v63 = vmul.f32 %v5586_v56, %v703_v14 }
 0x6a6   :  { %v882_v4 = vmul.f32 %v5588_v58, %v692_v17 }
 0x705   :  { %v896_v50 = vpop.permute.xlu0 %895 }
 0x706   :  { %v898_v57 = vmul.f32 %v5586_v56, %v896_v50 }
 0x708   :  { %900 = vrot.lane.b32.xlu0 %v898_v57, %s5857_s14 }
 0x709   :  { %v885_v59 = vpop.permute.xlu1 %884 }
 0x70a   :  { %v887_v61 = vmul.f32 %v5588_v58, %v885_v59 }
 0x70c   :  { %889 = vrot.lane.b32.xlu1 %v887_v61, %s5857_s14 }
 0x77a   :  { %v901_v1 = vpop.permute.xlu0 %900 }
 0x77b   :  { %v903_v3 = vadd.f32 %v901_v1, %v893_v63 }
 0x77d   :  { %5589 = vtanh.f32 %v903_v3 }
 0x77e   :  { %v890_v5 = vpop.permute.xlu1 %889 }
 0x77f   :  { %v892_v6 = vadd.f32 %v890_v5, %v882_v4 }
 0x781   :  { %5591 = vtanh.f32 %v892_v6 }
 0x787   :  { %v5590_v7 = vpop.eup %5589 }
 0x788   :  { %912 = vrot.lane.b32.xlu0 %v5590_v7, %s5857_s14 }
 0x78b   :  { %v5592_v39 = vpop.eup %5591 }
 0x78c   :  { %906 = vrot.lane.b32.xlu1 %v5592_v39, %s5857_s14 }
 0x7fa   :  { %v913_v8 = vpop.permute.xlu0 %912 }
 0x7fb   :  { %v915_v9 = vmul.f32 %v5586_v56, %v913_v8 }
 0x7fd   :  { %993 = vrot.lane.b32.xlu0 %v915_v9, %s5858_s15 }
 0x7fe   :  { %v907_v10 = vpop.permute.xlu1 %906 }
 0x7ff   :  { %v909_v11 = vmul.f32 %v5588_v58, %v907_v10 }
 0x801   :  { %917 = vrot.lane.b32.xlu1 %v909_v11, %s5858_s15 }
 0x86f   :  { %v6128_v12 = vpop.permute.xlu0 %993 }
 0x870   :  { %4860 = vmatmul.mubr.msk.f32.vlgmr.msra.gmra.mrb[18].mxu1 %vm82_vm0, %v6128_v12 }
 0x871   :  { %5324 = vmatpush3.bf16.msra.mxu1 %v5989_v29  ;;  %4881 = vmatprep.mubr.msk.f32.mxu1 %vm5855_vm1, %v5856_v32 }
 0x872   :  { %5325 = vmatprep.subr.bf16.mxu1 %v5854_v18 }
 0x873   :  { %v6136_v13 = vpop.permute.xlu1 %917 }
 0x874   :  { %4849 = vmatmul.mubr.msk.f32.vlgmr.msra.gmra.mrb[10].mxu0 %vm82_vm0, %v6136_v13 }
 0x875   :  { %5318 = vmatpush3.bf16.msra.mxu0 %v5964_v19  ;;  %5327 = vmatpush3.bf16.msra.mxu1 %v5999_v33 }
 0x876   :  { %5319 = vmatprep.subr.bf16.mxu0 %v5854_v18  ;;  %4870 = vmatprep.mubr.msk.f32.mxu0 %vm5855_vm1, %v5856_v32 }
 0x877   :  { %5334 = vmatprep.subr.bf16.mxu1 %v5854_v18 }
 0x879   :  { %5321 = vmatpush3.bf16.msra.mxu0 %v5979_v27 }
 0x87a   :  { %5328 = vmatprep.subr.bf16.mxu0 %v5854_v18 }
 0x943   :  { %v1063_v14 = vpop.f32.mrb[18].mxu1 }
 0x944   :  { %v1067_v15 = vadd.f32 %v1063_v14, %v6056_v2  ;;  %v4861_v16 = vpop.f32.mrb[19].mxu1 }
 0x946   :  { %5593 = vtanh.f32 %v1067_v15  ;;  %v4377_v24 = vmul.f32 -1.442695, %v1067_v15 }
 0x947   :  { %v987_v17 = vpop.f32.mrb[10].mxu0 }
 0x948   :  { %v991_v20 = vadd.f32 %v987_v17, %v6037_v46  ;;  %v4850_v21 = vpop.f32.mrb[11].mxu0 }
 0x94a   :  { %5595 = vtanh.f32 %v991_v20  ;;  %v4376_v25 = vmul.f32 -1.442695, %v991_v20 }
 0x94b   :  { %5597 = vpow2.f32 %v4377_v24 }
 0x94c   :  { %5599 = vpow2.f32 %v4376_v25 }
 0x950   :  { %v5594_v22 = vpop.eup %5593 }
 0x951   :  { %1095 = vrot.lane.b32.xlu0 %v5594_v22, %s5857_s14 }
 0x954   :  { %v5596_v23 = vpop.eup %5595 }
 0x955   :  { %1084 = vrot.lane.b32.xlu1 %v5596_v23, %s5857_s14  ;;  %v5598_v30 = vpop.eup %5597 }
 0x956   :  { %v1077_v31 = vadd.f32 1.0, %v5598_v30  ;;  %v5600_v2 = vpop.eup %5599 }
 0x957   :  { %v1071_v34 = vadd.f32 1.0, %v5600_v2 }
 0x958   :  { %5601 = vrcp.f32 %v1077_v31 }
 0x959   :  { %5603 = vrcp.f32 %v1071_v34 }
 0x962   :  { %v5602_v35 = vpop.eup %5601 }
 0x963   :  { %v5604_v38 = vpop.eup %5603  ;;  %v1093_v43 = vmul.f32 %v5602_v35, %v903_v3 }
 0x964   :  { %v1082_v52 = vmul.f32 %v5604_v38, %v892_v6 }
 0x9c3   :  { %v1096_v46 = vpop.permute.xlu0 %1095 }
 0x9c4   :  { %v1098_v36 = vmul.f32 %v5602_v35, %v1096_v46 }
 0x9c6   :  { %1100 = vrot.lane.b32.xlu0 %v1098_v36, %s5857_s14 }
 0x9c7   :  { %v1085_v40 = vpop.permute.xlu1 %1084 }
 0x9c8   :  { %v1087_v42 = vmul.f32 %v5604_v38, %v1085_v40 }
 0x9ca   :  { %1089 = vrot.lane.b32.xlu1 %v1087_v42, %s5857_s14 }
 0xa38   :  { %v1101_v45 = vpop.permute.xlu0 %1100 }
 0xa39   :  { %v1103_v51 = vadd.f32 %v1101_v45, %v1093_v43 }
 0xa3b   :  { %5605 = vtanh.f32 %v1103_v51 }
 0xa3c   :  { %v1090_v0 = vpop.permute.xlu1 %1089 }
 0xa3d   :  { %v1092_v54 = vadd.f32 %v1090_v0, %v1082_v52 }
 0xa3f   :  { %5607 = vtanh.f32 %v1092_v54 }
 0xa45   :  { %v5606_v56 = vpop.eup %5605 }
 0xa46   :  { %1112 = vrot.lane.b32.xlu0 %v5606_v56, %s5857_s14 }
 0xa49   :  { %v5608_v50 = vpop.eup %5607 }
 0xa4a   :  { %1106 = vrot.lane.b32.xlu1 %v5608_v50, %s5857_s14 }
 0xab8   :  { %v1113_v57 = vpop.permute.xlu0 %1112 }
 0xab9   :  { %v1115_v58 = vmul.f32 %v5602_v35, %v1113_v57 }
 0xabb   :  { %1193 = vrot.lane.b32.xlu0 %v1115_v58, %s5858_s15 }
 0xabc   :  { %v1107_v59 = vpop.permute.xlu1 %1106 }
 0xabd   :  { %v1109_v61 = vmul.f32 %v5604_v38, %v1107_v59 }
 0xabf   :  { %1117 = vrot.lane.b32.xlu1 %v1109_v61, %s5858_s15 }
 0xb2d   :  { %v6158_v63 = vpop.permute.xlu0 %1193 }
 0xb2e   :  { %4882 = vmatmul.mubr.msk.f32.vlgmr.msra.gmra.mrb[20].mxu1 %vm82_vm0, %v6158_v63 }
 0xb2f   :  { %5336 = vmatpush3.bf16.msra.mxu1 %v5989_v29  ;;  %4903 = vmatprep.mubr.msk.f32.mxu1 %vm5855_vm1, %v5856_v32 }
 0xb30   :  { %5337 = vmatprep.subr.bf16.mxu1 %v5854_v18 }
 0xb31   :  { %v6166_v1 = vpop.permute.xlu1 %1117 }
 0xb32   :  { %4871 = vmatmul.mubr.msk.f32.vlgmr.msra.gmra.mrb[12].mxu0 %vm82_vm0, %v6166_v1 }
 0xb33   :  { %5330 = vmatpush3.bf16.msra.mxu0 %v5964_v19  ;;  %5339 = vmatpush3.bf16.msra.mxu1 %v5999_v33 }
 0xb34   :  { %5331 = vmatprep.subr.bf16.mxu0 %v5854_v18  ;;  %4892 = vmatprep.mubr.msk.f32.mxu0 %vm5855_vm1, %v5856_v32 }
 0xb35   :  { %5346 = vmatprep.subr.bf16.mxu1 %v5854_v18 }
 0xb37   :  { %5333 = vmatpush3.bf16.msra.mxu0 %v5979_v27 }
 0xb38   :  { %5340 = vmatprep.subr.bf16.mxu0 %v5854_v18 }
 0xc01   :  { %v1263_v3 = vpop.f32.mrb[20].mxu1 }
 0xc02   :  { %v1267_v4 = vadd.f32 %v1263_v3, %v6050_v60  ;;  %v4883_v5 = vpop.f32.mrb[21].mxu1 }
 0xc04   :  { %5609 = vtanh.f32 %v1267_v4  ;;  %v4381_v10 = vmul.f32 -1.442695, %v1267_v4 }
 0xc05   :  { %v1187_v6 = vpop.f32.mrb[12].mxu0 }
 0xc06   :  { %v1191_v7 = vadd.f32 %v1187_v6, %v6033_v41  ;;  %v4872_v39 = vpop.f32.mrb[13].mxu0 }
 0xc08   :  { %5611 = vtanh.f32 %v1191_v7  ;;  %v4380_v11 = vmul.f32 -1.442695, %v1191_v7 }
 0xc09   :  { %5613 = vpow2.f32 %v4381_v10 }
 0xc0a   :  { %5615 = vpow2.f32 %v4380_v11 }
 0xc0e   :  { %v5610_v8 = vpop.eup %5609 }
 0xc0f   :  { %1295 = vrot.lane.b32.xlu0 %v5610_v8, %s5857_s14 }
 0xc12   :  { %v5612_v9 = vpop.eup %5611 }
 0xc13   :  { %1284 = vrot.lane.b32.xlu1 %v5612_v9, %s5857_s14  ;;  %v5614_v14 = vpop.eup %5613 }
 0xc14   :  { %v1277_v15 = vadd.f32 1.0, %v5614_v14  ;;  %v5616_v60 = vpop.eup %5615 }
 0xc15   :  { %v1271_v16 = vadd.f32 1.0, %v5616_v60 }
 0xc16   :  { %5617 = vrcp.f32 %v1277_v15 }
 0xc17   :  { %5619 = vrcp.f32 %v1271_v16 }
 0xc20   :  { %v5618_v17 = vpop.eup %5617 }
 0xc21   :  { %v5620_v21 = vpop.eup %5619  ;;  %v1293_v24 = vmul.f32 %v5618_v17, %v1103_v51 }
 0xc22   :  { %v1282_v31 = vmul.f32 %v5620_v21, %v1092_v54 }
 0xc81   :  { %v1296_v41 = vpop.permute.xlu0 %1295 }
 0xc82   :  { %v1298_v20 = vmul.f32 %v5618_v17, %v1296_v41 }
 0xc84   :  { %1300 = vrot.lane.b32.xlu0 %v1298_v20, %s5857_s14 }
 0xc85   :  { %v1285_v22 = vpop.permute.xlu1 %1284 }
 0xc86   :  { %v1287_v23 = vmul.f32 %v5620_v21, %v1285_v22 }
 0xc88   :  { %1289 = vrot.lane.b32.xlu1 %v1287_v23, %s5857_s14 }
 0xcf6   :  { %v1301_v25 = vpop.permute.xlu0 %1300 }
 0xcf7   :  { %v1303_v30 = vadd.f32 %v1301_v25, %v1293_v24 }
 0xcf9   :  { %5621 = vtanh.f32 %v1303_v30 }
 0xcfa   :  { %v1290_v2 = vpop.permute.xlu1 %1289 }
 0xcfb   :  { %v1292_v34 = vadd.f32 %v1290_v2, %v1282_v31 }
 0xcfd   :  { %5623 = vtanh.f32 %v1292_v34 }
 0xd03   :  { %v5622_v35 = vpop.eup %5621 }
 0xd04   :  { %1312 = vrot.lane.b32.xlu0 %v5622_v35, %s5857_s14 }
 0xd07   :  { %v5624_v46 = vpop.eup %5623 }
 0xd08   :  { %1306 = vrot.lane.b32.xlu1 %v5624_v46, %s5857_s14 }
 0xd76   :  { %v1313_v36 = vpop.permute.xlu0 %1312 }
 0xd77   :  { %v1315_v38 = vmul.f32 %v5618_v17, %v1313_v36 }
 0xd79   :  { %1393 = vrot.lane.b32.xlu0 %v1315_v38, %s5858_s15 }
 0xd7a   :  { %v1307_v40 = vpop.permute.xlu1 %1306 }
 0xd7b   :  { %v1309_v42 = vmul.f32 %v5620_v21, %v1307_v40 }
 0xd7d   :  { %1317 = vrot.lane.b32.xlu1 %v1309_v42, %s5858_s15 }
 0xdeb   :  { %v6188_v43 = vpop.permute.xlu0 %1393 }
 0xdec   :  { %4904 = vmatmul.mubr.msk.f32.vlgmr.msra.gmra.mrb[22].mxu1 %vm82_vm0, %v6188_v43 }
 0xded   :  { %5348 = vmatpush3.bf16.msra.mxu1 %v5989_v29  ;;  %4925 = vmatprep.mubr.msk.f32.mxu1 %vm5855_vm1, %v5856_v32 }
 0xdee   :  { %5349 = vmatprep.subr.bf16.mxu1 %v5854_v18 }
 0xdef   :  { %v6196_v45 = vpop.permute.xlu1 %1317 }
 0xdf0   :  { %4893 = vmatmul.mubr.msk.f32.vlgmr.msra.gmra.mrb[14].mxu0 %vm82_vm0, %v6196_v45 }
 0xdf1   :  { %5342 = vmatpush3.bf16.msra.mxu0 %v5964_v19  ;;  %5351 = vmatpush3.bf16.msra.mxu1 %v5999_v33 }
 0xdf2   :  { %5343 = vmatprep.subr.bf16.mxu0 %v5854_v18  ;;  %4914 = vmatprep.mubr.msk.f32.mxu0 %vm5855_vm1, %v5856_v32 }
 0xdf3   :  { %5358 = vmatprep.subr.bf16.mxu1 %v5854_v18 }
 0xdf5   :  { %5345 = vmatpush3.bf16.msra.mxu0 %v5979_v27 }
 0xdf6   :  { %5352 = vmatprep.subr.bf16.mxu0 %v5854_v18 }
 0xebf   :  { %v1463_v51 = vpop.f32.mrb[22].mxu1 }
 0xec0   :  { %v1467_v52 = vadd.f32 %v1463_v51, %v6052_v62  ;;  %v4905_v0 = vpop.f32.mrb[23].mxu1 }
 0xec2   :  { %5625 = vtanh.f32 %v1467_v52  ;;  %v4385_v59 = vmul.f32 -1.442695, %v1467_v52 }
 0xec3   :  { %v1387_v54 = vpop.f32.mrb[14].mxu0 }
 0xec4   :  { %v1391_v56 = vadd.f32 %v1387_v54, %v6029_v37  ;;  %v4894_v50 = vpop.f32.mrb[15].mxu0 }
 0xec6   :  { %5627 = vtanh.f32 %v1391_v56  ;;  %v4384_v61 = vmul.f32 -1.442695, %v1391_v56 }
 0xec7   :  { %5629 = vpow2.f32 %v4385_v59 }
 0xec8   :  { %5631 = vpow2.f32 %v4384_v61 }
 0xecc   :  { %v5626_v57 = vpop.eup %5625 }
 0xecd   :  { %1495 = vrot.lane.b32.xlu0 %v5626_v57, %s5857_s14 }
 0xed0   :  { %v5628_v58 = vpop.eup %5627 }
 0xed1   :  { %1484 = vrot.lane.b32.xlu1 %v5628_v58, %s5857_s14  ;;  %v5630_v3 = vpop.eup %5629 }
 0xed2   :  { %v1477_v4 = vadd.f32 1.0, %v5630_v3  ;;  %v5632_v62 = vpop.eup %5631 }
 0xed3   :  { %v1471_v5 = vadd.f32 1.0, %v5632_v62 }
 0xed4   :  { %5633 = vrcp.f32 %v1477_v4 }
 0xed5   :  { %5635 = vrcp.f32 %v1471_v5 }
 0xede   :  { %v5634_v6 = vpop.eup %5633 }
 0xedf   :  { %v5636_v39 = vpop.eup %5635  ;;  %v1493_v10 = vmul.f32 %v5634_v6, %v1303_v30 }
 0xee0   :  { %v1482_v15 = vmul.f32 %v5636_v39, %v1292_v34 }
 0xf3f   :  { %v1496_v37 = vpop.permute.xlu0 %1495 }
 0xf40   :  { %v1498_v7 = vmul.f32 %v5634_v6, %v1496_v37 }
 0xf42   :  { %1500 = vrot.lane.b32.xlu0 %v1498_v7, %s5857_s14 }
 0xf43   :  { %v1485_v8 = vpop.permute.xlu1 %1484 }
 0xf44   :  { %v1487_v9 = vmul.f32 %v5636_v39, %v1485_v8 }
 0xf46   :  { %1489 = vrot.lane.b32.xlu1 %v1487_v9, %s5857_s14 }
 0xfb4   :  { %v1501_v11 = vpop.permute.xlu0 %1500 }
 0xfb5   :  { %v1503_v14 = vadd.f32 %v1501_v11, %v1493_v10 }
 0xfb7   :  { %5637 = vtanh.f32 %v1503_v14 }
 0xfb8   :  { %v1490_v60 = vpop.permute.xlu1 %1489 }
 0xfb9   :  { %v1492_v16 = vadd.f32 %v1490_v60, %v1482_v15 }
 0xfbb   :  { %5639 = vtanh.f32 %v1492_v16 }
 0xfc1   :  { %v5638_v17 = vpop.eup %5637 }
 0xfc2   :  { %1512 = vrot.lane.b32.xlu0 %v5638_v17, %s5857_s14 }
 0xfc5   :  { %v5640_v41 = vpop.eup %5639 }
 0xfc6   :  { %1506 = vrot.lane.b32.xlu1 %v5640_v41, %s5857_s14 }
0x1034   :  { %v1513_v20 = vpop.permute.xlu0 %1512 }
0x1035   :  { %v1515_v21 = vmul.f32 %v5634_v6, %v1513_v20 }
0x1037   :  { %1593 = vrot.lane.b32.xlu0 %v1515_v21, %s5858_s15 }
0x1038   :  { %v1507_v22 = vpop.permute.xlu1 %1506 }
0x1039   :  { %v1509_v23 = vmul.f32 %v5636_v39, %v1507_v22 }
0x103b   :  { %1517 = vrot.lane.b32.xlu1 %v1509_v23, %s5858_s15 }
0x10a9   :  { %v6218_v24 = vpop.permute.xlu0 %1593 }
0x10aa   :  { %4926 = vmatmul.mubr.msk.f32.vlgmr.msra.gmra.mrb[24].mxu1 %vm82_vm0, %v6218_v24 }
0x10ab   :  { %5360 = vmatpush3.bf16.msra.mxu1 %v5989_v29  ;;  %4947 = vmatprep.mubr.msk.f32.mxu1 %vm5855_vm1, %v5856_v32 }
0x10ac   :  { %5361 = vmatprep.subr.bf16.mxu1 %v5854_v18 }
0x10ad   :  { %v6226_v25 = vpop.permute.xlu1 %1517 }
0x10ae   :  { %4915 = vmatmul.mubr.msk.f32.vlgmr.msra.gmra.mrb[16].mxu0 %vm82_vm0, %v6226_v25 }
0x10af   :  { %5354 = vmatpush3.bf16.msra.mxu0 %v5964_v19  ;;  %5363 = vmatpush3.bf16.msra.mxu1 %v5999_v33 }
0x10b0   :  { %5355 = vmatprep.subr.bf16.mxu0 %v5854_v18  ;;  %4936 = vmatprep.mubr.msk.f32.mxu0 %vm5855_vm1, %v5856_v32 }
0x10b3   :  { %5357 = vmatpush3.bf16.msra.mxu0 %v5979_v27 }
0x117d   :  { %v1663_v29 = vpop.f32.mrb[24].mxu1 }
0x117e   :  { %v1667_v30 = vadd.f32 %v1663_v29, %v6046_v53  ;;  %v4927_v31 = vpop.f32.mrb[25].mxu1 }
0x1180   :  { %5641 = vtanh.f32 %v1667_v30  ;;  %v4389_v46 = vmul.f32 -1.442695, %v1667_v30 }
0x1181   :  { %v1587_v2 = vpop.f32.mrb[16].mxu0 }
0x1182   :  { %v1591_v34 = vadd.f32 %v1587_v2, %v6039_v48  ;;  %v4916_v35 = vpop.f32.mrb[17].mxu0 }
0x1184   :  { %5643 = vtanh.f32 %v1591_v34  ;;  %v4388_v36 = vmul.f32 -1.442695, %v1591_v34 }
0x1185   :  { %5645 = vpow2.f32 %v4389_v46 }
0x1186   :  { %5647 = vpow2.f32 %v4388_v36 }
0x118a   :  { %v5642_v19 = vpop.eup %5641 }
0x118b   :  { %1695 = vrot.lane.b32.xlu0 %v5642_v19, %s5857_s14 }
0x118e   :  { %v5644_v33 = vpop.eup %5643 }
0x118f   :  { %1684 = vrot.lane.b32.xlu1 %v5644_v33, %s5857_s14  ;;  %v5646_v27 = vpop.eup %5645 }
0x1190   :  { %v1677_v38 = vadd.f32 1.0, %v5646_v27  ;;  %v5648_v53 = vpop.eup %5647  ;;  %v4404_v27 = vld [vmem:[%s6694_s2 + $0x40] sm:$0xff] }
0x1191   :  { %v1671_v40 = vadd.f32 1.0, %v5648_v53  ;;  %v4408_v53 = vld [vmem:[%s6694_s2 + $0x60] sm:$0xff] }
0x1192   :  { %5649 = vrcp.f32 %v1677_v38  ;;  %v4405_v38 = vld [vmem:[%s6694_s2 + $0x48] sm:$0xff] }
0x1193   :  { %5651 = vrcp.f32 %v1671_v40  ;;  %v5364_v40 = vpack.c.bf16 %v4405_v38, %v4404_v27 }
0x1195   :  { %5365 = vmatprep.subr.bf16.mxu0 %v5364_v40 }
0x119c   :  { %v5650_v42 = vpop.eup %5649 }
0x119d   :  { %v5652_v52 = vpop.eup %5651  ;;  %v1693_v56 = vmul.f32 %v5650_v42, %v1503_v14 }
0x119e   :  { %v1682_v58 = vmul.f32 %v5652_v52, %v1492_v16 }
0x11fd   :  { %v1696_v48 = vpop.permute.xlu0 %1695 }
0x11fe   :  { %v1698_v51 = vmul.f32 %v5650_v42, %v1696_v48  ;;  %v4406_v48 = vld [vmem:[%s6694_s2 + $0x50] sm:$0xff] }
0x1200   :  { %1700 = vrot.lane.b32.xlu0 %v1698_v51, %s5857_s14  ;;  %v4407_v51 = vld [vmem:[%s6694_s2 + $0x58] sm:$0xff] }
0x1201   :  { %v1685_v0 = vpop.permute.xlu1 %1684 }
0x1202   :  { %v1687_v54 = vmul.f32 %v5652_v52, %v1685_v0  ;;  %v5368_v0 = vpack.c.bf16 %v4407_v51, %v4406_v48 }
0x1204   :  { %1689 = vrot.lane.b32.xlu1 %v1687_v54, %s5857_s14  ;;  %v4410_v54 = vld [vmem:[%s6694_s2 + $0x70] sm:$0xff] }
0x1272   :  { %v1701_v50 = vpop.permute.xlu0 %1700 }
0x1273   :  { %v1703_v57 = vadd.f32 %v1701_v50, %v1693_v56  ;;  %v4411_v56 = vld [vmem:[%s6694_s2 + $0x78] sm:$0xff] }
0x1274   :  { %v5384_v50 = vpack.c.bf16 %v4411_v56, %v4410_v54 }
0x1275   :  { %5653 = vtanh.f32 %v1703_v57 }
0x1276   :  { %v1690_v59 = vpop.permute.xlu1 %1689 }
0x1277   :  { %v1692_v61 = vadd.f32 %v1690_v59, %v1682_v58  ;;  %v4398_v59 = vld [vmem:[%s6693_s1 + $0x60] sm:$0xff] }
0x1279   :  { %5655 = vtanh.f32 %v1692_v61 }
0x127f   :  { %v5654_v3 = vpop.eup %5653 }
0x1280   :  { %1712 = vrot.lane.b32.xlu0 %v5654_v3, %s5857_s14 }
0x1283   :  { %v5656_v4 = vpop.eup %5655 }
0x1284   :  { %1706 = vrot.lane.b32.xlu1 %v5656_v4, %s5857_s14  ;;  %v4394_v4 = vld [vmem:[%s6693_s1 + $0x40] sm:$0xff] }
0x12f2   :  { %v1713_v62 = vpop.permute.xlu0 %1712 }
0x12f3   :  { %v1715_v5 = vmul.f32 %v5650_v42, %v1713_v62  ;;  %v4409_v42 = vld [vmem:[%s6694_s2 + $0x68] sm:$0xff] }
0x12f4   :  { %v4395_v62 = vld [vmem:[%s6693_s1 + $0x48] sm:$0xff] }
0x12f5   :  { %1793 = vrot.lane.b32.xlu0 %v1715_v5, %s5858_s15  ;;  %v5372_v5 = vpack.c.bf16 %v4395_v62, %v4394_v4 }
0x12f6   :  { %v1707_v6 = vpop.permute.xlu1 %1706 }
0x12f7   :  { %v1709_v37 = vmul.f32 %v5652_v52, %v1707_v6  ;;  %v5380_v52 = vpack.c.bf16 %v4409_v42, %v4408_v53 }
0x12f9   :  { %1717 = vrot.lane.b32.xlu1 %v1709_v37, %s5858_s15  ;;  %5381 = vmatprep.subr.bf16.mxu1 %v5380_v52 }
0x1367   :  { %v6246_v7 = vpop.permute.xlu0 %1793 }
0x1368   :  { %4948 = vmatmul.mubr.msk.f32.vlgmr.msra.gmra.mrb[26].mxu1 %vm82_vm0, %v6246_v7 }
0x1369   :  { %5383 = vmatpush3.bf16.msra.mxu1 %v5380_v52 }
0x136a   :  { %5385 = vmatprep.subr.bf16.mxu1 %v5384_v50 }
0x136b   :  { %v6250_v39 = vpop.permute.xlu1 %1717 }
0x136c   :  { %4937 = vmatmul.mubr.msk.f32.vlgmr.msra.gmra.mrb[18].mxu0 %vm82_vm0, %v6250_v39 }
0x136d   :  { %5367 = vmatpush3.bf16.msra.mxu0 %v5364_v40  ;;  %5387 = vmatpush3.bf16.msra.mxu1 %v5384_v50 }
0x136e   :  { %5369 = vmatprep.subr.bf16.mxu0 %v5368_v0 }
0x1371   :  { %5371 = vmatpush3.bf16.msra.mxu0 %v5368_v0 }
0x1372   :  { %5373 = vmatprep.subr.bf16.mxu0 %v5372_v5 }
0x143b   :  { %v1863_v8 = vpop.f32.mrb[26].mxu1 }
0x143c   :  { %v1867_v9 = vadd.f32 %v1863_v8, %v6048_v55  ;;  %v4949_v10 = vpop.f32.mrb[27].mxu1 }
0x143d   :  { %v4400_v10 = vld [vmem:[%s6693_s1 + $0x70] sm:$0xff] }
0x143e   :  { %5657 = vtanh.f32 %v1867_v9  ;;  %v4393_v17 = vmul.f32 -1.442695, %v1867_v9 }
0x143f   :  { %v1787_v11 = vpop.f32.mrb[18].mxu0 }
0x1440   :  { %v1791_v14 = vadd.f32 %v1787_v11, %v6035_v44  ;;  %v4938_v15 = vpop.f32.mrb[19].mxu0  ;;  %v4401_v11 = vld [vmem:[%s6693_s1 + $0x78] sm:$0xff] }
0x1441   :  { %v4397_v15 = vld [vmem:[%s6693_s1 + $0x58] sm:$0xff] }
0x1442   :  { %5659 = vtanh.f32 %v1791_v14  ;;  %v4392_v41 = vmul.f32 -1.442695, %v1791_v14  ;;  %v4396_v14 = vld [vmem:[%s6693_s1 + $0x50] sm:$0xff] }
0x1443   :  { %5661 = vpow2.f32 %v4393_v17  ;;  %v5376_v17 = vpack.c.bf16 %v4397_v15, %v4396_v14 }
0x1444   :  { %5663 = vpow2.f32 %v4392_v41 }
0x1448   :  { %v5658_v60 = vpop.eup %5657 }
0x1449   :  { %1895 = vrot.lane.b32.xlu0 %v5658_v60, %s5857_s14 }
0x144c   :  { %v5660_v16 = vpop.eup %5659 }
0x144d   :  { %1884 = vrot.lane.b32.xlu1 %v5660_v16, %s5857_s14  ;;  %v5662_v20 = vpop.eup %5661  ;;  %v5392_v16 = vpack.c.bf16 %v4401_v11, %v4400_v10 }
0x144e   :  { %v1877_v21 = vadd.f32 1.0, %v5662_v20  ;;  %v5664_v55 = vpop.eup %5663  ;;  %v1935_v20 = vld [vmem:[#allocation2 + $0x78] sm:$0xff] }
0x144f   :  { %v1871_v22 = vadd.f32 1.0, %v5664_v55  ;;  %v1930_v55 = vld [vmem:[#allocation2 + $0x58] sm:$0xff] }
0x1450   :  { %5665 = vrcp.f32 %v1877_v21  ;;  %v1929_v21 = vld [vmem:[#allocation2 + $0x50] sm:$0xff] }
0x1451   :  { %5667 = vrcp.f32 %v1871_v22 }
0x145a   :  { %v5666_v23 = vpop.eup %5665 }
0x145b   :  { %v5668_v30 = vpop.eup %5667  ;;  %v1893_v34 = vmul.f32 %v5666_v23, %v1703_v57 }
0x145c   :  { %v1882_v33 = vmul.f32 %v5668_v30, %v1692_v61  ;;  %v4399_v61 = vld [vmem:[%s6693_s1 + $0x68] sm:$0xff] }
0x145d   :  { %v5388_v3 = vpack.c.bf16 %v4399_v61, %v4398_v59 }
0x145f   :  { %5389 = vmatprep.subr.bf16.mxu1 %v5388_v3 }
0x14bb   :  { %v1896_v44 = vpop.permute.xlu0 %1895 }
0x14bc   :  { %v1898_v29 = vmul.f32 %v5666_v23, %v1896_v44 }
0x14be   :  { %1900 = vrot.lane.b32.xlu0 %v1898_v29, %s5857_s14 }
0x14bf   :  { %v1885_v31 = vpop.permute.xlu1 %1884 }
0x14c0   :  { %v1887_v2 = vmul.f32 %v5668_v30, %v1885_v31 }
0x14c2   :  { %1889 = vrot.lane.b32.xlu1 %v1887_v2, %s5857_s14 }
0x1530   :  { %v1901_v35 = vpop.permute.xlu0 %1900 }
0x1531   :  { %v1903_v19 = vadd.f32 %v1901_v35, %v1893_v34 }
0x1533   :  { %5669 = vtanh.f32 %v1903_v19 }
0x1534   :  { %v1890_v46 = vpop.permute.xlu1 %1889 }
0x1535   :  { %v1892_v36 = vadd.f32 %v1890_v46, %v1882_v33 }
0x1537   :  { %5671 = vtanh.f32 %v1892_v36 }
0x153d   :  { %v5670_v57 = vpop.eup %5669 }
0x153e   :  { %1912 = vrot.lane.b32.xlu0 %v5670_v57, %s5857_s14 }
0x1541   :  { %v5672_v58 = vpop.eup %5671 }
0x1542   :  { %1906 = vrot.lane.b32.xlu1 %v5672_v58, %s5857_s14 }
0x15b0   :  { %v1913_v6 = vpop.permute.xlu0 %1912 }
0x15b1   :  { %v1915_v37 = vmul.f32 %v5666_v23, %v1913_v6 }
0x15b3   :  { %1951 = vrot.lane.b32.xlu0 %v1915_v37, %s5858_s15 }
0x15b4   :  { %v1907_v8 = vpop.permute.xlu1 %1906 }
0x15b5   :  { %v1909_v9 = vmul.f32 %v5668_v30, %v1907_v8 }
0x15b7   :  { %2061 = vrot.lane.b32.xlu1 %v1909_v9, %s5858_s15 }
0x1625   :  { %v1952_v60 = vpop.permute.xlu0 %1951 }
0x1626   :  { %4958 = vmatprep.mubr.msk.f32.mxu0 %vm82_vm0, %v1952_v60  ;;  %4998 = vmatprep.mubr.msk.f32.mxu1 %vm82_vm0, %v1952_v60 }
0x1627   :  { %4959 = vmatmul.mubr.msk.f32.vlgmr.msra.gmra.mrb[20].mxu0 %vm82_vm0, %v6246_v7  ;;  %4999 = vmatmul.mubr.msk.f32.vlgmr.msra.gmra.mrb[28].mxu1 %vm82_vm0, %v6246_v7  ;;  %v1928_v7 = vld [vmem:[#allocation2 + $0x48] sm:$0xff] }
0x1628   :  { %4961 = vmatprep.mubr.msk.f32.mxu0 %vm82_vm0, %v6218_v24  ;;  %5001 = vmatprep.mubr.msk.f32.mxu1 %vm82_vm0, %v6218_v24  ;;  %v1927_v24 = vld [vmem:[#allocation2 + $0x40] sm:$0xff] }
0x1629   :  { %5391 = vmatpush3.bf16.msra.mxu1 %v5388_v3  ;;  %5375 = vmatpush3.bf16.msra.mxu0 %v5372_v5  ;;  %v6350_v41 = vpack.c.bf16 %v1928_v7, %v1927_v24 }
0x162a   :  { %5393 = vmatprep.subr.bf16.mxu1 %v5392_v16  ;;  %5377 = vmatprep.subr.bf16.mxu0 %v5376_v17 }
0x162b   :  { %4962 = vmatmul.mubr.msk.f32.gmra.mrb[22].mxu0 %vm82_vm0, %v6188_v43  ;;  %5002 = vmatmul.mubr.msk.f32.gmra.mrb[30].mxu1 %vm82_vm0, %v6188_v43  ;;  %v1932_v43 = vld [vmem:[#allocation2 + $0x60] sm:$0xff] }
0x162c   :  { %4964 = vmatprep.mubr.msk.f32.mxu0 %vm82_vm0, %v6158_v63  ;;  %5004 = vmatprep.mubr.msk.f32.mxu1 %vm82_vm0, %v6158_v63  ;;  %v1933_v63 = vld [vmem:[#allocation2 + $0x68] sm:$0xff] }
0x162d   :  { %5395 = vmatpush3.bf16.msra.mxu1 %v5392_v16  ;;  %5379 = vmatpush3.bf16.msra.mxu0 %v5376_v17 }
0x162e   :  { %5402 = vmatprep.subr.bf16.mxu1 %v5854_v18  ;;  %5396 = vmatprep.subr.bf16.mxu0 %v5854_v18 }
0x162f   :  { %4965 = vmatmul.mubr.msk.f32.gmra.mrb[24].mxu0 %vm82_vm0, %v6128_v12  ;;  %5005 = vmatmul.mubr.msk.f32.gmra.mrb[32].mxu1 %vm82_vm0, %v6128_v12  ;;  %v6348_v12 = vpack.c.bf16 %v1933_v63, %v1932_v43 }
0x1630   :  { %4967 = vmatprep.mubr.msk.f32.mxu0 %vm82_vm0, %v6098_v26  ;;  %5007 = vmatprep.mubr.msk.f32.mxu1 %vm82_vm0, %v6098_v26  ;;  %v1934_v26 = vld [vmem:[#allocation2 + $0x70] sm:$0xff] }
0x1633   :  { %4968 = vmatmul.mubr.msk.f32.gmra.mrb[26].mxu0 %vm82_vm0, %v6068_v47  ;;  %5008 = vmatmul.mubr.msk.f32.gmra.mrb[34].mxu1 %vm82_vm0, %v6068_v47  ;;  %v6362_v47 = vpack.c.bf16 %v1935_v20, %v1934_v26 }
0x1634   :  { %4978 = vmatprep.mubr.msk.f32.mxu0 %vm82_vm0, %v6076_v49  ;;  %5018 = vmatprep.mubr.msk.f32.mxu1 %vm82_vm0, %v6076_v49  ;;  %v6364_v49 = vpack.c.bf16 %v1930_v55, %v1929_v21 }
0x1637   :  { %4979 = vmatmul.mubr.msk.f32.vlgmr.msra.gmra.mrb[20].mxu0 %vm82_vm0, %v6106_v28  ;;  %5019 = vmatmul.mubr.msk.f32.vlgmr.msra.gmra.mrb[28].mxu1 %vm82_vm0, %v6106_v28  ;;  %v2062_v28 = vpop.permute.xlu1 %2061 }
0x1638   :  { %4981 = vmatprep.mubr.msk.f32.mxu0 %vm82_vm0, %v6136_v13  ;;  %5021 = vmatprep.mubr.msk.f32.mxu1 %vm82_vm0, %v6136_v13  ;;  %v4428_v13 = vld [vmem:[%s6696_s4 + $0x2] ss:$0 sm:$0xff] }
0x1639   :  { %5404 = vmatpush3.bf16.msra.mxu1 %v6348_v12  ;;  %5398 = vmatpush3.bf16.msra.mxu0 %v6350_v41 }
0x163a   :  { %5405 = vmatprep.subr.bf16.mxu1 %v5854_v18  ;;  %5399 = vmatprep.subr.bf16.mxu0 %v5854_v18 }
0x163b   :  { %4982 = vmatmul.mubr.msk.f32.gmra.mrb[22].mxu0 %vm82_vm0, %v6166_v1  ;;  %5022 = vmatmul.mubr.msk.f32.gmra.mrb[30].mxu1 %vm82_vm0, %v6166_v1  ;;  %v4445_v1 = vld [vmem:[%s6696_s4 + $0x3] ss:$0 sm:$0xff] }
0x163c   :  { %4984 = vmatprep.mubr.msk.f32.mxu0 %vm82_vm0, %v6196_v45  ;;  %5024 = vmatprep.mubr.msk.f32.mxu1 %vm82_vm0, %v6196_v45 }
0x163d   :  { %5407 = vmatpush3.bf16.msra.mxu1 %v6362_v47  ;;  %5401 = vmatpush3.bf16.msra.mxu0 %v6364_v49 }
0x163e   :  { %5408 = vmatprep.subr.bf16.mxu0 %v5854_v18  ;;  %5414 = vmatprep.subr.bf16.mxu1 %v5854_v18 }
0x163f   :  { %4985 = vmatmul.mubr.msk.f32.gmra.mrb[24].mxu0 %vm82_vm0, %v6226_v25  ;;  %5025 = vmatmul.mubr.msk.f32.gmra.mrb[32].mxu1 %vm82_vm0, %v6226_v25 }
0x1640   :  { %4987 = vmatprep.mubr.msk.f32.mxu0 %vm82_vm0, %v6250_v39  ;;  %5027 = vmatprep.mubr.msk.f32.mxu1 %vm82_vm0, %v6250_v39 }
0x1643   :  { %4988 = vmatmul.mubr.msk.f32.gmra.mrb[26].mxu0 %vm82_vm0, %v2062_v28  ;;  %5028 = vmatmul.mubr.msk.f32.gmra.mrb[34].mxu1 %vm82_vm0, %v2062_v28 }
0x1644   :  { %5038 = vmatprep.mubr.msk.f32.mxu0 %vm5855_vm1, %v5856_v32  ;;  %5049 = vmatprep.mubr.msk.f32.mxu1 %vm5855_vm1, %v5856_v32 }
0x1647   :  { %5039 = vmatmul.mubr.f32.vlgmr.msra.gmra.mrb[28].mxu0 %v5856_v32  ;;  %5050 = vmatmul.mubr.f32.vlgmr.msra.gmra.mrb[36].mxu1 %v5856_v32 }
0x1648   :  { %5410 = vmatpush3.bf16.msra.mxu0 %v6350_v41  ;;  %5416 = vmatpush3.bf16.msra.mxu1 %v6348_v12 }
0x1649   :  { %5411 = vmatprep.subr.bf16.mxu0 %v5854_v18  ;;  %5417 = vmatprep.subr.bf16.mxu1 %v5854_v18 }
0x164a   :  { %5071 = vmatprep.mubr.msk.f32.mxu1 %vm5855_vm1, %v5856_v32  ;;  %5060 = vmatprep.mubr.msk.f32.mxu0 %vm5855_vm1, %v5856_v32 }
0x164c   :  { %5413 = vmatpush3.bf16.msra.mxu0 %v6364_v49  ;;  %5419 = vmatpush3.bf16.msra.mxu1 %v6362_v47 }
0x164d   :  { %5420 = vmatprep.subr.bf16.mxu0 %v5854_v18  ;;  %5426 = vmatprep.subr.bf16.mxu1 %v5854_v18 }
0x170a   :  { %v4980_v45 = vpop.f32.mrb[20].mxu0  ;;  %v5020_v25 = vpop.f32.mrb[28].mxu1 }
0x170b   :  { %v6414_v39 = vadd.f32 %v4980_v45, %v4428_v13  ;;  %v6416_v22 = vadd.f32 %v5020_v25, %v4445_v1  ;;  %v2131_v23 = vpop.f32.mrb[21].mxu0  ;;  %v2355_v44 = vpop.f32.mrb[29].mxu1 }
0x170c   :  { %v6418_v29 = vadd.f32 %v4445_v1, %v2355_v44  ;;  %v2176_v59 = vadd.f32 %v4428_v13, %v2131_v23 }
0x170e   :  { %v4983_v30 = vpop.f32.mrb[22].mxu0  ;;  %v5023_v31 = vpop.f32.mrb[30].mxu1 }
0x170f   :  { %v6420_v2 = vadd.f32 %v4983_v30, %v4428_v13  ;;  %v6422_v34 = vadd.f32 %v5023_v31, %v4445_v1  ;;  %v2141_v35 = vpop.f32.mrb[23].mxu0  ;;  %v2365_v19 = vpop.f32.mrb[31].mxu1 }
0x1710   :  { %v6424_v33 = vadd.f32 %v4428_v13, %v2141_v35  ;;  %v6426_v46 = vadd.f32 %v4445_v1, %v2365_v19 }
0x1712   :  { %v4986_v36 = vpop.f32.mrb[24].mxu0  ;;  %v5026_v27 = vpop.f32.mrb[32].mxu1 }
0x1713   :  { %v6428_v38 = vadd.f32 %v4986_v36, %v4428_v13  ;;  %v6430_v53 = vadd.f32 %v5026_v27, %v4445_v1  ;;  %v2151_v40 = vpop.f32.mrb[25].mxu0  ;;  %v2375_v42 = vpop.f32.mrb[33].mxu1 }
0x1714   :  { %v6432_v48 = vadd.f32 %v4428_v13, %v2151_v40  ;;  %v6434_v51 = vadd.f32 %v4445_v1, %v2375_v42 }
0x1716   :  { %v4989_v52 = vpop.f32.mrb[26].mxu0  ;;  %v5029_v0 = vpop.f32.mrb[34].mxu1 }
0x1717   :  { %v6436_v54 = vadd.f32 %v4989_v52, %v4428_v13  ;;  %v2161_v56 = vpop.f32.mrb[27].mxu0  ;;  %v2385_v50 = vpop.f32.mrb[35].mxu1  ;;  %v2407_v61 = vadd.f32 %v5029_v0, %v4445_v1 }
0x1718   :  { %v6438_v57 = vadd.f32 %v4428_v13, %v2161_v56  ;;  %v6440_v58 = vadd.f32 %v4445_v1, %v2385_v50 }
0x171a   :  { %v2474_v3 = vpop.f32.mrb[28].mxu0  ;;  %v2545_v4 = vpop.f32.mrb[36].mxu1 }
0x171b   :  { %v2478_v62 = vadd.f32 %v2474_v3, %v2176_v59  ;;  %v2549_v5 = vadd.f32 %v2545_v4, %v2407_v61  ;;  %v5051_v6 = vpop.f32.mrb[37].mxu1  ;;  %v5040_v37 = vpop.f32.mrb[29].mxu0 }
0x171d   :  { %5673 = vtanh.f32 %v2478_v62  ;;  %v4446_v10 = vmul.f32 -1.442695, %v2478_v62  ;;  %v4447_v11 = vmul.f32 -1.442695, %v2549_v5 }
0x171e   :  { %5675 = vtanh.f32 %v2549_v5 }
0x171f   :  { %5677 = vpow2.f32 %v4446_v10 }
0x1720   :  { %5679 = vpow2.f32 %v4447_v11 }
0x1727   :  { %v5674_v8 = vpop.eup %5673 }
0x1728   :  { %v5676_v9 = vpop.eup %5675  ;;  %2566 = vrot.lane.b32.xlu1 %v5674_v8, %s5857_s14 }
0x1729   :  { %2577 = vrot.lane.b32.xlu0 %v5676_v9, %s5857_s14  ;;  %v5678_v14 = vpop.eup %5677 }
0x172a   :  { %v5680_v15 = vpop.eup %5679  ;;  %v2553_v60 = vadd.f32 1.0, %v5678_v14 }
0x172b   :  { %v2559_v16 = vadd.f32 1.0, %v5680_v15 }
0x172c   :  { %5681 = vrcp.f32 %v2553_v60 }
0x172d   :  { %5683 = vrcp.f32 %v2559_v16 }
0x1736   :  { %v5682_v17 = vpop.eup %5681 }
0x1737   :  { %v5684_v63 = vpop.eup %5683  ;;  %v2564_v20 = vmul.f32 0.0, %v5682_v17 }
0x1738   :  { %v2575_v21 = vmul.f32 0.0, %v5684_v63 }
0x179a   :  { %v2567_v43 = vpop.permute.xlu1 %2566 }
0x179b   :  { %v2578_v24 = vpop.permute.xlu0 %2577  ;;  %v2569_v7 = vmul.f32 %v5682_v17, %v2567_v43 }
0x179c   :  { %v2580_v26 = vmul.f32 %v5684_v63, %v2578_v24 }
0x179d   :  { %2571 = vrot.lane.b32.xlu1 %v2569_v7, %s5857_s14 }
0x179e   :  { %2582 = vrot.lane.b32.xlu0 %v2580_v26, %s5857_s14 }
0x180f   :  { %v2572_v55 = vpop.permute.xlu1 %2571 }
0x1810   :  { %v2583_v28 = vpop.permute.xlu0 %2582  ;;  %v2574_v13 = vadd.f32 %v2572_v55, %v2564_v20 }
0x1811   :  { %v2585_v1 = vadd.f32 %v2583_v28, %v2575_v21 }
0x1812   :  { %5685 = vtanh.f32 %v2574_v13 }
0x1813   :  { %5687 = vtanh.f32 %v2585_v1 }
0x181c   :  { %v5686_v45 = vpop.eup %5685 }
0x181d   :  { %v5688_v25 = vpop.eup %5687  ;;  %2588 = vrot.lane.b32.xlu1 %v5686_v45, %s5857_s14 }
0x181e   :  { %2594 = vrot.lane.b32.xlu0 %v5688_v25, %s5857_s14 }
0x188f   :  { %v2589_v23 = vpop.permute.xlu1 %2588 }
0x1890   :  { %v2595_v44 = vpop.permute.xlu0 %2594  ;;  %v2591_v30 = vmul.f32 %v5682_v17, %v2589_v23 }
0x1891   :  { %v2597_v31 = vmul.f32 %v5684_v63, %v2595_v44 }
0x1892   :  { %2599 = vrot.lane.b32.xlu1 %v2591_v30, %s5858_s15 }
0x1893   :  { %2675 = vrot.lane.b32.xlu0 %v2597_v31, %s5858_s15 }
0x1904   :  { %v2600_v35 = vpop.permute.xlu1 %2599 }
0x1905   :  { %v2676_v19 = vpop.permute.xlu0 %2675  ;;  %5061 = vmatmul.mubr.msk.f32.vlgmr.msra.gmra.mrb[30].mxu0 %vm82_vm0, %v2600_v35 }
0x1906   :  { %5072 = vmatmul.mubr.msk.f32.vlgmr.msra.gmra.mrb[38].mxu1 %vm82_vm0, %v2676_v19  ;;  %5422 = vmatpush3.bf16.msra.mxu0 %v6350_v41 }
0x1907   :  { %5428 = vmatpush3.bf16.msra.mxu1 %v6348_v12  ;;  %5423 = vmatprep.subr.bf16.mxu0 %v5854_v18 }
0x1908   :  { %5429 = vmatprep.subr.bf16.mxu1 %v5854_v18  ;;  %5093 = vmatprep.mubr.msk.f32.mxu1 %vm5855_vm1, %v5856_v32 }
0x1909   :  { %5082 = vmatprep.mubr.msk.f32.mxu0 %vm5855_vm1, %v5856_v32 }
0x190a   :  { %5425 = vmatpush3.bf16.msra.mxu0 %v6364_v49 }
0x190b   :  { %5431 = vmatpush3.bf16.msra.mxu1 %v6362_v47  ;;  %5432 = vmatprep.subr.bf16.mxu0 %v5854_v18 }
0x190c   :  { %5438 = vmatprep.subr.bf16.mxu1 %v5854_v18 }
0x19d8   :  { %v2669_v36 = vpop.f32.mrb[30].mxu0 }
0x19d9   :  { %v2673_v27 = vadd.f32 %v2669_v36, %v6414_v39  ;;  %v2745_v40 = vpop.f32.mrb[38].mxu1  ;;  %v5062_v42 = vpop.f32.mrb[31].mxu0 }
0x19da   :  { %v2749_v52 = vadd.f32 %v2745_v40, %v6440_v58  ;;  %v5073_v0 = vpop.f32.mrb[39].mxu1 }
0x19db   :  { %5689 = vtanh.f32 %v2673_v27  ;;  %v4450_v59 = vmul.f32 -1.442695, %v2673_v27 }
0x19dc   :  { %5691 = vtanh.f32 %v2749_v52  ;;  %v4451_v61 = vmul.f32 -1.442695, %v2749_v52 }
0x19dd   :  { %5693 = vpow2.f32 %v4450_v59 }
0x19de   :  { %5695 = vpow2.f32 %v4451_v61 }
0x19e5   :  { %v5690_v56 = vpop.eup %5689 }
0x19e6   :  { %v5692_v50 = vpop.eup %5691  ;;  %2766 = vrot.lane.b32.xlu1 %v5690_v56, %s5857_s14 }
0x19e7   :  { %2777 = vrot.lane.b32.xlu0 %v5692_v50, %s5857_s14  ;;  %v5694_v3 = vpop.eup %5693 }
0x19e8   :  { %v5696_v4 = vpop.eup %5695  ;;  %v2753_v39 = vadd.f32 1.0, %v5694_v3 }
0x19e9   :  { %v2759_v62 = vadd.f32 1.0, %v5696_v4 }
0x19ea   :  { %5697 = vrcp.f32 %v2753_v39 }
0x19eb   :  { %5699 = vrcp.f32 %v2759_v62 }
0x19f4   :  { %v5698_v58 = vpop.eup %5697 }
0x19f5   :  { %v5700_v6 = vpop.eup %5699  ;;  %v2764_v10 = vmul.f32 %v5698_v58, %v2574_v13 }
0x19f6   :  { %v2775_v11 = vmul.f32 %v5700_v6, %v2585_v1 }
0x1a58   :  { %v2767_v5 = vpop.permute.xlu1 %2766 }
0x1a59   :  { %v2778_v37 = vpop.permute.xlu0 %2777  ;;  %v2769_v8 = vmul.f32 %v5698_v58, %v2767_v5 }
0x1a5a   :  { %v2780_v9 = vmul.f32 %v5700_v6, %v2778_v37 }
0x1a5b   :  { %2771 = vrot.lane.b32.xlu1 %v2769_v8, %s5857_s14 }
0x1a5c   :  { %2782 = vrot.lane.b32.xlu0 %v2780_v9, %s5857_s14 }
0x1acd   :  { %v2772_v14 = vpop.permute.xlu1 %2771 }
0x1ace   :  { %v2783_v15 = vpop.permute.xlu0 %2782  ;;  %v2774_v60 = vadd.f32 %v2772_v14, %v2764_v10 }
0x1acf   :  { %v2785_v16 = vadd.f32 %v2783_v15, %v2775_v11 }
0x1ad0   :  { %5701 = vtanh.f32 %v2774_v60 }
0x1ad1   :  { %5703 = vtanh.f32 %v2785_v16 }
0x1ada   :  { %v5702_v17 = vpop.eup %5701 }
0x1adb   :  { %v5704_v43 = vpop.eup %5703  ;;  %2788 = vrot.lane.b32.xlu1 %v5702_v17, %s5857_s14 }
0x1adc   :  { %2794 = vrot.lane.b32.xlu0 %v5704_v43, %s5857_s14 }
0x1b4d   :  { %v2789_v63 = vpop.permute.xlu1 %2788 }
0x1b4e   :  { %v2795_v24 = vpop.permute.xlu0 %2794  ;;  %v2791_v7 = vmul.f32 %v5698_v58, %v2789_v63 }
0x1b4f   :  { %v2797_v26 = vmul.f32 %v5700_v6, %v2795_v24 }
0x1b50   :  { %2799 = vrot.lane.b32.xlu1 %v2791_v7, %s5858_s15 }
0x1b51   :  { %2875 = vrot.lane.b32.xlu0 %v2797_v26, %s5858_s15 }
0x1bc2   :  { %v2800_v20 = vpop.permute.xlu1 %2799 }
0x1bc3   :  { %v2876_v21 = vpop.permute.xlu0 %2875  ;;  %5083 = vmatmul.mubr.msk.f32.vlgmr.msra.gmra.mrb[32].mxu0 %vm82_vm0, %v2800_v20 }
0x1bc4   :  { %5094 = vmatmul.mubr.msk.f32.vlgmr.msra.gmra.mrb[40].mxu1 %vm82_vm0, %v2876_v21  ;;  %5434 = vmatpush3.bf16.msra.mxu0 %v6350_v41 }
0x1bc5   :  { %5440 = vmatpush3.bf16.msra.mxu1 %v6348_v12  ;;  %5435 = vmatprep.subr.bf16.mxu0 %v5854_v18 }
0x1bc6   :  { %5441 = vmatprep.subr.bf16.mxu1 %v5854_v18  ;;  %5115 = vmatprep.mubr.msk.f32.mxu1 %vm5855_vm1, %v5856_v32 }
0x1bc7   :  { %5104 = vmatprep.mubr.msk.f32.mxu0 %vm5855_vm1, %v5856_v32 }
0x1bc8   :  { %5437 = vmatpush3.bf16.msra.mxu0 %v6364_v49 }
0x1bc9   :  { %5443 = vmatpush3.bf16.msra.mxu1 %v6362_v47  ;;  %5444 = vmatprep.subr.bf16.mxu0 %v5854_v18 }
0x1bca   :  { %5450 = vmatprep.subr.bf16.mxu1 %v5854_v18 }
0x1c96   :  { %v2869_v55 = vpop.f32.mrb[32].mxu0 }
0x1c97   :  { %v2873_v28 = vadd.f32 %v2869_v55, %v6424_v33  ;;  %v2945_v13 = vpop.f32.mrb[40].mxu1  ;;  %v5084_v1 = vpop.f32.mrb[33].mxu0 }
0x1c98   :  { %v2949_v45 = vadd.f32 %v2945_v13, %v6430_v53  ;;  %v5095_v25 = vpop.f32.mrb[41].mxu1 }
0x1c99   :  { %5705 = vtanh.f32 %v2873_v28  ;;  %v4454_v30 = vmul.f32 -1.442695, %v2873_v28 }
0x1c9a   :  { %5707 = vtanh.f32 %v2949_v45  ;;  %v4455_v31 = vmul.f32 -1.442695, %v2949_v45 }
0x1c9b   :  { %5709 = vpow2.f32 %v4454_v30 }
0x1c9c   :  { %5711 = vpow2.f32 %v4455_v31 }
0x1ca3   :  { %v5706_v23 = vpop.eup %5705 }
0x1ca4   :  { %v5708_v44 = vpop.eup %5707  ;;  %2966 = vrot.lane.b32.xlu1 %v5706_v23, %s5857_s14 }
0x1ca5   :  { %2977 = vrot.lane.b32.xlu0 %v5708_v44, %s5857_s14  ;;  %v5710_v35 = vpop.eup %5709 }
0x1ca6   :  { %v5712_v19 = vpop.eup %5711  ;;  %v2953_v33 = vadd.f32 1.0, %v5710_v35 }
0x1ca7   :  { %v2959_v36 = vadd.f32 1.0, %v5712_v19 }
0x1ca8   :  { %5713 = vrcp.f32 %v2953_v33 }
0x1ca9   :  { %5715 = vrcp.f32 %v2959_v36 }
0x1cb2   :  { %v5714_v53 = vpop.eup %5713 }
0x1cb3   :  { %v5716_v40 = vpop.eup %5715  ;;  %v2964_v56 = vmul.f32 %v5714_v53, %v2774_v60 }
0x1cb4   :  { %v2975_v50 = vmul.f32 %v5716_v40, %v2785_v16 }
0x1d16   :  { %v2967_v27 = vpop.permute.xlu1 %2966 }
0x1d17   :  { %v2978_v42 = vpop.permute.xlu0 %2977  ;;  %v2969_v52 = vmul.f32 %v5714_v53, %v2967_v27 }
0x1d18   :  { %v2980_v0 = vmul.f32 %v5716_v40, %v2978_v42 }
0x1d19   :  { %2971 = vrot.lane.b32.xlu1 %v2969_v52, %s5857_s14 }
0x1d1a   :  { %2982 = vrot.lane.b32.xlu0 %v2980_v0, %s5857_s14 }
0x1d8b   :  { %v2972_v59 = vpop.permute.xlu1 %2971 }
0x1d8c   :  { %v2983_v61 = vpop.permute.xlu0 %2982  ;;  %v2974_v3 = vadd.f32 %v2972_v59, %v2964_v56 }
0x1d8d   :  { %v2985_v4 = vadd.f32 %v2983_v61, %v2975_v50 }
0x1d8e   :  { %5717 = vtanh.f32 %v2974_v3 }
0x1d8f   :  { %5719 = vtanh.f32 %v2985_v4 }
0x1d98   :  { %v5718_v39 = vpop.eup %5717 }
0x1d99   :  { %v5720_v62 = vpop.eup %5719  ;;  %2988 = vrot.lane.b32.xlu1 %v5718_v39, %s5857_s14 }
0x1d9a   :  { %2994 = vrot.lane.b32.xlu0 %v5720_v62, %s5857_s14 }
0x1e0b   :  { %v2989_v58 = vpop.permute.xlu1 %2988 }
0x1e0c   :  { %v2995_v5 = vpop.permute.xlu0 %2994  ;;  %v2991_v6 = vmul.f32 %v5714_v53, %v2989_v58 }
0x1e0d   :  { %v2997_v37 = vmul.f32 %v5716_v40, %v2995_v5 }
0x1e0e   :  { %2999 = vrot.lane.b32.xlu1 %v2991_v6, %s5858_s15 }
0x1e0f   :  { %3075 = vrot.lane.b32.xlu0 %v2997_v37, %s5858_s15 }
0x1e80   :  { %v3000_v8 = vpop.permute.xlu1 %2999 }
0x1e81   :  { %v3076_v9 = vpop.permute.xlu0 %3075  ;;  %5105 = vmatmul.mubr.msk.f32.vlgmr.msra.gmra.mrb[34].mxu0 %vm82_vm0, %v3000_v8 }
0x1e82   :  { %5116 = vmatmul.mubr.msk.f32.vlgmr.msra.gmra.mrb[42].mxu1 %vm82_vm0, %v3076_v9  ;;  %5446 = vmatpush3.bf16.msra.mxu0 %v6350_v41 }
0x1e83   :  { %5452 = vmatpush3.bf16.msra.mxu1 %v6348_v12  ;;  %5447 = vmatprep.subr.bf16.mxu0 %v5854_v18 }
0x1e84   :  { %5453 = vmatprep.subr.bf16.mxu1 %v5854_v18  ;;  %5137 = vmatprep.mubr.msk.f32.mxu1 %vm5855_vm1, %v5856_v32 }
0x1e85   :  { %5126 = vmatprep.mubr.msk.f32.mxu0 %vm5855_vm1, %v5856_v32 }
0x1e86   :  { %5449 = vmatpush3.bf16.msra.mxu0 %v6364_v49 }
0x1e87   :  { %5455 = vmatpush3.bf16.msra.mxu1 %v6362_v47  ;;  %5456 = vmatprep.subr.bf16.mxu0 %v5854_v18 }
0x1e88   :  { %5462 = vmatprep.subr.bf16.mxu1 %v5854_v18 }
0x1f54   :  { %v3069_v10 = vpop.f32.mrb[34].mxu0 }
0x1f55   :  { %v3073_v11 = vadd.f32 %v3069_v10, %v6420_v2  ;;  %v3145_v14 = vpop.f32.mrb[42].mxu1  ;;  %v5106_v15 = vpop.f32.mrb[35].mxu0 }
0x1f56   :  { %v3149_v60 = vadd.f32 %v3145_v14, %v6434_v51  ;;  %v5117_v16 = vpop.f32.mrb[43].mxu1 }
0x1f57   :  { %5721 = vtanh.f32 %v3073_v11  ;;  %v4458_v63 = vmul.f32 -1.442695, %v3073_v11 }
0x1f58   :  { %5723 = vtanh.f32 %v3149_v60  ;;  %v4459_v24 = vmul.f32 -1.442695, %v3149_v60 }
0x1f59   :  { %5725 = vpow2.f32 %v4458_v63 }
0x1f5a   :  { %5727 = vpow2.f32 %v4459_v24 }
0x1f61   :  { %v5722_v17 = vpop.eup %5721 }
0x1f62   :  { %v5724_v43 = vpop.eup %5723  ;;  %3166 = vrot.lane.b32.xlu1 %v5722_v17, %s5857_s14 }
0x1f63   :  { %3177 = vrot.lane.b32.xlu0 %v5724_v43, %s5857_s14  ;;  %v5726_v7 = vpop.eup %5725 }
0x1f64   :  { %v5728_v26 = vpop.eup %5727  ;;  %v3153_v2 = vadd.f32 1.0, %v5726_v7 }
0x1f65   :  { %v3159_v20 = vadd.f32 1.0, %v5728_v26 }
0x1f66   :  { %5729 = vrcp.f32 %v3153_v2 }
0x1f67   :  { %5731 = vrcp.f32 %v3159_v20 }
0x1f70   :  { %v5730_v51 = vpop.eup %5729 }
0x1f71   :  { %v5732_v55 = vpop.eup %5731  ;;  %v3164_v45 = vmul.f32 %v5730_v51, %v2974_v3 }
0x1f72   :  { %v3175_v25 = vmul.f32 %v5732_v55, %v2985_v4 }
0x1fd4   :  { %v3167_v21 = vpop.permute.xlu1 %3166 }
0x1fd5   :  { %v3178_v28 = vpop.permute.xlu0 %3177  ;;  %v3169_v13 = vmul.f32 %v5730_v51, %v3167_v21 }
0x1fd6   :  { %v3180_v1 = vmul.f32 %v5732_v55, %v3178_v28 }
0x1fd7   :  { %3171 = vrot.lane.b32.xlu1 %v3169_v13, %s5857_s14 }
0x1fd8   :  { %3182 = vrot.lane.b32.xlu0 %v3180_v1, %s5857_s14 }
0x2049   :  { %v3172_v23 = vpop.permute.xlu1 %3171 }
0x204a   :  { %v3183_v44 = vpop.permute.xlu0 %3182  ;;  %v3174_v30 = vadd.f32 %v3172_v23, %v3164_v45 }
0x204b   :  { %v3185_v31 = vadd.f32 %v3183_v44, %v3175_v25 }
0x204c   :  { %5733 = vtanh.f32 %v3174_v30 }
0x204d   :  { %5735 = vtanh.f32 %v3185_v31 }
0x2056   :  { %v5734_v35 = vpop.eup %5733 }
0x2057   :  { %v5736_v19 = vpop.eup %5735  ;;  %3188 = vrot.lane.b32.xlu1 %v5734_v35, %s5857_s14 }
0x2058   :  { %3194 = vrot.lane.b32.xlu0 %v5736_v19, %s5857_s14 }
0x20c9   :  { %v3189_v33 = vpop.permute.xlu1 %3188 }
0x20ca   :  { %v3195_v36 = vpop.permute.xlu0 %3194  ;;  %v3191_v53 = vmul.f32 %v5730_v51, %v3189_v33 }
0x20cb   :  { %v3197_v27 = vmul.f32 %v5732_v55, %v3195_v36 }
0x20cc   :  { %3199 = vrot.lane.b32.xlu1 %v3191_v53, %s5858_s15 }
0x20cd   :  { %3275 = vrot.lane.b32.xlu0 %v3197_v27, %s5858_s15 }
0x213e   :  { %v3200_v40 = vpop.permute.xlu1 %3199 }
0x213f   :  { %v3276_v42 = vpop.permute.xlu0 %3275  ;;  %5127 = vmatmul.mubr.msk.f32.vlgmr.msra.gmra.mrb[36].mxu0 %vm82_vm0, %v3200_v40 }
0x2140   :  { %5138 = vmatmul.mubr.msk.f32.vlgmr.msra.gmra.mrb[44].mxu1 %vm82_vm0, %v3276_v42  ;;  %5458 = vmatpush3.bf16.msra.mxu0 %v6350_v41 }
0x2141   :  { %5464 = vmatpush3.bf16.msra.mxu1 %v6348_v12  ;;  %5459 = vmatprep.subr.bf16.mxu0 %v5854_v18 }
0x2142   :  { %5465 = vmatprep.subr.bf16.mxu1 %v5854_v18  ;;  %5159 = vmatprep.mubr.msk.f32.mxu1 %vm5855_vm1, %v5856_v32 }
0x2143   :  { %5148 = vmatprep.mubr.msk.f32.mxu0 %vm5855_vm1, %v5856_v32 }
0x2144   :  { %5461 = vmatpush3.bf16.msra.mxu0 %v6364_v49 }
0x2145   :  { %5467 = vmatpush3.bf16.msra.mxu1 %v6362_v47  ;;  %5468 = vmatprep.subr.bf16.mxu0 %v5854_v18 }
0x2146   :  { %5474 = vmatprep.subr.bf16.mxu1 %v5854_v18 }
0x2212   :  { %v3269_v52 = vpop.f32.mrb[36].mxu0 }
0x2213   :  { %v3273_v0 = vadd.f32 %v3269_v52, %v6432_v48  ;;  %v3345_v56 = vpop.f32.mrb[44].mxu1  ;;  %v5128_v50 = vpop.f32.mrb[37].mxu0 }
0x2214   :  { %v3349_v59 = vadd.f32 %v3345_v56, %v6422_v34  ;;  %v5139_v61 = vpop.f32.mrb[45].mxu1 }
0x2215   :  { %5737 = vtanh.f32 %v3273_v0  ;;  %v4462_v39 = vmul.f32 -1.442695, %v3273_v0 }
0x2216   :  { %5739 = vtanh.f32 %v3349_v59  ;;  %v4463_v62 = vmul.f32 -1.442695, %v3349_v59 }
0x2217   :  { %5741 = vpow2.f32 %v4462_v39 }
0x2218   :  { %5743 = vpow2.f32 %v4463_v62 }
0x221f   :  { %v5738_v3 = vpop.eup %5737 }
0x2220   :  { %v5740_v4 = vpop.eup %5739  ;;  %3366 = vrot.lane.b32.xlu1 %v5738_v3, %s5857_s14 }
0x2221   :  { %3377 = vrot.lane.b32.xlu0 %v5740_v4, %s5857_s14  ;;  %v5742_v58 = vpop.eup %5741 }
0x2222   :  { %v5744_v5 = vpop.eup %5743  ;;  %v3353_v48 = vadd.f32 1.0, %v5742_v58 }
0x2223   :  { %v3359_v6 = vadd.f32 1.0, %v5744_v5 }
0x2224   :  { %5745 = vrcp.f32 %v3353_v48 }
0x2225   :  { %5747 = vrcp.f32 %v3359_v6 }
0x222e   :  { %v5746_v34 = vpop.eup %5745 }
0x222f   :  { %v5748_v8 = vpop.eup %5747  ;;  %v3364_v14 = vmul.f32 %v5746_v34, %v3174_v30 }
0x2230   :  { %v3375_v15 = vmul.f32 %v5748_v8, %v3185_v31 }
0x2292   :  { %v3367_v37 = vpop.permute.xlu1 %3366 }
0x2293   :  { %v3378_v9 = vpop.permute.xlu0 %3377  ;;  %v3369_v10 = vmul.f32 %v5746_v34, %v3367_v37 }
0x2294   :  { %v3380_v11 = vmul.f32 %v5748_v8, %v3378_v9 }
0x2295   :  { %3371 = vrot.lane.b32.xlu1 %v3369_v10, %s5857_s14 }
0x2296   :  { %3382 = vrot.lane.b32.xlu0 %v3380_v11, %s5857_s14 }
0x2307   :  { %v3372_v60 = vpop.permute.xlu1 %3371 }
0x2308   :  { %v3383_v16 = vpop.permute.xlu0 %3382  ;;  %v3374_v17 = vadd.f32 %v3372_v60, %v3364_v14 }
0x2309   :  { %v3385_v43 = vadd.f32 %v3383_v16, %v3375_v15 }
0x230a   :  { %5749 = vtanh.f32 %v3374_v17 }
0x230b   :  { %5751 = vtanh.f32 %v3385_v43 }
0x2314   :  { %v5750_v63 = vpop.eup %5749 }
0x2315   :  { %v5752_v24 = vpop.eup %5751  ;;  %3388 = vrot.lane.b32.xlu1 %v5750_v63, %s5857_s14 }
0x2316   :  { %3394 = vrot.lane.b32.xlu0 %v5752_v24, %s5857_s14 }
0x2387   :  { %v3389_v7 = vpop.permute.xlu1 %3388 }
0x2388   :  { %v3395_v26 = vpop.permute.xlu0 %3394  ;;  %v3391_v2 = vmul.f32 %v5746_v34, %v3389_v7 }
0x2389   :  { %v3397_v20 = vmul.f32 %v5748_v8, %v3395_v26 }
0x238a   :  { %3399 = vrot.lane.b32.xlu1 %v3391_v2, %s5858_s15 }
0x238b   :  { %3475 = vrot.lane.b32.xlu0 %v3397_v20, %s5858_s15 }
0x23fc   :  { %v3400_v51 = vpop.permute.xlu1 %3399 }
0x23fd   :  { %v3476_v21 = vpop.permute.xlu0 %3475  ;;  %5149 = vmatmul.mubr.msk.f32.vlgmr.msra.gmra.mrb[38].mxu0 %vm82_vm0, %v3400_v51 }
0x23fe   :  { %5160 = vmatmul.mubr.msk.f32.vlgmr.msra.gmra.mrb[46].mxu1 %vm82_vm0, %v3476_v21  ;;  %5470 = vmatpush3.bf16.msra.mxu0 %v6350_v41 }
0x23ff   :  { %5476 = vmatpush3.bf16.msra.mxu1 %v6348_v12  ;;  %5471 = vmatprep.subr.bf16.mxu0 %v5854_v18 }
0x2400   :  { %5477 = vmatprep.subr.bf16.mxu1 %v5854_v18  ;;  %5181 = vmatprep.mubr.msk.f32.mxu1 %vm5855_vm1, %v5856_v32 }
0x2401   :  { %5170 = vmatprep.mubr.msk.f32.mxu0 %vm5855_vm1, %v5856_v32 }
0x2402   :  { %5473 = vmatpush3.bf16.msra.mxu0 %v6364_v49 }
0x2403   :  { %5479 = vmatpush3.bf16.msra.mxu1 %v6362_v47  ;;  %5480 = vmatprep.subr.bf16.mxu0 %v5854_v18 }
0x2404   :  { %5486 = vmatprep.subr.bf16.mxu1 %v5854_v18 }
0x24d0   :  { %v3469_v55 = vpop.f32.mrb[38].mxu0 }
0x24d1   :  { %v3473_v28 = vadd.f32 %v3469_v55, %v6428_v38  ;;  %v3545_v13 = vpop.f32.mrb[46].mxu1  ;;  %v5150_v1 = vpop.f32.mrb[39].mxu0 }
0x24d2   :  { %v3549_v45 = vadd.f32 %v3545_v13, %v6426_v46  ;;  %v5161_v25 = vpop.f32.mrb[47].mxu1 }
0x24d3   :  { %5753 = vtanh.f32 %v3473_v28  ;;  %v4466_v30 = vmul.f32 -1.442695, %v3473_v28 }
0x24d4   :  { %5755 = vtanh.f32 %v3549_v45  ;;  %v4467_v31 = vmul.f32 -1.442695, %v3549_v45 }
0x24d5   :  { %5757 = vpow2.f32 %v4466_v30 }
0x24d6   :  { %5759 = vpow2.f32 %v4467_v31 }
0x24dd   :  { %v5754_v23 = vpop.eup %5753 }
0x24de   :  { %v5756_v44 = vpop.eup %5755  ;;  %3566 = vrot.lane.b32.xlu1 %v5754_v23, %s5857_s14 }
0x24df   :  { %3577 = vrot.lane.b32.xlu0 %v5756_v44, %s5857_s14  ;;  %v5758_v35 = vpop.eup %5757 }
0x24e0   :  { %v5760_v19 = vpop.eup %5759  ;;  %v3553_v38 = vadd.f32 1.0, %v5758_v35 }
0x24e1   :  { %v3559_v33 = vadd.f32 1.0, %v5760_v19 }
0x24e2   :  { %5761 = vrcp.f32 %v3553_v38 }
0x24e3   :  { %5763 = vrcp.f32 %v3559_v33 }
0x24ec   :  { %v5762_v46 = vpop.eup %5761 }
0x24ed   :  { %v5764_v53 = vpop.eup %5763  ;;  %v3564_v52 = vmul.f32 %v5762_v46, %v3374_v17 }
0x24ee   :  { %v3575_v0 = vmul.f32 %v5764_v53, %v3385_v43 }
0x2550   :  { %v3567_v36 = vpop.permute.xlu1 %3566 }
0x2551   :  { %v3578_v27 = vpop.permute.xlu0 %3577  ;;  %v3569_v40 = vmul.f32 %v5762_v46, %v3567_v36 }
0x2552   :  { %v3580_v42 = vmul.f32 %v5764_v53, %v3578_v27 }
0x2553   :  { %3571 = vrot.lane.b32.xlu1 %v3569_v40, %s5857_s14 }
0x2554   :  { %3582 = vrot.lane.b32.xlu0 %v3580_v42, %s5857_s14 }
0x25c5   :  { %v3572_v56 = vpop.permute.xlu1 %3571 }
0x25c6   :  { %v3583_v50 = vpop.permute.xlu0 %3582  ;;  %v3574_v59 = vadd.f32 %v3572_v56, %v3564_v52 }
0x25c7   :  { %v3585_v61 = vadd.f32 %v3583_v50, %v3575_v0 }
0x25c8   :  { %5765 = vtanh.f32 %v3574_v59 }
0x25c9   :  { %5767 = vtanh.f32 %v3585_v61 }
0x25d2   :  { %v5766_v3 = vpop.eup %5765 }
0x25d3   :  { %v5768_v4 = vpop.eup %5767  ;;  %3588 = vrot.lane.b32.xlu1 %v5766_v3, %s5857_s14 }
0x25d4   :  { %3594 = vrot.lane.b32.xlu0 %v5768_v4, %s5857_s14 }
0x2645   :  { %v3589_v39 = vpop.permute.xlu1 %3588 }
0x2646   :  { %v3595_v62 = vpop.permute.xlu0 %3594  ;;  %v3591_v58 = vmul.f32 %v5762_v46, %v3589_v39 }
0x2647   :  { %v3597_v5 = vmul.f32 %v5764_v53, %v3595_v62 }
0x2648   :  { %3599 = vrot.lane.b32.xlu1 %v3591_v58, %s5858_s15 }
0x2649   :  { %3675 = vrot.lane.b32.xlu0 %v3597_v5, %s5858_s15 }
0x26ba   :  { %v3600_v48 = vpop.permute.xlu1 %3599 }
0x26bb   :  { %v3676_v6 = vpop.permute.xlu0 %3675  ;;  %5171 = vmatmul.mubr.msk.f32.vlgmr.msra.gmra.mrb[40].mxu0 %vm82_vm0, %v3600_v48  ;;  %v4002_v48 = vld [vmem:[%s6698_s6 + $0x20] sm:$0xff] }
0x26bc   :  { %5182 = vmatmul.mubr.msk.f32.vlgmr.msra.gmra.mrb[48].mxu1 %vm82_vm0, %v3676_v6  ;;  %5482 = vmatpush3.bf16.msra.mxu0 %v6350_v41  ;;  %v4003_v6 = vld [vmem:[%s6698_s6 + $0x28] sm:$0xff] }
0x26bd   :  { %5488 = vmatpush3.bf16.msra.mxu1 %v6348_v12  ;;  %5483 = vmatprep.subr.bf16.mxu0 %v5854_v18 }
0x26be   :  { %5489 = vmatprep.subr.bf16.mxu1 %v5854_v18  ;;  %5203 = vmatprep.mubr.msk.f32.mxu1 %vm5855_vm1, %v5856_v32 }
0x26bf   :  { %5192 = vmatprep.mubr.msk.f32.mxu0 %vm5855_vm1, %v5856_v32 }
0x26c0   :  { %5485 = vmatpush3.bf16.msra.mxu0 %v6364_v49 }
0x26c1   :  { %5491 = vmatpush3.bf16.msra.mxu1 %v6362_v47  ;;  %5492 = vmatprep.subr.bf16.mxu0 %v5854_v18 }
0x26c2   :  { %5498 = vmatprep.subr.bf16.mxu1 %v5854_v18 }
0x278e   :  { %v3669_v41 = vpop.f32.mrb[40].mxu0 }
0x278f   :  { %v3673_v12 = vadd.f32 %v3669_v41, %v6438_v57  ;;  %v3745_v34 = vpop.f32.mrb[48].mxu1  ;;  %v5172_v37 = vpop.f32.mrb[41].mxu0  ;;  %v3998_v41 = vld [vmem:[%s6698_s6] sm:$0xff] }
0x2790   :  { %v3749_v8 = vadd.f32 %v3745_v34, %v6416_v22  ;;  %v5183_v9 = vpop.f32.mrb[49].mxu1  ;;  %v3999_v34 = vld [vmem:[%s6698_s6 + $0x8] sm:$0xff]  ;;  %v4004_v37 = vld [vmem:[%s6698_s6 + $0x30] sm:$0xff] }
0x2791   :  { %5769 = vtanh.f32 %v3673_v12  ;;  %v4470_v47 = vmul.f32 -1.442695, %v3673_v12  ;;  %v5493_v12 = vpack.c.bf16 %v4003_v6, %v4002_v48  ;;  %v5499_v9 = vpack.c.bf16 %v3999_v34, %v3998_v41 }
0x2792   :  { %5771 = vtanh.f32 %v3749_v8  ;;  %v4471_v49 = vmul.f32 -1.442695, %v3749_v8  ;;  %v4005_v8 = vld [vmem:[%s6698_s6 + $0x38] sm:$0xff] }
0x2793   :  { %5773 = vpow2.f32 %v4470_v47  ;;  %v5496_v47 = vpack.c.bf16 %v4005_v8, %v4004_v37 }
0x2794   :  { %5775 = vpow2.f32 %v4471_v49 }
0x279b   :  { %v5770_v10 = vpop.eup %5769 }
0x279c   :  { %v5772_v11 = vpop.eup %5771  ;;  %3766 = vrot.lane.b32.xlu1 %v5770_v10, %s5857_s14  ;;  %v4000_v10 = vld [vmem:[%s6698_s6 + $0x10] sm:$0xff] }
0x279d   :  { %3777 = vrot.lane.b32.xlu0 %v5772_v11, %s5857_s14  ;;  %v5774_v14 = vpop.eup %5773  ;;  %v4001_v11 = vld [vmem:[%s6698_s6 + $0x18] sm:$0xff] }
0x279e   :  { %v5776_v15 = vpop.eup %5775  ;;  %v3753_v57 = vadd.f32 1.0, %v5774_v14  ;;  %v5502_v49 = vpack.c.bf16 %v4001_v11, %v4000_v10 }
0x279f   :  { %v3759_v60 = vadd.f32 1.0, %v5776_v15 }
0x27a0   :  { %5777 = vrcp.f32 %v3753_v57 }
0x27a1   :  { %5779 = vrcp.f32 %v3759_v60 }
0x27aa   :  { %v5778_v22 = vpop.eup %5777 }
0x27ab   :  { %v5780_v17 = vpop.eup %5779  ;;  %v3764_v7 = vmul.f32 %v5778_v22, %v3574_v59 }
0x27ac   :  { %v3775_v26 = vmul.f32 %v5780_v17, %v3585_v61 }
0x280e   :  { %v3767_v16 = vpop.permute.xlu1 %3766 }
0x280f   :  { %v3778_v43 = vpop.permute.xlu0 %3777  ;;  %v3769_v63 = vmul.f32 %v5778_v22, %v3767_v16 }
0x2810   :  { %v3780_v24 = vmul.f32 %v5780_v17, %v3778_v43  ;;  %v4007_v43 = vld [vmem:[%s6698_s6 + $0x48] sm:$0xff] }
0x2811   :  { %3771 = vrot.lane.b32.xlu1 %v3769_v63, %s5857_s14 }
0x2812   :  { %3782 = vrot.lane.b32.xlu0 %v3780_v24, %s5857_s14 }
0x2883   :  { %v3772_v2 = vpop.permute.xlu1 %3771 }
0x2884   :  { %v3783_v20 = vpop.permute.xlu0 %3782  ;;  %v3774_v51 = vadd.f32 %v3772_v2, %v3764_v7  ;;  %v4008_v7 = vld [vmem:[%s6698_s6 + $0x50] sm:$0xff] }
0x2885   :  { %v3785_v21 = vadd.f32 %v3783_v20, %v3775_v26  ;;  %v4009_v26 = vld [vmem:[%s6698_s6 + $0x58] sm:$0xff] }
0x2886   :  { %5781 = vtanh.f32 %v3774_v51  ;;  %v5508_v20 = vpack.c.bf16 %v4009_v26, %v4008_v7 }
0x2887   :  { %5783 = vtanh.f32 %v3785_v21 }
0x2890   :  { %v5782_v55 = vpop.eup %5781 }
0x2891   :  { %v5784_v28 = vpop.eup %5783  ;;  %3788 = vrot.lane.b32.xlu1 %v5782_v55, %s5857_s14 }
0x2892   :  { %3794 = vrot.lane.b32.xlu0 %v5784_v28, %s5857_s14  ;;  %v4012_v28 = vld [vmem:[%s6698_s6 + $0x70] sm:$0xff] }
0x2903   :  { %v3789_v13 = vpop.permute.xlu1 %3788 }
0x2904   :  { %v3795_v1 = vpop.permute.xlu0 %3794  ;;  %v3791_v45 = vmul.f32 %v5778_v22, %v3789_v13 }
0x2905   :  { %v3797_v25 = vmul.f32 %v5780_v17, %v3795_v1  ;;  %v4006_v17 = vld [vmem:[%s6698_s6 + $0x40] sm:$0xff] }
0x2906   :  { %3799 = vrot.lane.b32.xlu1 %v3791_v45, %s5858_s15  ;;  %v5505_v63 = vpack.c.bf16 %v4007_v43, %v4006_v17  ;;  %v4164_v1 = vld [vmem:[%s6697_s5] sm:$0xff]  ;;  %s5859_s5 = smov [#allocation5]  }
0x2907   :  { %3875 = vrot.lane.b32.xlu0 %v3797_v25, %s5858_s15  ;;  %s4332_s17 = sshll.u32 %s5859_s5, 4  ;;  %s4333_s17 = int_to_ptr.vmem [resolvable:$true] %s4332_s17 }
0x2908   :  { %p5830_p9 = scmp.lt.s32.totalorder %s4333_s17, %s4333_s17 }
0x2978   :  { %v3800_v23 = vpop.permute.xlu1 %3799 }
0x2979   :  { %v3876_v44 = vpop.permute.xlu0 %3875  ;;  %5193 = vmatmul.mubr.msk.f32.vlgmr.msra.gmra.mrb[42].mxu0 %vm82_vm0, %v3800_v23 }
0x297a   :  { %5204 = vmatmul.mubr.msk.f32.vlgmr.msra.gmra.mrb[50].mxu1 %vm82_vm0, %v3876_v44  ;;  %5214 = vmatprep.mubr.msk.f32.mxu0 %vm5855_vm1, %v5856_v32 }
0x297b   :  { %5225 = vmatprep.mubr.msk.f32.mxu1 %vm5855_vm1, %v5856_v32  ;;  %5494 = vmatpush3.bf16.msra.mxu0 %v5493_v12 }
0x297c   :  { %5500 = vmatpush3.bf16.msra.mxu1 %v5499_v9  ;;  %5495 = vmatprep.subr.bf16.mxu0 %v5854_v18 }
0x297d   :  { %5501 = vmatprep.subr.bf16.mxu1 %v5854_v18 }
0x297f   :  { %5497 = vmatpush3.bf16.msra.mxu0 %v5496_v47 }
0x2980   :  { %5503 = vmatpush3.bf16.msra.mxu1 %v5502_v49  ;;  %5504 = vmatprep.subr.bf16.mxu0 %v5854_v18 }
0x2981   :  { %5247 = vmatprep.subr.mxu1 %v5856_v32 }
0x2a4c   :  { %v3869_v30 = vpop.f32.mrb[42].mxu0 }
0x2a4d   :  { %v3873_v31 = vadd.f32 %v3869_v30, %v6436_v54  ;;  %v3945_v35 = vpop.f32.mrb[50].mxu1  ;;  %v5194_v19 = vpop.f32.mrb[43].mxu0 }
0x2a4e   :  { %v3949_v38 = vadd.f32 %v3945_v35, %v6418_v29  ;;  %v5205_v33 = vpop.f32.mrb[51].mxu1  ;;  %v4479_v35 = vld [vmem:[%s6699_s7] ss:$0 sm:$0xff]  ;;  %s5825_s7 = scalar_lea.vmem %s4333_s17, 32 }
0x2a4f   :  { %5785 = vtanh.f32 %v3873_v31  ;;  %v4474_v53 = vmul.f32 -1.442695, %v3873_v31  ;;  %v4249_v33 = vld [vmem:[%s6700_s8] sm:$0x3]  ;;  %p5826_p8 = scmp.ne.s32.totalorder %s4333_s17, %s5825_s7  ;;  %p5831_p10 = scmp.lt.s32.totalorder %s5825_s7, %s5825_s7 }
0x2a50   :  { %5787 = vtanh.f32 %v3949_v38  ;;  %v4475_v27 = vmul.f32 -1.442695, %v3949_v38 }
0x2a51   :  { %5789 = vpow2.f32 %v4474_v53  ;;  %p5832_p11 = por %p5831_p10, %p5830_p9 }
0x2a52   :  { %5791 = vpow2.f32 %v4475_v27 }
0x2a53   :  { %p5833_p12 = pnand %p5832_p11, %p5826_p8 }
0x2a59   :  { %v5786_v46 = vpop.eup %5785 }
0x2a5a   :  { %v5788_v36 = vpop.eup %5787  ;;  %3966 = vrot.lane.b32.xlu1 %v5786_v46, %s5857_s14 }
0x2a5b   :  { %3977 = vrot.lane.b32.xlu0 %v5788_v36, %s5857_s14  ;;  %v5790_v40 = vpop.eup %5789 }
0x2a5c   :  { %v5792_v42 = vpop.eup %5791  ;;  %v3953_v54 = vadd.f32 1.0, %v5790_v40 }
0x2a5d   :  { %v3959_v52 = vadd.f32 1.0, %v5792_v42 }
0x2a5e   :  { %5793 = vrcp.f32 %v3953_v54 }
0x2a5f   :  { %5795 = vrcp.f32 %v3959_v52 }
0x2a68   :  { %v5794_v29 = vpop.eup %5793 }
0x2a69   :  { %v5796_v56 = vpop.eup %5795  ;;  %v3964_v3 = vmul.f32 %v5794_v29, %v3774_v51  ;;  %v4010_v51 = vld [vmem:[%s6698_s6 + $0x60] sm:$0xff] }
0x2a6a   :  { %v3975_v4 = vmul.f32 %v5796_v56, %v3785_v21  ;;  %v4011_v21 = vld [vmem:[%s6698_s6 + $0x68] sm:$0xff] }
0x2a6b   :  { %v5511_v55 = vpack.c.bf16 %v4011_v21, %v4010_v51 }
0x2acc   :  { %v3967_v0 = vpop.permute.xlu1 %3966 }
0x2acd   :  { %v3978_v50 = vpop.permute.xlu0 %3977  ;;  %v3969_v59 = vmul.f32 %v5794_v29, %v3967_v0 }
0x2ace   :  { %v3980_v61 = vmul.f32 %v5796_v56, %v3978_v50 }
0x2acf   :  { %3971 = vrot.lane.b32.xlu1 %v3969_v59, %s5857_s14 }
0x2ad0   :  { %3982 = vrot.lane.b32.xlu0 %v3980_v61, %s5857_s14 }
0x2b41   :  { %v3972_v39 = vpop.permute.xlu1 %3971 }
0x2b42   :  { %v3983_v62 = vpop.permute.xlu0 %3982  ;;  %v3974_v58 = vadd.f32 %v3972_v39, %v3964_v3 }
0x2b43   :  { %v3985_v5 = vadd.f32 %v3983_v62, %v3975_v4 }
0x2b44   :  { %5797 = vtanh.f32 %v3974_v58 }
0x2b45   :  { %5799 = vtanh.f32 %v3985_v5 }
0x2b4e   :  { %v5798_v14 = vpop.eup %5797 }
0x2b4f   :  { %v5800_v15 = vpop.eup %5799  ;;  %3988 = vrot.lane.b32.xlu1 %v5798_v14, %s5857_s14 }
0x2b50   :  { %3994 = vrot.lane.b32.xlu0 %v5800_v15, %s5857_s14 }
0x2bc1   :  { %v3989_v57 = vpop.permute.xlu1 %3988 }
0x2bc2   :  { %v3995_v60 = vpop.permute.xlu0 %3994  ;;  %v3991_v22 = vmul.f32 %v5794_v29, %v3989_v57 }
0x2bc3   :  { %v3997_v16 = vmul.f32 %v5796_v56, %v3995_v60 }
0x2bc4   :  { %4090 = vrot.lane.b32.xlu1 %v3991_v22, %s5858_s15 }
0x2bc5   :  { %4015 = vrot.lane.b32.xlu0 %v3997_v16, %s5858_s15 }
0x2c36   :  { %v4091_v24 = vpop.permute.xlu1 %4090 }
0x2c37   :  { %v4016_v2 = vpop.permute.xlu0 %4015  ;;  %5226 = vmatmul.mubr.msk.f32.vlgmr.msra.gmra.mrb[52].mxu1 %vm82_vm0, %v4091_v24 }
0x2c38   :  { %5215 = vmatmul.mubr.msk.f32.vlgmr.msra.gmra.mrb[44].mxu0 %vm82_vm0, %v4016_v2  ;;  %5249 = vmatprep.mubr.msk.f32.mxu1 %vm5855_vm1, %v5856_v32 }
0x2c39   :  { %5506 = vmatpush3.bf16.msra.mxu0 %v5505_v63  ;;  %5244 = vmatprep.mubr.msk.f32.mxu0 %vm5855_vm1, %v5856_v32  ;;  %v4013_v32 = vld [vmem:[%s6698_s6 + $0x78] sm:$0xff] }
0x2c3a   :  { %5507 = vmatprep.subr.bf16.mxu0 %v5854_v18  ;;  %v5514_v13 = vpack.c.bf16 %v4013_v32, %v4012_v28 }
0x2c3d   :  { %5509 = vmatpush3.bf16.msra.mxu0 %v5508_v20 }
0x2c3e   :  { %5510 = vmatprep.subr.bf16.mxu0 %v5854_v18 }
0x2c41   :  { %5512 = vmatpush3.bf16.msra.mxu0 %v5511_v55 }
0x2c42   :  { %5513 = vmatprep.subr.bf16.mxu0 %v5854_v18 }
0x2c45   :  { %5515 = vmatpush3.bf16.msra.mxu0 %v5514_v13 }
0x2c48   :  { %5245 = vmatmul.mubr.msk.f32.vlgmr.msra.gmra.mrb[46].mxu0 %vm4165_vm2, %v4164_v1 }
0x2d0a   :  { %v4160_v45 = vpop.f32.mrb[52].mxu1 }
0x2d0b   :  { %v4085_v25 = vpop.f32.mrb[44].mxu0  ;;  %v5227_v23 = vpop.f32.mrb[53].mxu1 }
0x2d0c   :  { %v4161_v44 = vadd.f32 %v4160_v45, %v4085_v25  ;;  %v5216_v30 = vpop.f32.mrb[45].mxu0 }
0x2d1b   :  { %v4235_v31 = vpop.f32.mrb[46].mxu0 }
0x2d1c   :  { %v4239_v19 = vadd.f32 %v4235_v31, %v4161_v44  ;;  %v5246_v38 = vpop.f32.mrb[47].mxu0 }
0x2d1e   :  { %v4247_v18 = vadd.f32 %v4479_v35, %v4239_v19 }
0x2d20   :  { %5801 = vtanh.f32 %v4247_v18 }
0x2d2a   :  { %v5802_v46 = vpop.eup %5801 }
0x2d2b   :  { %5248 = vmatpush3.msra.mxu1 %v5802_v46 }
0x2d2c   :  { %5250 = vmatmul.mubr.msk.f32.vlgmr.msra.gmra.mrb[54].mxu1 %vm4250_vm3, %v4249_v33 }
0x2dff   :  { %v4320_v36 = vpop.f32.mrb[54].mxu1 }
0x2e00   :  { %v5251_v53 = vpop.f32.mrb[55].mxu1  ;;  %4325 = vst.msk [vmem:[#allocation5] sm:$0x3] %vm4324_vm4, %v4320_v36 }
0x2e01   :  { %5836 = shalt.err (!%p5833_p12)
}
0x2e02   :  { %s5837_s19 = scalar_lea.hbm %s6701_s9, 32 }
0x2e03   :  { %p5838_p13 = scmp.ne.s32.totalorder %s6701_s9, %s5837_s19  ;;  %p5841_p0 = scmp.lt.u32.totalorder %s5837_s19, %s6701_s9 }
0x2e05   :  { %p5843_p1 = pnand %p5841_p0, %p5838_p13 }
0x2e07   :  { %5846 = shalt.err (!%p5843_p1)
}
0x2e08   :  { %4335 = dma.vmem_to_hbm [thread:$0]  %s4333_s17, 32, %s6701_s9, [#allocation4]  }
0x2e09   :  { %5849 = dma.done.wait [#allocation4], 32  }
0x2e0a   :  { %5850 = vsyncadd [#allocation4], 4294967264 }
0x2e0b   :  { %4339 = vsyncpa [#allocation3], 1 }
0x2e0c   :  { %4340 = vsyncpa [#allocation4], 1 }

</bundles_post_ra>
